<compile_context>
chip_gen: v7x
topology: tpu7x:2x2x1
jax: 0.10.0
libtpu: 0.0.40
codegen_flags: <defaults>
</compile_context>

<pallas_src>
import functools

import jax
import jax.numpy as jnp
from jax.experimental import pallas as pl
from jax.experimental.pallas import tpu as pltpu


def _round_up(x, m):
    return ((x + m - 1) // m) * m


def rbm_forward_kernel(k, v_ref, w_ref, wt_ref, vb_ref, hb_ref, uh_ref, uv_ref, vk_ref):
    """One batch tile of the k-step Gibbs chain: v -> h1 -> (v_, h_) * k, writes final v_."""
    W = w_ref[...]      # (H_pad, V_pad) bf16, resident (single-buffered)
    WT = wt_ref[...]    # (V_pad, H_pad) bf16, resident (single-buffered)
    vb = vb_ref[...]    # (1, V_pad) f32
    hb = hb_ref[...]    # (1, H_pad) f32

    def _sample(logits_f32, u_f32):
        # sigmoid(x) > u  <=>  tanh(x/2) > 2u - 1  (same decision, single EUP op).
        return (jnp.tanh(0.5 * logits_f32) > (2.0 * u_f32 - 1.0)).astype(jnp.bfloat16)

    def _v_to_h(v_bf, u):
        # F.linear(v, W, h_bias) == v @ W.T + h_bias ; W.T supplied pre-transposed.
        logits = jnp.dot(v_bf, WT, preferred_element_type=jnp.float32) + hb
        return _sample(logits, u)

    def _h_to_v(h_bf, u):
        # F.linear(h, W.t(), v_bias) == h @ W + v_bias
        logits = jnp.dot(h_bf, W, preferred_element_type=jnp.float32) + vb
        return _sample(logits, u)

    v_s = v_ref[...]                       # (TB, V_pad) bf16, binary {0, 1}
    h = _v_to_h(v_s, uh_ref[0])
    for i in range(k):                     # k is a static Python int -> unrolled (k is small)
        v_s = _h_to_v(h, uv_ref[i])
        if i + 1 < k:                      # final h of the chain is never read -> skip dead matmul
            h = _v_to_h(v_s, uh_ref[i + 1])
    vk_ref[...] = v_s                      # already bf16 {0, 1}


def rbm_forward(v, W, v_bias, h_bias, *, k, seed=0, batch_tile=256):
    """Pallas equivalent of RBM.forward(v) -> (v, v_)."""
    assert k >= 1, "k must be >= 1 (the PyTorch reference is undefined for k == 0)"
    B, n_vis = v.shape
    n_hin = W.shape[0]

    # Lane-dense padding: feature dims to multiples of 128, batch to a multiple of 16.
    V_pad = _round_up(n_vis, 128)
    H_pad = _round_up(n_hin, 128)
    B16 = _round_up(B, 16)
    TB = min(_round_up(batch_tile, 16), B16)     # note: on v5e, batch_tile=128 already fills the MXU
    B_pad = _round_up(B16, TB)
    grid = (B_pad // TB,)

    # Zero-padded bf16 weights in both orientations stay resident in VMEM across the grid.
    # Padded rows/cols are zero, so padded (garbage) samples never influence real lanes.
    W_bf = jnp.zeros((H_pad, V_pad), jnp.bfloat16).at[:n_hin, :n_vis].set(W.astype(jnp.bfloat16))
    WT_bf = W_bf.T
    vb = jnp.zeros((1, V_pad), jnp.float32).at[0, :n_vis].set(v_bias.astype(jnp.float32))
    hb = jnp.zeros((1, H_pad), jnp.float32).at[0, :n_hin].set(h_bias.astype(jnp.float32))

    # Binary visibles travel as bf16 (exact for {0,1}) -> half the v / v_k HBM traffic.
    v_in = jnp.zeros((B_pad, V_pad), jnp.bfloat16).at[:B, :n_vis].set(v.astype(jnp.bfloat16))

    # Host-side Bernoulli uniforms (k per direction), tiled over the batch like v.
    key = jax.random.PRNGKey(seed)
    kh, kv = jax.random.split(key)
    u_h = jax.random.uniform(kh, (k, B_pad, H_pad), dtype=jnp.float32)
    u_v = jax.random.uniform(kv, (k, B_pad, V_pad), dtype=jnp.float32)

    # Explicit VMEM budget: double-buffered per-tile operands + single-buffered residents,
    # plus ~30% headroom for Mosaic scratch (default scoped limit is far below physical).
    vmem_needed = (
        4 * TB * V_pad                      # v in  (bf16, 2 buffers)
        + 4 * TB * V_pad                    # v_k out (bf16, 2 buffers)
        + 2 * H_pad * V_pad                 # W  (bf16, 1 buffer)
        + 2 * V_pad * H_pad                 # WT (bf16, 1 buffer)
        + 4 * (V_pad + H_pad)               # biases (f32)
        + 2 * 4 * k * TB * H_pad            # u_h (f32, 2 buffers)
        + 2 * 4 * k * TB * V_pad            # u_v (f32, 2 buffers)
    )
    vmem_limit = int(min(max(int(vmem_needed * 1.3) + (4 << 20), 32 << 20), 100 << 20))

    flops = int(2 * (2 * k) * B_pad * V_pad * H_pad)            # 2k matmuls
    transcendentals = int(k * B_pad * (V_pad + H_pad))          # one tanh per sampled unit
    bytes_accessed = int(
        2 * 2 * B_pad * V_pad               # v in + v_k out (bf16)
        + 2 * 2 * H_pad * V_pad             # W + W.T (bf16)
        + 4 * (V_pad + H_pad)               # biases
        + 4 * k * B_pad * (V_pad + H_pad)   # uniforms (f32)
    )

    kernel = functools.partial(rbm_forward_kernel, k)
    resident = dict(pipeline_mode=pl.Buffered(1))   # constant index_map -> single buffer

    v_k_pad = pl.pallas_call(
        kernel,
        out_shape=jax.ShapeDtypeStruct((B_pad, V_pad), jnp.bfloat16),
        grid_spec=pltpu.PrefetchScalarGridSpec(
            num_scalar_prefetch=0,
            grid=grid,
            in_specs=[
                pl.BlockSpec((TB, V_pad), lambda i: (i, 0)),                    # v (per batch tile)
                pl.BlockSpec((H_pad, V_pad), lambda i: (0, 0), **resident),     # W      (resident)
                pl.BlockSpec((V_pad, H_pad), lambda i: (0, 0), **resident),     # W.T    (resident)
                pl.BlockSpec((1, V_pad), lambda i: (0, 0), **resident),         # v_bias (resident)
                pl.BlockSpec((1, H_pad), lambda i: (0, 0), **resident),         # h_bias (resident)
                pl.BlockSpec((k, TB, H_pad), lambda i: (0, i, 0)),              # uniforms v->h
                pl.BlockSpec((k, TB, V_pad), lambda i: (0, i, 0)),              # uniforms h->v
            ],
            out_specs=pl.BlockSpec((TB, V_pad), lambda i: (i, 0)),
        ),
        compiler_params=pltpu.CompilerParams(
            dimension_semantics=("parallel",),
            vmem_limit_bytes=vmem_limit),
        cost_estimate=pl.CostEstimate(
            flops=flops, transcendentals=transcendentals, bytes_accessed=bytes_accessed),
    )(v_in, W_bf, WT_bf, vb, hb, u_h, u_v)

    v_k = v_k_pad[:B, :n_vis].astype(jnp.float32)
    return v, v_k


if __name__ == "__main__":
    # Scaled-down RBM shapes (n_vis=784, n_hin=500, k=5 in the reference).
    # Non-multiple-of-128 feature dims and a non-tile batch exercise the padding paths;
    # B=300 gives a 2-long batch grid with the default 256-row tile.
    B, n_vis, n_hin, k = 300, 200, 120, 3

    key = jax.random.PRNGKey(0)
    k_w, k_v = jax.random.split(key, 2)

    # __init__: W ~ 0.01 * randn(n_hin, n_vis), biases zero.
    W = 0.01 * jax.random.normal(k_w, (n_hin, n_vis), dtype=jnp.float32)
    v_bias = jnp.zeros((n_vis,), dtype=jnp.float32)
    h_bias = jnp.zeros((n_hin,), dtype=jnp.float32)

    # Binarized-image-like visible input.
    v = (jax.random.uniform(k_v, (B, n_vis)) > 0.5).astype(jnp.float32)

    v_out, v_k = rbm_forward(v, W, v_bias, h_bias, k=k, seed=42)
    jax.block_until_ready((v_out, v_k))

    assert v_out.shape == (B, n_vis) and v_k.shape == (B, n_vis)
    assert v_k.dtype == jnp.float32
    # Gibbs-sampled visibles are binary {0, 1}.
    assert bool(jnp.all((v_k == 0.0) | (v_k == 1.0)))

    print("KERNEL_OK")
</pallas_src>

<mosaic_0001>
module attributes {stable_mosaic.version = 11 : i64} {
  func.func @rbm_forward_kernel(%arg0: i32, %arg1: memref<256x256xbf16, #tpu.memory_space<vmem>>, %arg2: memref<128x256xbf16, #tpu.memory_space<vmem>>, %arg3: memref<256x128xbf16, #tpu.memory_space<vmem>>, %arg4: memref<1x256xf32, #tpu.memory_space<vmem>>, %arg5: memref<1x128xf32, #tpu.memory_space<vmem>>, %arg6: memref<3x256x128xf32, #tpu.memory_space<vmem>>, %arg7: memref<3x256x256xf32, #tpu.memory_space<vmem>>, %arg8: memref<256x256xbf16, #tpu.memory_space<vmem>>) attributes {dimension_semantics = [#tpu.dimension_semantics<parallel>], iteration_bounds = array<i64: 2>, scalar_prefetch = 0 : i64, scratch_operands = 0 : i64, tpu.core_type = #tpu.core_type<tc>, window_params = [{transform_indices = @transform_0, window_bounds = array<i64: 256, 256>}, {pipeline_mode = #tpu.pipeline_mode<synchronous>, transform_indices = @transform_1, window_bounds = array<i64: 128, 256>}, {pipeline_mode = #tpu.pipeline_mode<synchronous>, transform_indices = @transform_2, window_bounds = array<i64: 256, 128>}, {pipeline_mode = #tpu.pipeline_mode<synchronous>, transform_indices = @transform_3, window_bounds = array<i64: 1, 256>}, {pipeline_mode = #tpu.pipeline_mode<synchronous>, transform_indices = @transform_4, window_bounds = array<i64: 1, 128>}, {transform_indices = @transform_5, window_bounds = array<i64: 3, 256, 128>}, {transform_indices = @transform_6, window_bounds = array<i64: 3, 256, 256>}, {transform_indices = @transform_7, window_bounds = array<i64: 256, 256>}]} {
    %c0 = arith.constant 0 : index
    %c0_0 = arith.constant 0 : index
    %0 = vector.load %arg2[%c0, %c0_0] : memref<128x256xbf16, #tpu.memory_space<vmem>>, vector<128x256xbf16>
    %c0_1 = arith.constant 0 : index
    %c0_2 = arith.constant 0 : index
    %1 = vector.load %arg3[%c0_1, %c0_2] : memref<256x128xbf16, #tpu.memory_space<vmem>>, vector<256x128xbf16>
    %c0_3 = arith.constant 0 : index
    %c0_4 = arith.constant 0 : index
    %2 = vector.load %arg4[%c0_3, %c0_4] : memref<1x256xf32, #tpu.memory_space<vmem>>, vector<1x256xf32>
    %c0_5 = arith.constant 0 : index
    %c0_6 = arith.constant 0 : index
    %3 = vector.load %arg5[%c0_5, %c0_6] : memref<1x128xf32, #tpu.memory_space<vmem>>, vector<1x128xf32>
    %c0_7 = arith.constant 0 : index
    %c0_8 = arith.constant 0 : index
    %4 = vector.load %arg1[%c0_7, %c0_8] : memref<256x256xbf16, #tpu.memory_space<vmem>>, vector<256x256xbf16>
    %c0_9 = arith.constant 0 : index
    %c0_10 = arith.constant 0 : index
    %c0_11 = arith.constant 0 : index
    %5 = vector.load %arg6[%c0_9, %c0_10, %c0_11] : memref<3x256x128xf32, #tpu.memory_space<vmem>>, vector<1x256x128xf32>
    %6 = vector.shape_cast %5 : vector<1x256x128xf32> to vector<256x128xf32>
    %cst = arith.constant dense<0.000000e+00> : vector<256x128xf32>
    %7 = tpu.matmul %4, %1, %cst {dimension_numbers = #tpu.dot_dimension_numbers<[1], [0], [0], [1], [0, 0, 1, 1], [], []>} : vector<256x256xbf16>, vector<256x128xbf16>, vector<256x128xf32> -> vector<256x128xf32>
    %8 = vector.broadcast %3 : vector<1x128xf32> to vector<256x128xf32>
    %9 = arith.addf %7, %8 : vector<256x128xf32>
    %cst_12 = arith.constant 5.000000e-01 : f32
    %10 = vector.broadcast %cst_12 : f32 to vector<256x128xf32>
    %11 = arith.mulf %10, %9 : vector<256x128xf32>
    %12 = math.tanh %11 : vector<256x128xf32>
    %cst_13 = arith.constant 2.000000e+00 : f32
    %13 = vector.broadcast %cst_13 : f32 to vector<256x128xf32>
    %14 = arith.mulf %13, %6 : vector<256x128xf32>
    %cst_14 = arith.constant 1.000000e+00 : f32
    %15 = vector.broadcast %cst_14 : f32 to vector<256x128xf32>
    %16 = arith.subf %14, %15 : vector<256x128xf32>
    %17 = arith.cmpf ogt, %12, %16 : vector<256x128xf32>
    %18 = arith.extui %17 : vector<256x128xi1> to vector<256x128xi32>
    %19 = arith.sitofp %18 : vector<256x128xi32> to vector<256x128xf32>
    %20 = arith.truncf %19 : vector<256x128xf32> to vector<256x128xbf16>
    %c0_15 = arith.constant 0 : index
    %c0_16 = arith.constant 0 : index
    %c0_17 = arith.constant 0 : index
    %21 = vector.load %arg7[%c0_15, %c0_16, %c0_17] : memref<3x256x256xf32, #tpu.memory_space<vmem>>, vector<1x256x256xf32>
    %22 = vector.shape_cast %21 : vector<1x256x256xf32> to vector<256x256xf32>
    %cst_18 = arith.constant dense<0.000000e+00> : vector<256x256xf32>
    %23 = tpu.matmul %20, %0, %cst_18 {dimension_numbers = #tpu.dot_dimension_numbers<[1], [0], [0], [1], [0, 0, 1, 1], [], []>} : vector<256x128xbf16>, vector<128x256xbf16>, vector<256x256xf32> -> vector<256x256xf32>
    %24 = vector.broadcast %2 : vector<1x256xf32> to vector<256x256xf32>
    %25 = arith.addf %23, %24 : vector<256x256xf32>
    %cst_19 = arith.constant 5.000000e-01 : f32
    %26 = vector.broadcast %cst_19 : f32 to vector<256x256xf32>
    %27 = arith.mulf %26, %25 : vector<256x256xf32>
    %28 = math.tanh %27 : vector<256x256xf32>
    %cst_20 = arith.constant 2.000000e+00 : f32
    %29 = vector.broadcast %cst_20 : f32 to vector<256x256xf32>
    %30 = arith.mulf %29, %22 : vector<256x256xf32>
    %cst_21 = arith.constant 1.000000e+00 : f32
    %31 = vector.broadcast %cst_21 : f32 to vector<256x256xf32>
    %32 = arith.subf %30, %31 : vector<256x256xf32>
    %33 = arith.cmpf ogt, %28, %32 : vector<256x256xf32>
    %34 = arith.extui %33 : vector<256x256xi1> to vector<256x256xi32>
    %35 = arith.sitofp %34 : vector<256x256xi32> to vector<256x256xf32>
    %36 = arith.truncf %35 : vector<256x256xf32> to vector<256x256xbf16>
    %c1 = arith.constant 1 : index
    %c0_22 = arith.constant 0 : index
    %c0_23 = arith.constant 0 : index
    %37 = vector.load %arg6[%c1, %c0_22, %c0_23] : memref<3x256x128xf32, #tpu.memory_space<vmem>>, vector<1x256x128xf32>
    %38 = vector.shape_cast %37 : vector<1x256x128xf32> to vector<256x128xf32>
    %cst_24 = arith.constant dense<0.000000e+00> : vector<256x128xf32>
    %39 = tpu.matmul %36, %1, %cst_24 {dimension_numbers = #tpu.dot_dimension_numbers<[1], [0], [0], [1], [0, 0, 1, 1], [], []>} : vector<256x256xbf16>, vector<256x128xbf16>, vector<256x128xf32> -> vector<256x128xf32>
    %40 = vector.broadcast %3 : vector<1x128xf32> to vector<256x128xf32>
    %41 = arith.addf %39, %40 : vector<256x128xf32>
    %cst_25 = arith.constant 5.000000e-01 : f32
    %42 = vector.broadcast %cst_25 : f32 to vector<256x128xf32>
    %43 = arith.mulf %42, %41 : vector<256x128xf32>
    %44 = math.tanh %43 : vector<256x128xf32>
    %cst_26 = arith.constant 2.000000e+00 : f32
    %45 = vector.broadcast %cst_26 : f32 to vector<256x128xf32>
    %46 = arith.mulf %45, %38 : vector<256x128xf32>
    %cst_27 = arith.constant 1.000000e+00 : f32
    %47 = vector.broadcast %cst_27 : f32 to vector<256x128xf32>
    %48 = arith.subf %46, %47 : vector<256x128xf32>
    %49 = arith.cmpf ogt, %44, %48 : vector<256x128xf32>
    %50 = arith.extui %49 : vector<256x128xi1> to vector<256x128xi32>
    %51 = arith.sitofp %50 : vector<256x128xi32> to vector<256x128xf32>
    %52 = arith.truncf %51 : vector<256x128xf32> to vector<256x128xbf16>
    %c1_28 = arith.constant 1 : index
    %c0_29 = arith.constant 0 : index
    %c0_30 = arith.constant 0 : index
    %53 = vector.load %arg7[%c1_28, %c0_29, %c0_30] : memref<3x256x256xf32, #tpu.memory_space<vmem>>, vector<1x256x256xf32>
    %54 = vector.shape_cast %53 : vector<1x256x256xf32> to vector<256x256xf32>
    %cst_31 = arith.constant dense<0.000000e+00> : vector<256x256xf32>
    %55 = tpu.matmul %52, %0, %cst_31 {dimension_numbers = #tpu.dot_dimension_numbers<[1], [0], [0], [1], [0, 0, 1, 1], [], []>} : vector<256x128xbf16>, vector<128x256xbf16>, vector<256x256xf32> -> vector<256x256xf32>
    %56 = vector.broadcast %2 : vector<1x256xf32> to vector<256x256xf32>
    %57 = arith.addf %55, %56 : vector<256x256xf32>
    %cst_32 = arith.constant 5.000000e-01 : f32
    %58 = vector.broadcast %cst_32 : f32 to vector<256x256xf32>
    %59 = arith.mulf %58, %57 : vector<256x256xf32>
    %60 = math.tanh %59 : vector<256x256xf32>
    %cst_33 = arith.constant 2.000000e+00 : f32
    %61 = vector.broadcast %cst_33 : f32 to vector<256x256xf32>
    %62 = arith.mulf %61, %54 : vector<256x256xf32>
    %cst_34 = arith.constant 1.000000e+00 : f32
    %63 = vector.broadcast %cst_34 : f32 to vector<256x256xf32>
    %64 = arith.subf %62, %63 : vector<256x256xf32>
    %65 = arith.cmpf ogt, %60, %64 : vector<256x256xf32>
    %66 = arith.extui %65 : vector<256x256xi1> to vector<256x256xi32>
    %67 = arith.sitofp %66 : vector<256x256xi32> to vector<256x256xf32>
    %68 = arith.truncf %67 : vector<256x256xf32> to vector<256x256xbf16>
    %c2 = arith.constant 2 : index
    %c0_35 = arith.constant 0 : index
    %c0_36 = arith.constant 0 : index
    %69 = vector.load %arg6[%c2, %c0_35, %c0_36] : memref<3x256x128xf32, #tpu.memory_space<vmem>>, vector<1x256x128xf32>
    %70 = vector.shape_cast %69 : vector<1x256x128xf32> to vector<256x128xf32>
    %cst_37 = arith.constant dense<0.000000e+00> : vector<256x128xf32>
    %71 = tpu.matmul %68, %1, %cst_37 {dimension_numbers = #tpu.dot_dimension_numbers<[1], [0], [0], [1], [0, 0, 1, 1], [], []>} : vector<256x256xbf16>, vector<256x128xbf16>, vector<256x128xf32> -> vector<256x128xf32>
    %72 = vector.broadcast %3 : vector<1x128xf32> to vector<256x128xf32>
    %73 = arith.addf %71, %72 : vector<256x128xf32>
    %cst_38 = arith.constant 5.000000e-01 : f32
    %74 = vector.broadcast %cst_38 : f32 to vector<256x128xf32>
    %75 = arith.mulf %74, %73 : vector<256x128xf32>
    %76 = math.tanh %75 : vector<256x128xf32>
    %cst_39 = arith.constant 2.000000e+00 : f32
    %77 = vector.broadcast %cst_39 : f32 to vector<256x128xf32>
    %78 = arith.mulf %77, %70 : vector<256x128xf32>
    %cst_40 = arith.constant 1.000000e+00 : f32
    %79 = vector.broadcast %cst_40 : f32 to vector<256x128xf32>
    %80 = arith.subf %78, %79 : vector<256x128xf32>
    %81 = arith.cmpf ogt, %76, %80 : vector<256x128xf32>
    %82 = arith.extui %81 : vector<256x128xi1> to vector<256x128xi32>
    %83 = arith.sitofp %82 : vector<256x128xi32> to vector<256x128xf32>
    %84 = arith.truncf %83 : vector<256x128xf32> to vector<256x128xbf16>
    %c2_41 = arith.constant 2 : index
    %c0_42 = arith.constant 0 : index
    %c0_43 = arith.constant 0 : index
    %85 = vector.load %arg7[%c2_41, %c0_42, %c0_43] : memref<3x256x256xf32, #tpu.memory_space<vmem>>, vector<1x256x256xf32>
    %86 = vector.shape_cast %85 : vector<1x256x256xf32> to vector<256x256xf32>
    %cst_44 = arith.constant dense<0.000000e+00> : vector<256x256xf32>
    %87 = tpu.matmul %84, %0, %cst_44 {dimension_numbers = #tpu.dot_dimension_numbers<[1], [0], [0], [1], [0, 0, 1, 1], [], []>} : vector<256x128xbf16>, vector<128x256xbf16>, vector<256x256xf32> -> vector<256x256xf32>
    %88 = vector.broadcast %2 : vector<1x256xf32> to vector<256x256xf32>
    %89 = arith.addf %87, %88 : vector<256x256xf32>
    %cst_45 = arith.constant 5.000000e-01 : f32
    %90 = vector.broadcast %cst_45 : f32 to vector<256x256xf32>
    %91 = arith.mulf %90, %89 : vector<256x256xf32>
    %92 = math.tanh %91 : vector<256x256xf32>
    %cst_46 = arith.constant 2.000000e+00 : f32
    %93 = vector.broadcast %cst_46 : f32 to vector<256x256xf32>
    %94 = arith.mulf %93, %86 : vector<256x256xf32>
    %cst_47 = arith.constant 1.000000e+00 : f32
    %95 = vector.broadcast %cst_47 : f32 to vector<256x256xf32>
    %96 = arith.subf %94, %95 : vector<256x256xf32>
    %97 = arith.cmpf ogt, %92, %96 : vector<256x256xf32>
    %98 = arith.extui %97 : vector<256x256xi1> to vector<256x256xi32>
    %99 = arith.sitofp %98 : vector<256x256xi32> to vector<256x256xf32>
    %100 = arith.truncf %99 : vector<256x256xf32> to vector<256x256xbf16>
    %c0_48 = arith.constant 0 : index
    %c0_49 = arith.constant 0 : index
    %101 = vector.load %arg8[%c0_48, %c0_49] : memref<256x256xbf16, #tpu.memory_space<vmem>>, vector<256x256xbf16>
    tpu.vector_store %arg8[%c0_48, %c0_49], %100 {strides = array<i32>} : memref<256x256xbf16, #tpu.memory_space<vmem>>, vector<256x256xbf16>,
    return
  }
  func.func @transform_0(%arg0: i32) -> (i32, i32) {
    %c0_i32 = arith.constant 0 : i32
    %c0_i32_0 = arith.constant 0 : i32
    return %arg0, %c0_i32 : i32, i32
  }
  func.func @transform_1(%arg0: i32) -> (i32, i32) {
    %c0_i32 = arith.constant 0 : i32
    %c0_i32_0 = arith.constant 0 : i32
    %c0_i32_1 = arith.constant 0 : i32
    return %c0_i32, %c0_i32_0 : i32, i32
  }
  func.func @transform_2(%arg0: i32) -> (i32, i32) {
    %c0_i32 = arith.constant 0 : i32
    %c0_i32_0 = arith.constant 0 : i32
    %c0_i32_1 = arith.constant 0 : i32
    return %c0_i32, %c0_i32_0 : i32, i32
  }
  func.func @transform_3(%arg0: i32) -> (i32, i32) {
    %c0_i32 = arith.constant 0 : i32
    %c0_i32_0 = arith.constant 0 : i32
    %c0_i32_1 = arith.constant 0 : i32
    return %c0_i32, %c0_i32_0 : i32, i32
  }
  func.func @transform_4(%arg0: i32) -> (i32, i32) {
    %c0_i32 = arith.constant 0 : i32
    %c0_i32_0 = arith.constant 0 : i32
    %c0_i32_1 = arith.constant 0 : i32
    return %c0_i32, %c0_i32_0 : i32, i32
  }
  func.func @transform_5(%arg0: i32) -> (i32, i32, i32) {
    %c0_i32 = arith.constant 0 : i32
    %c0_i32_0 = arith.constant 0 : i32
    %c0_i32_1 = arith.constant 0 : i32
    return %c0_i32, %arg0, %c0_i32_0 : i32, i32, i32
  }
  func.func @transform_6(%arg0: i32) -> (i32, i32, i32) {
    %c0_i32 = arith.constant 0 : i32
    %c0_i32_0 = arith.constant 0 : i32
    %c0_i32_1 = arith.constant 0 : i32
    return %c0_i32, %arg0, %c0_i32_0 : i32, i32, i32
  }
  func.func @transform_7(%arg0: i32) -> (i32, i32) {
    %c0_i32 = arith.constant 0 : i32
    %c0_i32_0 = arith.constant 0 : i32
    return %arg0, %c0_i32 : i32, i32
  }
}

</mosaic_0001>

<bundles_post_ra>
// kernel: tpu_custom_call.1
= control target key start
LH: loop header
LB: loop body
LE: loop exit
PB: predicated region body
PF: predicated region fallthrough
CT: control target
= control target key end

     0   :  { %s8679_s0 = inlined_call_operand.hbm [shape: bf16[512,256], index: 0, kind: input, shape index: {}]   ;;  %s8680_s1 = inlined_call_operand.hbm [shape: bf16[128,256], index: 1, kind: input, shape index: {}]   ;;  %s8681_s2 = inlined_call_operand.hbm [shape: bf16[256,128], index: 2, kind: input, shape index: {}]   ;;  %s8682_s3 = inlined_call_operand.hbm [shape: f32[1,256], index: 3, kind: input, shape index: {}]   ;;  %s8683_s4 = inlined_call_operand.hbm [shape: f32[1,128], index: 4, kind: input, shape index: {}]   ;;  %s8684_s5 = inlined_call_operand.hbm [shape: f32[3,512,128], index: 5, kind: input, shape index: {}]   ;;  %s8685_s6 = inlined_call_operand.hbm [shape: f32[3,512,256], index: 6, kind: input, shape index: {}]   ;;  %s8686_s7 = inlined_call_operand.hbm [shape: bf16[512,256], index: 7, kind: output, shape index: {}]  }
   0x1   :  { %8696 = sst [smem:[#allocation30_spill]] %s8680_s1 }
   0x2   :  { %12 = vsyncpa [#allocation3], 0 }
   0x3   :  { %14 = vsyncpa [#allocation3 + $0x1], 0 }
   0x4   :  { %15 = vsyncpa [#allocation6], 0 }
   0x5   :  { %16 = vsyncpa [#allocation9], 0 }
   0x6   :  { %17 = vsyncpa [#allocation12], 0 }
   0x7   :  { %19 = vsyncpa [#allocation12 + $0x1], 0 }
   0x8   :  { %20 = vsyncpa [#allocation4], 0 }
   0x9   :  { %22 = vsyncpa [#allocation4 + $0x1], 0  ;;  %s7404_s24 = smov 0   ;;  %s7406_s25 = smov 0  }
   0xa   :  { %s7408_s26 = smov 0   ;;  %s7410_s27 = smov 0  }
   0xb LB: > { %8697 = sst [smem:[#allocation26_spill]] %s7321_s24  ;;  %s7425_s28 = sadd.s32 4294967295, %s7333_s27   ;;  %s7333_s27 = sphi %s7410_s27, %s8720_s27   ;;  %s7329_s26 = sphi %s7408_s26, %s8724_s26   ;;  %s7325_s25 = sphi %s7406_s25, %s8723_s25   ;;  %s7321_s24 = sphi %s7404_s24, %s8722_s24  }
   0xc   : > { %s4795_s29 = sadd.s32 4294967294, %s7333_s27   ;;  %s7429_s30 = sadd.s32 1, %s7333_s27  }
   0xd   : > { %8698 = sst [smem:[#allocation27_spill]] %s7429_s30  ;;  %s35_s8 = sadd.s32 1, %s7329_s26 }
   0xe   : > { %s32_s9 = ssub.s32 %s7333_s27, %s7429_s30  ;;  %p42_p0 = scmp.ne.s32.totalorder %s7329_s26, %s7325_s25 }
   0xf   : > { %p33_p1 = scmp.eq.s32.totalorder %s32_s9, 0  ;;  %p43_p2 = scmp.eq.s32.totalorder %s7333_s27, 0 }
  0x10   : > { %p48_p3 = scmp.ne.s32.totalorder %s7325_s25, %s7321_s24  ;;  %p8687_p4 = scmp.eq.s32.totalorder %s7425_s28, 0 }
  0x11   : > { %s7441_s10 = scalar_select %p33_p1, %s7329_s26, %s35_s8  }
  0x12   : > { %p7443_p5 = por %p43_p2, %p42_p0  ;;  %p7449_p6 = por %p8687_p4, %p48_p3 }
  0x13   : > { %8699 = sst [smem:[#allocation28_spill]] %s7441_s10  ;;  %p208_p7 = scmp.eq.s32.totalorder %s7425_s28, 1 }
  0x14   : > { %s8700_s11 = scalar_select %p7443_p5, 1, 0 }
  0x15   : > { %s8701_s12 = scalar_select %p7449_p6, 1, 0 }
  0x16   : > { %p214_p8 = scmp.eq.s32.totalorder %s4795_s29, 1  ;;  %p4796_p9 = scmp.ge.s32.totalorder %s7333_s27, 1 }
  0x17   : > { %p221_p10 = scmp.lt.s32.totalorder %s7333_s27, 3  ;;  %p7456_p11 = por %p208_p7, %p42_p0 }
  0x18   : > { %p7460_p12 = por %p214_p8, %p48_p3  ;;  %s7335_s16 = smov [#allocation5]  }
  0x19   : > { %s8702_s13 = scalar_select %p7456_p11, 1, 0 }
  0x1a   : > { %s8703_s14 = scalar_select %p7460_p12, 1, 0 }
  0x1b   : > { %p7464_p13 = pnand %p4796_p9, %p221_p10  ;;  %s233_s17 = sshll.u32 %s7335_s16, 4  ;;  %s234_s17 = int_to_ptr.vmem [resolvable:$true] %s233_s17 }
  0x1c   : > { %8704 = sst [smem:[#allocation29_spill]] %s8703_s14  ;;  %s7336_s19 = smov [#allocation8]  }
  0x1d   : > { %s8705_s15 = scalar_select %p7464_p13, 1, 0 }
  0x1e   : > { %p6334_p1 = pneg %p7464_p13  ;;  %s260_s20 = sshll.u32 %s7336_s19, 4  ;;  %s7476_s20 = int_to_ptr.vmem [resolvable:$true] %s260_s20 }
  0x1f   : > { %s8707_s1 = sld [smem:[#allocation30_spill]] }
  0x20   : > { %p7472_p2 = pnand %p6334_p1, %p8687_p4 }
  0x22   : > { %p7486_p3 = pneg %p7472_p2 }
  0x25   : > { %s7115_s23 = scalar_lea.hbm %s8707_s1, 2048 }
  0x26   : > { %p7116_p0 = scmp.ne.s32.totalorder %s8707_s1, %s7115_s23  ;;  %p7122_p9 = scmp.lt.u32.totalorder %s7115_s23, %s8707_s1 }
  0x28   : > { %p7118_p7 = pnand %p7486_p3, %p7116_p0 }
  0x2a   : > { %p7119_p8 = pneg %p7118_p7 }
  0x2c   : > { %p7124_p10 = pnand %p7122_p9, %p7119_p8 }
  0x2e   : > { %7127 = shalt.err (!%p7124_p10)
}
  0x2f   : > { %s7128_s21 = scalar_lea.vmem %s234_s17, 2048  ;;  %p7136_p11 = scmp.lt.s32.totalorder %s234_s17, %s234_s17 }
  0x30   : > { %p7129_p1 = scmp.ne.s32.totalorder %s234_s17, %s7128_s21  ;;  %p7137_p6 = scmp.lt.s32.totalorder %s7128_s21, %s7128_s21 }
  0x32   : > { %p7131_p4 = pnand %p7129_p1, %p7486_p3  ;;  %p7138_p13 = por %p7137_p6, %p7136_p11 }
  0x34   : > { %p7132_p12 = pneg %p7131_p4 }
  0x36   : > { %p7139_p5 = pnand %p7138_p13, %p7132_p12 }
  0x38   : > { %7142 = shalt.err (!%p7139_p5)
}
  0x39   : > { %s7337_s22 = smov 128   ;;  %s7338_s29 = smov 8  }
  0x3a   : > { %6337 = dma.hbm_to_vmem [thread:$0]  (!%p7472_p2), %s8707_s1, 2048, %s234_s17, [#allocation6], %s7337_s22, %s7337_s22, %s7338_s29  }
  0x3b   : > { %s7143_s10 = scalar_lea.hbm %s8682_s3, 32 }
  0x3c   : > { %p7144_p4 = scmp.ne.s32.totalorder %s8682_s3, %s7143_s10  ;;  %p7150_p11 = scmp.lt.u32.totalorder %s7143_s10, %s8682_s3 }
  0x3e   : > { %p7146_p6 = pnand %p7144_p4, %p7486_p3 }
  0x40   : > { %p7147_p5 = pneg %p7146_p6 }
  0x42   : > { %p7152_p12 = pnand %p7150_p11, %p7147_p5 }
  0x44   : > { %7155 = shalt.err (!%p7152_p12)
}
  0x45   : > { %s7156_s17 = scalar_lea.vmem %s7476_s20, 32  ;;  %p7164_p8 = scmp.lt.s32.totalorder %s7476_s20, %s7476_s20 }
  0x46   : > { %p7157_p13 = scmp.ne.s32.totalorder %s7476_s20, %s7156_s17  ;;  %p7165_p9 = scmp.lt.s32.totalorder %s7156_s17, %s7156_s17 }
  0x48   : > { %p7159_p0 = pnand %p7157_p13, %p7486_p3  ;;  %p7166_p10 = por %p7165_p9, %p7164_p8 }
  0x4a   : > { %p7160_p7 = pneg %p7159_p0 }
  0x4c   : > { %p7167_p1 = pnand %p7166_p10, %p7160_p7 }
  0x4e   : > { %7170 = shalt.err (!%p7167_p1)
}
  0x4f   : > { %6343 = dma.hbm_to_vmem [thread:$0]  (!%p7472_p2), %s8682_s3, 32, %s7476_s20, [#allocation9]  }
  0x50   : > { %s7339_s10 = smov [#allocation7]   ;;  %s7171_s8 = scalar_lea.hbm %s8681_s2, 2048 }
  0x51   : > { %s246_s14 = sshll.u32 %s7339_s10, 4  ;;  %p7172_p4 = scmp.ne.s32.totalorder %s8681_s2, %s7171_s8  ;;  %s247_s14 = int_to_ptr.vmem [resolvable:$true] %s246_s14 }
  0x52   : > { %p7178_p11 = scmp.lt.u32.totalorder %s7171_s8, %s8681_s2 }
  0x53   : > { %p7174_p6 = pnand %p7172_p4, %p7486_p3 }
  0x55   : > { %p7175_p5 = pneg %p7174_p6 }
  0x57   : > { %p7180_p12 = pnand %p7178_p11, %p7175_p5 }
  0x59   : > { %7183 = shalt.err (!%p7180_p12)
}
  0x5a   : > { %s7184_s20 = scalar_lea.vmem %s247_s14, 2048  ;;  %p7192_p8 = scmp.lt.s32.totalorder %s247_s14, %s247_s14 }
  0x5b   : > { %p7185_p13 = scmp.ne.s32.totalorder %s247_s14, %s7184_s20  ;;  %p7193_p9 = scmp.lt.s32.totalorder %s7184_s20, %s7184_s20 }
  0x5d   : > { %p7187_p0 = pnand %p7185_p13, %p7486_p3  ;;  %p7194_p10 = por %p7193_p9, %p7192_p8 }
  0x5f   : > { %p7188_p7 = pneg %p7187_p0 }
  0x61   : > { %p7195_p1 = pnand %p7194_p10, %p7188_p7 }
  0x63   : > { %7198 = shalt.err (!%p7195_p1)
}
  0x64   : > { %s7340_s17 = smov 64   ;;  %s7341_s24 = smov 4  }
  0x65   : > { %6340 = dma.hbm_to_vmem [thread:$0]  (!%p7472_p2), %s8681_s2, 2048, %s247_s14, [#allocation6], %s7340_s17, %s7340_s17, %s7341_s24  }
  0x66   : > { %s7342_s22 = smov [#allocation10]   ;;  %s7199_s16 = scalar_lea.hbm %s8683_s4, 16 }
  0x67   : > { %s271_s29 = sshll.u32 %s7342_s22, 4  ;;  %p7200_p4 = scmp.ne.s32.totalorder %s8683_s4, %s7199_s16  ;;  %s272_s29 = int_to_ptr.vmem [resolvable:$true] %s271_s29 }
  0x68   : > { %p7206_p11 = scmp.lt.u32.totalorder %s7199_s16, %s8683_s4 }
  0x69   : > { %p7202_p6 = pnand %p7200_p4, %p7486_p3 }
  0x6b   : > { %p7203_p5 = pneg %p7202_p6 }
  0x6d   : > { %p7208_p12 = pnand %p7206_p11, %p7203_p5 }
  0x6f   : > { %7211 = shalt.err (!%p7208_p12)
}
  0x70   : > { %s7212_s14 = scalar_lea.vmem %s272_s29, 16  ;;  %s7219_s17 = scalar_lea.vmem %s272_s29, 32 }
  0x71   : > { %p7213_p13 = scmp.ne.s32.totalorder %s272_s29, %s7212_s14  ;;  %p7220_p8 = scmp.lt.s32.totalorder %s272_s29, %s272_s29 }
  0x72   : > { %p7221_p9 = scmp.lt.s32.totalorder %s7219_s17, %s7212_s14 }
  0x73   : > { %p7215_p0 = pnand %p7213_p13, %p7486_p3 }
  0x74   : > { %p7222_p10 = por %p7221_p9, %p7220_p8 }
  0x75   : > { %p7216_p7 = pneg %p7215_p0 }
  0x77   : > { %p7223_p1 = pnand %p7222_p10, %p7216_p7 }
  0x79   : > { %7226 = shalt.err (!%p7223_p1)
}
  0x7a   : > { %6346 = dma.hbm_to_vmem [thread:$0]  (!%p7472_p2), %s8683_s4, 16, %s272_s29, [#allocation9]  }
  0x7b   : > { %p4801_p4 = scmp.ge.s32.totalorder %s7333_s27, 2 }
  0x7c   : > { %s7565_s1 = sand.u32 (!%p4801_p4), 1, %s7329_s26   ;;  %s5918_s9 = sshll.u32 (!%p4801_p4), %s7333_s27, 12 }
  0x7d   : > { %278 = sbr.rel (%p4801_p4) target bundleno = 178 (0xb2), region = 32  ;;  %s4802_s10 = sshll.u32 (!%p4801_p4), %s7565_s1, 8 }
  0x7e   : > { %s7574_s29 = scalar_lea.hbm (!%p4801_p4), %s8679_s0, %s5918_s9  ;;  %s286_s8 = scalar_lea.vmem (!%p4801_p4), [#allocation2], %s4802_s10 }
  0x7f   : > { %s294_s23 = sshll.u32 (!%p4801_p4), %s286_s8, 4  ;;  %s283_s16 = scalar_lea.sflag (!%p4801_p4), [#allocation3], %s7565_s1  ;;  %s7576_s23 = int_to_ptr.vmem [resolvable:$true] %s294_s23 }
  0x80   : > { %s7227_s19 = scalar_lea.hbm (!%p4801_p4), %s7574_s29, 4096  ;;  %p8709_p3 = scmp.ne.s32.totalorder (!%p4801_p4), %s8700_s11, 0 }
  0x81   : > { %p7228_p2 = scmp.ne.s32.totalorder (!%p4801_p4), %s7574_s29, %s7227_s19  ;;  %s7231_s14 = scalar_lea.hbm (!%p4801_p4), %s8679_s0, 8192 }
  0x82   : > { %p7232_p11 = scmp.lt.u32.totalorder (!%p4801_p4), %s7574_s29, %s8679_s0  ;;  %p7233_p12 = scmp.lt.u32.totalorder (!%p4801_p4), %s7231_s14, %s7227_s19 }
  0x83   : > { %p7229_p6 = pnand (!%p4801_p4), %p7228_p2, %p8709_p3  ;;  %p7235_p0 = scmp.lt.u32.totalorder (!%p4801_p4), %s7227_s19, %s7574_s29 }
  0x84   : > { %p7234_p13 = por %p7233_p12, %p7232_p11 }
  0x85   : > { %p7230_p5 = pneg %p7229_p6 }
  0x86   : > { %p7236_p7 = por %p7235_p0, %p7234_p13 }
  0x88   : > { %p7237_p8 = pnand %p7236_p7, %p7230_p5 }
  0x8a   : > { %7240 = shalt.err (!%p7237_p8)
}
  0x8b   : > { %s7241_s30 = scalar_lea.vmem %s7576_s23, 4096  ;;  %s7343_s10 = smov [#allocation2]  }
  0x8c   : > { %p7242_p9 = scmp.ne.s32.totalorder %s7576_s23, %s7241_s30  ;;  %s7245_s18 = sshll.u32 %s7343_s10, 4  ;;  %s7246_s18 = int_to_ptr.vmem [resolvable:$false] %s7245_s18 }
  0x8d   : > { %s7247_s22 = scalar_lea.vmem %s7246_s18, 8192  ;;  %p7248_p2 = scmp.lt.s32.totalorder %s7576_s23, %s7246_s18 }
  0x8e   : > { %p7243_p10 = pnand %p7242_p9, %p8709_p3  ;;  %p7249_p6 = scmp.lt.s32.totalorder %s7247_s22, %s7241_s30 }
  0x90   : > { %p7244_p1 = pneg %p7243_p10  ;;  %p7250_p11 = por %p7249_p6, %p7248_p2 }
  0x92   : > { %p7251_p12 = pnand %p7250_p11, %p7244_p1 }
  0x94   : > { %7254 = shalt.err (!%p7251_p12)
}
  0x95   : > { %s7344_s8 = smov 128   ;;  %s7345_s19 = smov 8  }
  0x96   : > { %6304 = dma.hbm_to_vmem [thread:$0]  (%p8709_p3), %s7574_s29, 4096, %s7576_s23, %s283_s16, %s7344_s8, %s7344_s8, %s7345_s19  }
  0x97   : > { %s304_s21 = sand.u32 1, %s7333_s27   ;;  %s6292_s20 = smul.u32 768, %s7565_s1 }
  0x98   : > { %s6305_s14 = scalar_select %p8709_p3, [#allocation0], [#allocation19] }
  0x99   : > { %s314_s30 = scalar_lea.hbm %s8684_s5, %s5918_s9  ;;  %s7346_s29 = smov 8192  }
  0x9a   : > { %6306 = sst [smem:[#allocation16]] (%p8709_p3), %s7346_s29  ;;  %s308_s16 = scalar_lea.vmem [#allocation11], %s6292_s20 }
  0x9b   : > { %s319_s23 = sld [smem:[%s6305_s14]]   ;;  %s327_s10 = sshll.u32 %s308_s16, 4  ;;  %s328_s10 = int_to_ptr.vmem [resolvable:$true] %s327_s10 }
  0x9c   : > { %s7347_s18 = smov 4096   ;;  %s7348_s22 = smov 32  }
  0x9d   : > { %6307 = sst [smem:[#allocation16 + $0x1]] (%p8709_p3), %s7347_s18  ;;  %s7349_s8 = smov 128  }
  0x9e   : > { %6308 = sst [smem:[#allocation16 + $0x2]] (%p8709_p3), %s7348_s22  ;;  %s7350_s19 = smov 8  }
  0x9f   : > { %6309 = sst [smem:[#allocation16 + $0x3]] (%p8709_p3), %s7349_s8  ;;  %s305_s20 = scalar_lea.sflag [#allocation12], %s304_s21 }
  0xa0   : > { %6310 = sst [smem:[#allocation16 + $0x4]] (%p8709_p3), %s7349_s8  ;;  %s7351_s17 = smov [#allocation15]  }
  0xa1   : > { %s4808_s9 = sshll.u32 %s319_s23, 26  ;;  %6311 = sst [smem:[#allocation16 + $0x5]] (%p8709_p3), %s7350_s19 }
  0xa2   : > { %s4809_s14 = sadd.s32 134217728, %s4808_s9 }
  0xa3   : > { %6312 = dma.general (%p8709_p3), %s314_s30, 12288, %s328_s10, %s305_s20, %s7351_s17, [#allocation16], %s4809_s14, 0  }
  0xa4   : > { %s6293_s24 = smul.u32 1536, %s7565_s1  ;;  %s5921_s29 = sshll.u32 %s7333_s27, 13 }
  0xa5   : > { %s7352_s16 = smov 16384   ;;  %s361_s30 = scalar_lea.hbm %s8685_s6, %s5921_s29 }
  0xa6   : > { %6314 = sst [smem:[#allocation18]] (%p8709_p3), %s7352_s16  ;;  %s354_s22 = scalar_lea.vmem [#allocation13], %s6293_s24 }
  0xa7   : > { %s6313_s23 = scalar_select %p8709_p3, [#allocation0], [#allocation20] }
  0xa8   : > { %s374_s8 = sshll.u32 %s354_s22, 4  ;;  %s7353_s9 = smov 8192   ;;  %s375_s8 = int_to_ptr.vmem [resolvable:$true] %s374_s8 }
  0xa9   : > { %s366_s10 = sld [smem:[%s6313_s23]]   ;;  %s7354_s1 = smov 32  }
  0xaa   : > { %6315 = sst [smem:[#allocation18 + $0x1]] (%p8709_p3), %s7353_s9  ;;  %s7355_s19 = smov 256  }
  0xab   : > { %6316 = sst [smem:[#allocation18 + $0x2]] (%p8709_p3), %s7354_s1  ;;  %s7356_s14 = smov 16  }
  0xac   : > { %6317 = sst [smem:[#allocation18 + $0x3]] (%p8709_p3), %s7355_s19  ;;  %s7357_s16 = smov [#allocation17]  }
  0xad   : > { %6318 = sst [smem:[#allocation18 + $0x4]] (%p8709_p3), %s7355_s19 }
  0xae   : > { %6319 = sst [smem:[#allocation18 + $0x5]] (%p8709_p3), %s7356_s14 }
  0xaf   : > { %s4813_s17 = sshll.u32 %s366_s10, 26 }
  0xb0   : > { %s4814_s29 = sadd.s32 134217728, %s4813_s17 }
  0xb1   : > { %6320 = dma.general (%p8709_p3), %s361_s30, 24576, %s375_s8, %s305_s20, %s7357_s16, [#allocation18], %s4814_s29, 0  }
  0xb2 PF: > { %p8710_p5 = scmp.ne.s32.totalorder %s8705_s15, 0 }
  0xb3   : > { %s7649_s24 = sand.u32 (!%p8710_p5), 1, %s7325_s25   ;;  %p8711_p13 = scmp.ne.s32.totalorder (!%p8710_p5), %s8701_s12, 0 }
  0xb4   : > { %399 = sbr.rel (%p8710_p5) target bundleno = 1770 (0x6ea), region = 48  ;;  %s4816_s23 = sshll.u32 (!%p8710_p5), %s7649_s24, 8 }
  0xb5   : > { %s402_s21 = scalar_lea.sflag (!%p8710_p5), [#allocation3], %s7649_s24  ;;  %s7655_s18 = scalar_lea.vmem (!%p8710_p5), [#allocation2], %s4816_s23 }
  0xbb   : > { %7300 = dma.done.wait (%p8711_p13), %s402_s21, 4096  }
  0xbc   : > { %7302 = vsyncadd (%p8711_p13), %s402_s21, 4294963200  ;;  %p8712_p3 = scmp.eq.s32.totalorder %s7425_s28, 0 }
  0xbe   : > { %7304 = dma.done.wait (%p8712_p3), [#allocation6], 4096   ;;  %p8713_p0 = pmov %p8712_p3 }
  0xc0   : > { %7306 = vsyncadd (%p8713_p0), [#allocation6], 4294963200  ;;  %p8714_p7 = pmov %p8713_p0 }
  0xc1   : > { %p8715_p8 = pmov %p8713_p0 }
  0xc2   : > { %7308 = dma.done.wait (%p8714_p7), [#allocation9], 48  }
  0xc3   : > { %7310 = vsyncadd (%p8715_p8), [#allocation9], 4294967248  ;;  %s426_s11 = sand.u32 1, %s7425_s28   ;;  %s6294_s15 = smul.u32 768, %s7649_s24 }
  0xc4   : > { %s427_s20 = scalar_lea.sflag [#allocation12], %s426_s11 }
  0xc5   : > { %s7671_s30 = scalar_lea.vmem [#allocation11], %s6294_s15 }
  0xc6   : > { %7312 = dma.done.wait (%p8711_p13), %s427_s20, 36864  }
  0xc7   : > { %7314 = vsyncadd (%p8711_p13), %s427_s20, 4294930432  ;;  %v7677_v0 = vld [vmem:[#allocation7 + $0x40] sm:$0xff]   ;;  %v6421_v2 = vld [vmem:[#allocation7 + $0x48] sm:$0xff]   ;;  %v7358_v61 = vmov 0   ;;  %s6295_s12 = smul.u32 1536, %s7649_s24  ;;  %s8428_s22 = scalar_lea.vmem [#allocation14], %s4816_s23 }
  0xc8   : > { %v6420_v1 = vld [vmem:[#allocation7] sm:$0xff]   ;;  %5956 = vmatprep.subr.bf16.mxu0 %v7677_v0  ;;  %v6422_v3 = vld [vmem:[#allocation7 + $0x8] sm:$0xff]   ;;  %v6423_v4 = vld [vmem:[#allocation7 + $0x50] sm:$0xff]   ;;  %1449 = vmatprep.mubr.bf16.mxu1 %v7358_v61  ;;  %s5955_s8 = sshll.u32 %s7425_s28, 12  ;;  %s4641_s9 = sshll.u32 %s8428_s22, 4  ;;  %s8634_s9 = int_to_ptr.vmem [resolvable:$true] %s4641_s9 }
  0xc9   : > { %5957 = vmatpush3.bf16.msra.mxu0 %v6420_v1  ;;  %v6424_v5 = vld [vmem:[#allocation7 + $0x10] sm:$0xff]   ;;  %v6425_v6 = vld [vmem:[#allocation7 + $0x58] sm:$0xff]   ;;  %v6427_v8 = vld [vmem:[#allocation7 + $0x60] sm:$0xff]   ;;  %s7887_s10 = scalar_lea.vmem [#allocation13], %s6295_s12  ;;  %s8632_s14 = scalar_lea.hbm %s8686_s7, %s5955_s8 }
  0xca   : > { %5958 = vmatprep.subr.bf16.mxu0 %v6421_v2  ;;  %v6426_v7 = vld [vmem:[#allocation7 + $0x18] sm:$0xff]   ;;  %v6428_v9 = vld [vmem:[#allocation7 + $0x20] sm:$0xff]   ;;  %v6429_v10 = vld [vmem:[#allocation7 + $0x68] sm:$0xff]   ;;  %s4627_s28 = scalar_lea.sflag [#allocation4], %s7649_s24  ;;  %s7255_s17 = scalar_lea.vmem %s8634_s9, 4096 }
  0xcb   : > { %v6437_v11 = vld [vmem:[%s7655_s18 + $0x4] ss:$8 sps:$4 sm:$0xff]   ;;  %v6431_v13 = vld [vmem:[#allocation7 + $0x70] sm:$0xff]   ;;  %v6433_v15 = vld [vmem:[#allocation7 + $0x78] sm:$0xff]   ;;  %p7256_p9 = scmp.ne.s32.totalorder %s8634_s9, %s7255_s17  ;;  %p8716_p10 = scmp.ne.s32.totalorder %s8702_s13, 0 }
  0xcc   : > { %v6430_v12 = vld [vmem:[#allocation7 + $0x28] sm:$0xff]   ;;  %893 = vmatprep.mubr.bf16.mxu0 %v6437_v11  ;;  %v6432_v14 = vld [vmem:[#allocation7 + $0x30] sm:$0xff]   ;;  %v6434_v16 = vld [vmem:[#allocation7 + $0x38] sm:$0xff]   ;;  %s7361_s29 = smov [#allocation14]  }
  0xcd   : > { %5959 = vmatpush3.bf16.msra.mxu0 %v6422_v3  ;;  %v6435_v17 = vld [vmem:[%s7655_s18] ss:$8 sps:$4 sm:$0xff]   ;;  %v6438_v18 = vld [vmem:[%s7655_s18 + $0x14] ss:$8 sps:$4 sm:$0xff]   ;;  %v6440_v19 = vld [vmem:[%s7655_s18 + $0x10] ss:$8 sps:$4 sm:$0xff]   ;;  %p7257_p1 = pnand %p7256_p9, %p8716_p10 }
  0xce   : > { %5960 = vmatprep.subr.bf16.mxu0 %v6423_v4  ;;  %v6441_v20 = vld [vmem:[%s7655_s18 + $0x24] ss:$8 sps:$4 sm:$0xff]   ;;  %v7688_v22 = vld [vmem:[#allocation5] ss:$8 sps:$4 sm:$0xff]   ;;  %v7690_v23 = vld [vmem:[#allocation5 + $0x14] ss:$8 sps:$4 sm:$0xff]  }
  0xcf   : > { %v7686_v21 = vld [vmem:[#allocation5 + $0x4] ss:$8 sps:$4 sm:$0xff]   ;;  %v7692_v24 = vld [vmem:[#allocation5 + $0x10] ss:$8 sps:$4 sm:$0xff]   ;;  %v6443_v26 = vld [vmem:[%s7655_s18 + $0x20] ss:$8 sps:$4 sm:$0xff]   ;;  %p7258_p2 = pneg %p7257_p1 }
  0xd0   : > { %1417 = vmatprep.subr.bf16.mxu1 %v7686_v21  ;;  %v7695_v25 = vld [vmem:[#allocation5 + $0x24] ss:$8 sps:$4 sm:$0xff]   ;;  %v6444_v27 = vld [vmem:[%s7655_s18 + $0x34] ss:$8 sps:$4 sm:$0xff]   ;;  %v6446_v28 = vld [vmem:[%s7655_s18 + $0x30] ss:$8 sps:$4 sm:$0xff]  }
  0xd1   : > { %5961 = vmatpush3.bf16.msra.mxu0 %v6424_v5  ;;  %1418 = vmatpush1.bf16.msra.mxu1 %v7688_v22  ;;  %v6447_v29 = vld [vmem:[%s7655_s18 + $0x44] ss:$8 sps:$4 sm:$0xff]   ;;  %v6449_v30 = vld [vmem:[%s7655_s18 + $0x40] ss:$8 sps:$4 sm:$0xff]   ;;  %v6450_v31 = vld [vmem:[%s7655_s18 + $0x54] ss:$8 sps:$4 sm:$0xff]  }
  0xd2   : > { %5962 = vmatprep.subr.bf16.mxu0 %v6425_v6  ;;  %1419 = vmatprep.subr.bf16.mxu1 %v7690_v23  ;;  %v6452_v32 = vld [vmem:[%s7655_s18 + $0x50] ss:$8 sps:$4 sm:$0xff]   ;;  %v6453_v33 = vld [vmem:[%s7655_s18 + $0x64] ss:$8 sps:$4 sm:$0xff]   ;;  %v6455_v34 = vld [vmem:[%s7655_s18 + $0x60] ss:$8 sps:$4 sm:$0xff]  }
  0xd3   : > { %v6456_v35 = vld [vmem:[%s7655_s18 + $0x74] ss:$8 sps:$4 sm:$0xff]   ;;  %v6458_v36 = vld [vmem:[%s7655_s18 + $0x70] ss:$8 sps:$4 sm:$0xff]   ;;  %v6459_v37 = vld [vmem:[%s7655_s18 + $0x84] ss:$8 sps:$4 sm:$0xff]  }
  0xd4   : > { %v6461_v38 = vld [vmem:[%s7655_s18 + $0x80] ss:$8 sps:$4 sm:$0xff]   ;;  %v6462_v39 = vld [vmem:[%s7655_s18 + $0x94] ss:$8 sps:$4 sm:$0xff]   ;;  %v6464_v40 = vld [vmem:[%s7655_s18 + $0x90] ss:$8 sps:$4 sm:$0xff]  }
  0xd5   : > { %5963 = vmatpush3.bf16.msra.mxu0 %v6426_v7  ;;  %1420 = vmatpush1.bf16.msra.mxu1 %v7692_v24  ;;  %v6465_v41 = vld [vmem:[%s7655_s18 + $0xa4] ss:$8 sps:$4 sm:$0xff]   ;;  %v6467_v42 = vld [vmem:[%s7655_s18 + $0xa0] ss:$8 sps:$4 sm:$0xff]   ;;  %v6468_v43 = vld [vmem:[%s7655_s18 + $0xb4] ss:$8 sps:$4 sm:$0xff]  }
  0xd6   : > { %5964 = vmatprep.subr.bf16.mxu0 %v6427_v8  ;;  %1421 = vmatprep.subr.bf16.mxu1 %v7695_v25  ;;  %v7720_v44 = vld [vmem:[#allocation5 + $0x20] ss:$8 sps:$4 sm:$0xff]   ;;  %v6470_v45 = vld [vmem:[%s7655_s18 + $0xb0] ss:$8 sps:$4 sm:$0xff]   ;;  %v7724_v46 = vld [vmem:[#allocation5 + $0x34] ss:$8 sps:$4 sm:$0xff]  }
  0xd7   : > { %v6471_v47 = vld [vmem:[%s7655_s18 + $0xc4] ss:$8 sps:$4 sm:$0xff]   ;;  %v7727_v48 = vld [vmem:[#allocation5 + $0x30] ss:$8 sps:$4 sm:$0xff]   ;;  %v7733_v50 = vld [vmem:[#allocation5 + $0x40] ss:$8 sps:$4 sm:$0xff]  }
  0xd8   : > { %v7731_v49 = vld [vmem:[#allocation5 + $0x44] ss:$8 sps:$4 sm:$0xff]   ;;  %v6473_v51 = vld [vmem:[%s7655_s18 + $0xc0] ss:$8 sps:$4 sm:$0xff]   ;;  %v7738_v52 = vld [vmem:[#allocation5 + $0x54] ss:$8 sps:$4 sm:$0xff]  }
  0xd9   : > { %5965 = vmatpush3.bf16.msra.mxu0 %v6428_v9  ;;  %1422 = vmatpush1.bf16.msra.mxu1 %v7720_v44  ;;  %v6474_v53 = vld [vmem:[%s7655_s18 + $0xd4] ss:$8 sps:$4 sm:$0xff]   ;;  %v7741_v54 = vld [vmem:[#allocation5 + $0x50] ss:$8 sps:$4 sm:$0xff]   ;;  %v7745_v55 = vld [vmem:[#allocation5 + $0x64] ss:$8 sps:$4 sm:$0xff]  }
  0xda   : > { %5966 = vmatprep.subr.bf16.mxu0 %v6429_v10  ;;  %1423 = vmatprep.subr.bf16.mxu1 %v7724_v46  ;;  %v7747_v56 = vld [vmem:[#allocation5 + $0x60] ss:$8 sps:$4 sm:$0xff]   ;;  %v6476_v57 = vld [vmem:[%s7655_s18 + $0xd0] ss:$8 sps:$4 sm:$0xff]   ;;  %v7752_v58 = vld [vmem:[#allocation5 + $0x74] ss:$8 sps:$4 sm:$0xff]  }
  0xdb   : > { %v6477_v59 = vld [vmem:[%s7655_s18 + $0xe4] ss:$8 sps:$4 sm:$0xff]   ;;  %v7755_v60 = vld [vmem:[#allocation5 + $0x70] ss:$8 sps:$4 sm:$0xff]   ;;  %v6479_v62 = vld [vmem:[%s7655_s18 + $0xe0] ss:$8 sps:$4 sm:$0xff]  }
  0xdc   : > { %v6480_v63 = vld [vmem:[%s7655_s18 + $0xf4] ss:$8 sps:$4 sm:$0xff]   ;;  %s7259_s16 = sshll.u32 %s7361_s29, 4  ;;  %s7260_s16 = int_to_ptr.vmem [resolvable:$false] %s7259_s16 }
  0xdd   : > { %5967 = vmatpush3.bf16.msra.mxu0 %v6430_v12  ;;  %1424 = vmatpush1.bf16.msra.mxu1 %v7727_v48  ;;  %s7261_s23 = scalar_lea.vmem %s7260_s16, 8192  ;;  %p7262_p6 = scmp.lt.s32.totalorder %s8634_s9, %s7260_s16 }
  0xde   : > { %5968 = vmatprep.subr.bf16.mxu0 %v6431_v13  ;;  %1425 = vmatprep.subr.bf16.mxu1 %v7731_v49  ;;  %p7263_p11 = scmp.lt.s32.totalorder %s7261_s23, %s7255_s17 }
  0xe0   : > { %p7264_p12 = por %p7263_p11, %p7262_p6 }
  0xe1   : > { %5969 = vmatpush3.bf16.msra.mxu0 %v6432_v14  ;;  %1426 = vmatpush1.bf16.msra.mxu1 %v7733_v50 }
  0xe2   : > { %5970 = vmatprep.subr.bf16.mxu0 %v6433_v15  ;;  %1427 = vmatprep.subr.bf16.mxu1 %v7738_v52  ;;  %p7265_p5 = pnand %p7264_p12, %p7258_p2 }
  0xe5   : > { %5971 = vmatpush3.bf16.msra.mxu0 %v6434_v16  ;;  %1428 = vmatpush1.bf16.msra.mxu1 %v7741_v54 }
  0xe6   : > { %6068 = vmatprep.subr.bf16.mxu0 %v7677_v0  ;;  %1429 = vmatprep.subr.bf16.mxu1 %v7745_v55 }
  0xe8   : > { %894 = vmatmul.mubr.bf16.vlgmr.msra.gmra.mrb[0].mxu0 %v6435_v17  ;;  %v568_v17 = vld [vmem:[%s7671_s30 + $0x8] sm:$0xff] }
  0xe9   : > { %901 = vmatprep.mubr.bf16.mxu0 %v6438_v18  ;;  %6069 = vmatpush3.bf16.msra.mxu0 %v6420_v1 }
  0xea   : > { %6070 = vmatprep.subr.bf16.mxu0 %v6421_v2  ;;  %1430 = vmatpush1.bf16.msra.mxu1 %v7747_v56  ;;  %v7764_v2 = vld [vmem:[#allocation10] ss:$0 sm:$0xff] }
  0xeb   : > { %1431 = vmatprep.subr.bf16.mxu1 %v7752_v58 }
  0xed   : > { %6071 = vmatpush3.bf16.msra.mxu0 %v6422_v3 }
  0xee   : > { %6072 = vmatprep.subr.bf16.mxu0 %v6423_v4  ;;  %1432 = vmatpush1.bf16.msra.mxu1 %v7755_v60 }
  0xef   : > { %2589 = vmatprep.subr.bf16.mxu1 %v7686_v21 }
  0xf0   : > { %902 = vmatmul.mubr.bf16.gmra.mrb[4].mxu0 %v6440_v19 }
  0xf1   : > { %909 = vmatprep.mubr.bf16.mxu0 %v6441_v20  ;;  %6073 = vmatpush3.bf16.msra.mxu0 %v6424_v5 }
  0xf2   : > { %6074 = vmatprep.subr.bf16.mxu0 %v6425_v6 }
  0xf5   : > { %6075 = vmatpush3.bf16.msra.mxu0 %v6426_v7 }
  0xf6   : > { %6076 = vmatprep.subr.bf16.mxu0 %v6427_v8 }
  0xf8   : > { %910 = vmatmul.mubr.bf16.gmra.mrb[8].mxu0 %v6443_v26 }
  0xf9   : > { %917 = vmatprep.mubr.bf16.mxu0 %v6444_v27  ;;  %6077 = vmatpush3.bf16.msra.mxu0 %v6428_v9  ;;  %v1087_v27 = vmul.f32 2.0, %v568_v17 }
  0xfa   : > { %6078 = vmatprep.subr.bf16.mxu0 %v6429_v10 }
  0xfd   : > { %6079 = vmatpush3.bf16.msra.mxu0 %v6430_v12 }
  0xfe   : > { %6080 = vmatprep.subr.bf16.mxu0 %v6431_v13 }
 0x100   : > { %918 = vmatmul.mubr.bf16.gmra.mrb[12].mxu0 %v6446_v28 }
 0x101   : > { %925 = vmatprep.mubr.bf16.mxu0 %v6447_v29  ;;  %6081 = vmatpush3.bf16.msra.mxu0 %v6432_v14 }
 0x102   : > { %6082 = vmatprep.subr.bf16.mxu0 %v6433_v15 }
 0x105   : > { %6083 = vmatpush3.bf16.msra.mxu0 %v6434_v16  ;;  %v567_v16 = vld [vmem:[%s7671_s30] sm:$0xff] }
 0x106   : > { %6180 = vmatprep.subr.bf16.mxu0 %v7677_v0  ;;  %v6482_v0 = vld [vmem:[%s7655_s18 + $0xf0] ss:$8 sps:$4 sm:$0xff]   ;;  %v1086_v26 = vmul.f32 2.0, %v567_v16 }
 0x108   : > { %926 = vmatmul.mubr.bf16.gmra.mrb[16].mxu0 %v6449_v30 }
 0x109   : > { %933 = vmatprep.mubr.bf16.mxu0 %v6450_v31 }
 0x110   : > { %934 = vmatmul.mubr.bf16.gmra.mrb[20].mxu0 %v6452_v32 }
 0x111   : > { %941 = vmatprep.mubr.bf16.mxu0 %v6453_v33  ;;  %v4871_v33 = vadd.f32 -1.0, %v1086_v26  ;;  %v574_v26 = vld [vmem:[%s7671_s30 + $0x38] sm:$0xff] }
 0x118   : > { %942 = vmatmul.mubr.bf16.gmra.mrb[24].mxu0 %v6455_v34  ;;  %v4872_v34 = vadd.f32 -1.0, %v1087_v27 }
 0x119   : > { %949 = vmatprep.mubr.bf16.mxu0 %v6456_v35 }
 0x120   : > { %950 = vmatmul.mubr.bf16.gmra.mrb[28].mxu0 %v6458_v36 }
 0x121   : > { %957 = vmatprep.mubr.bf16.mxu0 %v6459_v37 }
 0x128   : > { %958 = vmatmul.mubr.bf16.gmra.mrb[32].mxu0 %v6461_v38  ;;  %v569_v38 = vld [vmem:[%s7671_s30 + $0x10] sm:$0xff] }
 0x129   : > { %965 = vmatprep.mubr.bf16.mxu0 %v6462_v39  ;;  %v570_v39 = vld [vmem:[%s7671_s30 + $0x18] sm:$0xff] }
 0x130   : > { %966 = vmatmul.mubr.bf16.gmra.mrb[36].mxu0 %v6464_v40 }
 0x131   : > { %973 = vmatprep.mubr.bf16.mxu0 %v6465_v41 }
 0x138   : > { %974 = vmatmul.mubr.bf16.gmra.mrb[40].mxu0 %v6467_v42 }
 0x139   : > { %981 = vmatprep.mubr.bf16.mxu0 %v6468_v43 }
 0x140   : > { %982 = vmatmul.mubr.bf16.gmra.mrb[44].mxu0 %v6470_v45  ;;  %v1088_v45 = vmul.f32 2.0, %v569_v38 }
 0x141   : > { %989 = vmatprep.mubr.bf16.mxu0 %v6471_v47  ;;  %v1089_v47 = vmul.f32 2.0, %v570_v39  ;;  %v575_v39 = vld [vmem:[%s7671_s30 + $0x40] sm:$0xff] }
 0x148   : > { %990 = vmatmul.mubr.bf16.gmra.mrb[48].mxu0 %v6473_v51 }
 0x149   : > { %997 = vmatprep.mubr.bf16.mxu0 %v6474_v53 }
 0x150   : > { %998 = vmatmul.mubr.bf16.gmra.mrb[52].mxu0 %v6476_v57  ;;  %v7359_v57 = vmov 1.0|1.0  }
 0x151   : > { %1005 = vmatprep.mubr.bf16.mxu0 %v6477_v59 }
 0x158   : > { %1006 = vmatmul.mubr.bf16.gmra.mrb[56].mxu0 %v6479_v62 }
 0x159   : > { %1013 = vmatprep.mubr.bf16.mxu0 %v6480_v63 }
 0x160   : > { %1014 = vmatmul.mubr.bf16.gmra.mrb[60].mxu0 %v6482_v0  ;;  %v4873_v0 = vadd.f32 -1.0, %v1088_v45 }
 0x1bb   : > { %v5972_v1 = vpop.f32.mrb[0].mxu0 }
 0x1bc   : > { %v5973_v3 = vpop.f32.mrb[1].mxu0 }
 0x1bd   : > { %v5974_v4 = vadd.f32 %v5973_v3, %v5972_v1  ;;  %v5975_v5 = vpop.f32.mrb[2].mxu0  ;;  %v4874_v1 = vadd.f32 -1.0, %v1089_v47 }
 0x1be   : > { %v5976_v6 = vpop.f32.mrb[3].mxu0 }
 0x1bf   : > { %v896_v7 = vadd.f32 %v5974_v4, %v7764_v2  ;;  %v5977_v8 = vadd.f32 %v5976_v6, %v5975_v5  ;;  %v571_v6 = vld [vmem:[%s7671_s30 + $0x20] sm:$0xff] }
 0x1c1   : > { %v1022_v9 = vmul.f32 0.5, %v896_v7  ;;  %v899_v10 = vadd.f32 %v5977_v8, %v7764_v2  ;;  %v572_v7 = vld [vmem:[%s7671_s30 + $0x28] sm:$0xff] }
 0x1c3   : > { %6507 = vtanh.f32 %v1022_v9  ;;  %v1023_v11 = vmul.f32 0.5, %v899_v10  ;;  %v5978_v12 = vpop.f32.mrb[4].mxu0 }
 0x1c4   : > { %v5979_v13 = vpop.f32.mrb[5].mxu0 }
 0x1c5   : > { %6509 = vtanh.f32 %v1023_v11  ;;  %v5980_v14 = vadd.f32 %v5979_v13, %v5978_v12  ;;  %v5981_v15 = vpop.f32.mrb[6].mxu0  ;;  %v1091_v12 = vmul.f32 2.0, %v572_v7 }
 0x1c6   : > { %v5982_v18 = vpop.f32.mrb[7].mxu0 }
 0x1c7   : > { %v904_v19 = vadd.f32 %v5980_v14, %v7764_v2  ;;  %v5983_v20 = vadd.f32 %v5982_v18, %v5981_v15  ;;  %v4876_v17 = vadd.f32 -1.0, %v1091_v12 }
 0x1c9   : > { %v1024_v28 = vmul.f32 0.5, %v904_v19  ;;  %v907_v29 = vadd.f32 %v5983_v20, %v7764_v2  ;;  %v573_v20 = vld [vmem:[%s7671_s30 + $0x30] sm:$0xff] }
 0x1cb   : > { %6511 = vtanh.f32 %v1024_v28  ;;  %v1025_v30 = vmul.f32 0.5, %v907_v29  ;;  %v5984_v31 = vpop.f32.mrb[8].mxu0 }
 0x1cc   : > { %v5985_v32 = vpop.f32.mrb[9].mxu0 }
 0x1cd   : > { %v6508_v35 = vpop.eup %6507  ;;  %6513 = vtanh.f32 %v1025_v30  ;;  %v5986_v36 = vadd.f32 %v5985_v32, %v5984_v31  ;;  %v5987_v37 = vpop.f32.mrb[10].mxu0  ;;  %v1093_v31 = vmul.f32 2.0, %v574_v26 }
 0x1ce   : > { %v5988_v40 = vpop.f32.mrb[11].mxu0  ;;  %vm1150_vm0 = vcmp.gt.f32.partialorder %v6508_v35, %v4871_v33 }
 0x1cf   : > { %v6510_v41 = vpop.eup %6509  ;;  %v912_v42 = vadd.f32 %v5986_v36, %v7764_v2  ;;  %v5989_v43 = vadd.f32 %v5988_v40, %v5987_v37  ;;  %v4878_v36 = vadd.f32 -1.0, %v1093_v31  ;;  %v576_v40 = vld [vmem:[%s7671_s30 + $0x48] sm:$0xff] }
 0x1d0   : > { %vm1151_vm1 = vcmp.gt.f32.partialorder %v6510_v41, %v4872_v34  ;;  %v1095_v47 = vmul.f32 2.0, %v576_v40 }
 0x1d1   : > { %v1026_v51 = vmul.f32 0.5, %v912_v42  ;;  %v915_v53 = vadd.f32 %v5989_v43, %v7764_v2  ;;  %vm4951_vm2 = vmpackc.low %vm1151_vm1, %vm1150_vm0 }
 0x1d2   : > { %4952 = vmatmul.mubr.msk.bf16.vlgmr.msra.gmra.mrb[0].mxu1 %vm4951_vm2, %v7359_v57 }
 0x1d3   : > { %6515 = vtanh.f32 %v1026_v51  ;;  %v1027_v59 = vmul.f32 0.5, %v915_v53  ;;  %v5990_v62 = vpop.f32.mrb[12].mxu0  ;;  %1459 = vmatprep.mubr.bf16.mxu1 %v7358_v61  ;;  %2590 = vmatpush1.bf16.msra.mxu1 %v7688_v22  ;;  %v1090_v22 = vmul.f32 2.0, %v571_v6 }
 0x1d4   : > { %v5991_v63 = vpop.f32.mrb[13].mxu0  ;;  %2591 = vmatprep.subr.bf16.mxu1 %v7690_v23 }
 0x1d5   : > { %v6512_v3 = vpop.eup %6511  ;;  %6517 = vtanh.f32 %v1027_v59  ;;  %v5992_v4 = vadd.f32 %v5991_v63, %v5990_v62  ;;  %v5993_v5 = vpop.f32.mrb[14].mxu0  ;;  %v4875_v16 = vadd.f32 -1.0, %v1090_v22  ;;  %v4880_v63 = vadd.f32 -1.0, %v1095_v47 }
 0x1d6   : > { %v5994_v8 = vpop.f32.mrb[15].mxu0  ;;  %vm1152_vm3 = vcmp.gt.f32.partialorder %v6512_v3, %v4873_v0  ;;  %v577_v3 = vld [vmem:[%s7671_s30 + $0x50] sm:$0xff] }
 0x1d7   : > { %v6514_v9 = vpop.eup %6513  ;;  %v920_v10 = vadd.f32 %v5992_v4, %v7764_v2  ;;  %v5995_v11 = vadd.f32 %v5994_v8, %v5993_v5  ;;  %2592 = vmatpush1.bf16.msra.mxu1 %v7692_v24  ;;  %v578_v4 = vld [vmem:[%s7671_s30 + $0x58] sm:$0xff] }
 0x1d8   : > { %vm1153_vm4 = vcmp.gt.f32.partialorder %v6514_v9, %v4874_v1  ;;  %2593 = vmatprep.subr.bf16.mxu1 %v7695_v25  ;;  %v1097_v9 = vmul.f32 2.0, %v578_v4 }
 0x1d9   : > { %v1028_v23 = vmul.f32 0.5, %v920_v10  ;;  %v923_v13 = vadd.f32 %v5995_v11, %v7764_v2  ;;  %vm4953_vm5 = vmpackc.low %vm1153_vm4, %vm1152_vm3 }
 0x1da   : > { %4954 = vmatmul.mubr.msk.bf16.gmra.mrb[4].mxu1 %vm4953_vm5, %v7359_v57 }
 0x1db   : > { %6519 = vtanh.f32 %v1028_v23  ;;  %v1029_v14 = vmul.f32 0.5, %v923_v13  ;;  %v5996_v15 = vpop.f32.mrb[16].mxu0  ;;  %1469 = vmatprep.mubr.bf16.mxu1 %v7358_v61  ;;  %2594 = vmatpush1.bf16.msra.mxu1 %v7720_v44  ;;  %v1092_v44 = vmul.f32 2.0, %v573_v20  ;;  %v4882_v23 = vadd.f32 -1.0, %v1097_v9 }
 0x1dc   : > { %v5997_v24 = vpop.f32.mrb[17].mxu0  ;;  %2595 = vmatprep.subr.bf16.mxu1 %v7724_v46 }
 0x1dd   : > { %v6516_v25 = vpop.eup %6515  ;;  %6521 = vtanh.f32 %v1029_v14  ;;  %v5998_v18 = vadd.f32 %v5997_v24, %v5996_v15  ;;  %v5999_v19 = vpop.f32.mrb[18].mxu0  ;;  %v4877_v35 = vadd.f32 -1.0, %v1092_v44  ;;  %v579_v15 = vld [vmem:[%s7671_s30 + $0x60] sm:$0xff]  ;;  %v580_v24 = vld [vmem:[%s7671_s30 + $0x68] sm:$0xff] }
 0x1de   : > { %v6000_v27 = vpop.f32.mrb[19].mxu0  ;;  %vm1154_vm6 = vcmp.gt.f32.partialorder %v6516_v25, %v4875_v16  ;;  %v1099_v20 = vmul.f32 2.0, %v580_v24 }
 0x1df   : > { %v6518_v28 = vpop.eup %6517  ;;  %v928_v29 = vadd.f32 %v5998_v18, %v7764_v2  ;;  %v6001_v30 = vadd.f32 %v6000_v27, %v5999_v19  ;;  %2596 = vmatpush1.bf16.msra.mxu1 %v7727_v48  ;;  %v1098_v19 = vmul.f32 2.0, %v579_v15 }
 0x1e0   : > { %vm1155_vm7 = vcmp.gt.f32.partialorder %v6518_v28, %v4876_v17  ;;  %2597 = vmatprep.subr.bf16.mxu1 %v7731_v49  ;;  %v4884_v31 = vadd.f32 -1.0, %v1099_v20 }
 0x1e1   : > { %v1030_v46 = vmul.f32 0.5, %v928_v29  ;;  %v931_v32 = vadd.f32 %v6001_v30, %v7764_v2  ;;  %vm4955_vm8 = vmpackc.low %vm1155_vm7, %vm1154_vm6  ;;  %v4883_v44 = vadd.f32 -1.0, %v1098_v19 }
 0x1e2   : > { %4956 = vmatmul.mubr.msk.bf16.gmra.mrb[8].mxu1 %vm4955_vm8, %v7359_v57 }
 0x1e3   : > { %6523 = vtanh.f32 %v1030_v46  ;;  %v1031_v33 = vmul.f32 0.5, %v931_v32  ;;  %v6002_v34 = vpop.f32.mrb[20].mxu0  ;;  %1479 = vmatprep.mubr.bf16.mxu1 %v7358_v61  ;;  %2598 = vmatpush1.bf16.msra.mxu1 %v7733_v50  ;;  %v1094_v50 = vmul.f32 2.0, %v575_v39 }
 0x1e4   : > { %v6003_v48 = vpop.f32.mrb[21].mxu0  ;;  %2599 = vmatprep.subr.bf16.mxu1 %v7738_v52 }
 0x1e5   : > { %v6520_v49 = vpop.eup %6519  ;;  %6525 = vtanh.f32 %v1031_v33  ;;  %v6004_v37 = vadd.f32 %v6003_v48, %v6002_v34  ;;  %v6005_v38 = vpop.f32.mrb[22].mxu0  ;;  %v4879_v62 = vadd.f32 -1.0, %v1094_v50  ;;  %v581_v34 = vld [vmem:[%s7671_s30 + $0x70] sm:$0xff]  ;;  %v582_v48 = vld [vmem:[%s7671_s30 + $0x78] sm:$0xff] }
 0x1e6   : > { %v6006_v41 = vpop.f32.mrb[23].mxu0  ;;  %vm1156_vm9 = vcmp.gt.f32.partialorder %v6520_v49, %v4877_v35  ;;  %v1101_v39 = vmul.f32 2.0, %v582_v48 }
 0x1e7   : > { %v6522_v42 = vpop.eup %6521  ;;  %v936_v43 = vadd.f32 %v6004_v37, %v7764_v2  ;;  %v6007_v45 = vadd.f32 %v6006_v41, %v6005_v38  ;;  %2600 = vmatpush1.bf16.msra.mxu1 %v7741_v54  ;;  %v1100_v38 = vmul.f32 2.0, %v581_v34 }
 0x1e8   : > { %vm1157_vm10 = vcmp.gt.f32.partialorder %v6522_v42, %v4878_v36  ;;  %2601 = vmatprep.subr.bf16.mxu1 %v7745_v55  ;;  %v4886_v47 = vadd.f32 -1.0, %v1101_v39 }
 0x1e9   : > { %v1032_v52 = vmul.f32 0.5, %v936_v43  ;;  %v939_v51 = vadd.f32 %v6007_v45, %v7764_v2  ;;  %vm4957_vm11 = vmpackc.low %vm1157_vm10, %vm1156_vm9  ;;  %v4885_v50 = vadd.f32 -1.0, %v1100_v38 }
 0x1ea   : > { %4958 = vmatmul.mubr.msk.bf16.gmra.mrb[12].mxu1 %vm4957_vm11, %v7359_v57 }
 0x1eb   : > { %6527 = vtanh.f32 %v1032_v52  ;;  %v1033_v53 = vmul.f32 0.5, %v939_v51  ;;  %v6008_v59 = vpop.f32.mrb[24].mxu0  ;;  %1489 = vmatprep.mubr.bf16.mxu1 %v7358_v61  ;;  %2602 = vmatpush1.bf16.msra.mxu1 %v7747_v56  ;;  %v1096_v56 = vmul.f32 2.0, %v577_v3 }
 0x1ec   : > { %v6009_v54 = vpop.f32.mrb[25].mxu0  ;;  %2603 = vmatprep.subr.bf16.mxu1 %v7752_v58 }
 0x1ed   : > { %v6524_v55 = vpop.eup %6523  ;;  %6529 = vtanh.f32 %v1033_v53  ;;  %v6010_v0 = vadd.f32 %v6009_v54, %v6008_v59  ;;  %v6011_v1 = vpop.f32.mrb[26].mxu0  ;;  %v4881_v12 = vadd.f32 -1.0, %v1096_v56  ;;  %v583_v59 = vld [vmem:[%s7671_s30 + $0x80] sm:$0xff]  ;;  %v584_v54 = vld [vmem:[%s7671_s30 + $0x88] sm:$0xff] }
 0x1ee   : > { %v6012_v5 = vpop.f32.mrb[27].mxu0  ;;  %vm1158_vm12 = vcmp.gt.f32.partialorder %v6524_v55, %v4879_v62  ;;  %v1103_v3 = vmul.f32 2.0, %v584_v54 }
 0x1ef   : > { %v6526_v6 = vpop.eup %6525  ;;  %v944_v7 = vadd.f32 %v6010_v0, %v7764_v2  ;;  %v6013_v8 = vadd.f32 %v6012_v5, %v6011_v1  ;;  %2604 = vmatpush1.bf16.msra.mxu1 %v7755_v60  ;;  %v1102_v1 = vmul.f32 2.0, %v583_v59 }
 0x1f0   : > { %vm1159_vm13 = vcmp.gt.f32.partialorder %v6526_v6, %v4880_v63  ;;  %3761 = vmatprep.subr.bf16.mxu1 %v7686_v21  ;;  %v4888_v9 = vadd.f32 -1.0, %v1103_v3 }
 0x1f1   : > { %v1034_v58 = vmul.f32 0.5, %v944_v7  ;;  %v947_v10 = vadd.f32 %v6013_v8, %v7764_v2  ;;  %vm4959_vm14 = vmpackc.low %vm1159_vm13, %vm1158_vm12  ;;  %v4887_v56 = vadd.f32 -1.0, %v1102_v1 }
 0x1f2   : > { %4960 = vmatmul.mubr.msk.bf16.gmra.mrb[16].mxu1 %vm4959_vm14, %v7359_v57 }
 0x1f3   : > { %6531 = vtanh.f32 %v1034_v58  ;;  %v1035_v11 = vmul.f32 0.5, %v947_v10  ;;  %v6014_v22 = vpop.f32.mrb[28].mxu0  ;;  %1499 = vmatprep.mubr.bf16.mxu1 %v7358_v61 }
 0x1f4   : > { %v6015_v60 = vpop.f32.mrb[29].mxu0 }
 0x1f5   : > { %v6528_v13 = vpop.eup %6527  ;;  %6533 = vtanh.f32 %v1035_v11  ;;  %v6016_v14 = vadd.f32 %v6015_v60, %v6014_v22  ;;  %v6017_v21 = vpop.f32.mrb[30].mxu0  ;;  %v585_v22 = vld [vmem:[%s7671_s30 + $0x90] sm:$0xff]  ;;  %v586_v60 = vld [vmem:[%s7671_s30 + $0x98] sm:$0xff] }
 0x1f6   : > { %v6018_v16 = vpop.f32.mrb[31].mxu0  ;;  %vm1160_vm15 = vcmp.gt.f32.partialorder %v6528_v13, %v4881_v12  ;;  %v1105_v15 = vmul.f32 2.0, %v586_v60 }
 0x1f7   : > { %v6530_v17 = vpop.eup %6529  ;;  %v952_v25 = vadd.f32 %v6016_v14, %v7764_v2  ;;  %v6019_v18 = vadd.f32 %v6018_v16, %v6017_v21  ;;  %v1104_v21 = vmul.f32 2.0, %v585_v22 }
 0x1f8   : > { %vm1161_vm0 = vcmp.gt.f32.partialorder %v6530_v17, %v4882_v23  ;;  %v4890_v20 = vadd.f32 -1.0, %v1105_v15 }
 0x1f9   : > { %v1036_v26 = vmul.f32 0.5, %v952_v25  ;;  %v955_v27 = vadd.f32 %v6019_v18, %v7764_v2  ;;  %vm4961_vm1 = vmpackc.low %vm1161_vm0, %vm1160_vm15  ;;  %v4889_v19 = vadd.f32 -1.0, %v1104_v21 }
 0x1fa   : > { %4962 = vmatmul.mubr.msk.bf16.gmra.mrb[20].mxu1 %vm4961_vm1, %v7359_v57 }
 0x1fb   : > { %6535 = vtanh.f32 %v1036_v26  ;;  %v1037_v28 = vmul.f32 0.5, %v955_v27  ;;  %v6020_v29 = vpop.f32.mrb[32].mxu0  ;;  %1509 = vmatprep.mubr.bf16.mxu1 %v7358_v61 }
 0x1fc   : > { %v6021_v30 = vpop.f32.mrb[33].mxu0 }
 0x1fd   : > { %v6532_v46 = vpop.eup %6531  ;;  %6537 = vtanh.f32 %v1037_v28  ;;  %v6022_v32 = vadd.f32 %v6021_v30, %v6020_v29  ;;  %v6023_v33 = vpop.f32.mrb[34].mxu0  ;;  %v587_v29 = vld [vmem:[%s7671_s30 + $0xa0] sm:$0xff]  ;;  %v588_v30 = vld [vmem:[%s7671_s30 + $0xa8] sm:$0xff] }
 0x1fe   : > { %v6024_v35 = vpop.f32.mrb[35].mxu0  ;;  %vm1162_vm2 = vcmp.gt.f32.partialorder %v6532_v46, %v4883_v44  ;;  %v1107_v34 = vmul.f32 2.0, %v588_v30 }
 0x1ff   : > { %v6534_v36 = vpop.eup %6533  ;;  %v960_v49 = vadd.f32 %v6022_v32, %v7764_v2  ;;  %v6025_v37 = vadd.f32 %v6024_v35, %v6023_v33  ;;  %v1106_v33 = vmul.f32 2.0, %v587_v29 }
 0x200   : > { %vm1163_vm3 = vcmp.gt.f32.partialorder %v6534_v36, %v4884_v31  ;;  %v4892_v39 = vadd.f32 -1.0, %v1107_v34 }
 0x201   : > { %v1038_v40 = vmul.f32 0.5, %v960_v49  ;;  %v963_v41 = vadd.f32 %v6025_v37, %v7764_v2  ;;  %vm4963_vm4 = vmpackc.low %vm1163_vm3, %vm1162_vm2  ;;  %v4891_v38 = vadd.f32 -1.0, %v1106_v33 }
 0x202   : > { %4964 = vmatmul.mubr.msk.bf16.gmra.mrb[24].mxu1 %vm4963_vm4, %v7359_v57 }
 0x203   : > { %6539 = vtanh.f32 %v1038_v40  ;;  %v1039_v42 = vmul.f32 0.5, %v963_v41  ;;  %v6026_v43 = vpop.f32.mrb[36].mxu0  ;;  %1519 = vmatprep.mubr.bf16.mxu1 %v7358_v61 }
 0x204   : > { %v6027_v45 = vpop.f32.mrb[37].mxu0 }
 0x205   : > { %v6536_v52 = vpop.eup %6535  ;;  %6541 = vtanh.f32 %v1039_v42  ;;  %v6028_v51 = vadd.f32 %v6027_v45, %v6026_v43  ;;  %v6029_v53 = vpop.f32.mrb[38].mxu0  ;;  %v589_v43 = vld [vmem:[%s7671_s30 + $0xb0] sm:$0xff]  ;;  %v590_v45 = vld [vmem:[%s7671_s30 + $0xb8] sm:$0xff] }
 0x206   : > { %v6030_v62 = vpop.f32.mrb[39].mxu0  ;;  %vm1164_vm5 = vcmp.gt.f32.partialorder %v6536_v52, %v4885_v50  ;;  %v1109_v59 = vmul.f32 2.0, %v590_v45 }
 0x207   : > { %v6538_v63 = vpop.eup %6537  ;;  %v968_v55 = vadd.f32 %v6028_v51, %v7764_v2  ;;  %v6031_v0 = vadd.f32 %v6030_v62, %v6029_v53  ;;  %v1108_v53 = vmul.f32 2.0, %v589_v43 }
 0x208   : > { %vm1165_vm6 = vcmp.gt.f32.partialorder %v6538_v63, %v4886_v47  ;;  %v4894_v3 = vadd.f32 -1.0, %v1109_v59  ;;  %v597_v59 = vld [vmem:[%s7671_s30 + $0xf0] sm:$0xff] }
 0x209   : > { %v1040_v4 = vmul.f32 0.5, %v968_v55  ;;  %v971_v5 = vadd.f32 %v6031_v0, %v7764_v2  ;;  %vm4965_vm7 = vmpackc.low %vm1165_vm6, %vm1164_vm5  ;;  %v4893_v1 = vadd.f32 -1.0, %v1108_v53 }
 0x20a   : > { %4966 = vmatmul.mubr.msk.bf16.gmra.mrb[28].mxu1 %vm4965_vm7, %v7359_v57 }
 0x20b   : > { %6543 = vtanh.f32 %v1040_v4  ;;  %v1041_v6 = vmul.f32 0.5, %v971_v5  ;;  %v6032_v7 = vpop.f32.mrb[40].mxu0  ;;  %1529 = vmatprep.mubr.bf16.mxu1 %v7358_v61 }
 0x20c   : > { %v6033_v8 = vpop.f32.mrb[41].mxu0 }
 0x20d   : > { %v6540_v58 = vpop.eup %6539  ;;  %6545 = vtanh.f32 %v1041_v6  ;;  %v6034_v10 = vadd.f32 %v6033_v8, %v6032_v7  ;;  %v6035_v11 = vpop.f32.mrb[42].mxu0  ;;  %v591_v7 = vld [vmem:[%s7671_s30 + $0xc0] sm:$0xff]  ;;  %v592_v8 = vld [vmem:[%s7671_s30 + $0xc8] sm:$0xff] }
 0x20e   : > { %v6036_v12 = vpop.f32.mrb[43].mxu0  ;;  %vm1166_vm8 = vcmp.gt.f32.partialorder %v6540_v58, %v4887_v56  ;;  %v1111_v22 = vmul.f32 2.0, %v592_v8 }
 0x20f   : > { %v6542_v23 = vpop.eup %6541  ;;  %v976_v13 = vadd.f32 %v6034_v10, %v7764_v2  ;;  %v6037_v14 = vadd.f32 %v6036_v12, %v6035_v11  ;;  %v1110_v11 = vmul.f32 2.0, %v591_v7  ;;  %v533_v7 = vld [vmem:[#allocation8] sm:$0x3] }
 0x210   : > { %vm1167_vm9 = vcmp.gt.f32.partialorder %v6542_v23, %v4888_v9  ;;  %v4896_v15 = vadd.f32 -1.0, %v1111_v22 }
 0x211   : > { %v1042_v24 = vmul.f32 0.5, %v976_v13  ;;  %v979_v16 = vadd.f32 %v6037_v14, %v7764_v2  ;;  %vm4967_vm10 = vmpackc.low %vm1167_vm9, %vm1166_vm8  ;;  %v4895_v21 = vadd.f32 -1.0, %v1110_v11 }
 0x212   : > { %4968 = vmatmul.mubr.msk.bf16.gmra.mrb[32].mxu1 %vm4967_vm10, %v7359_v57 }
 0x213   : > { %6547 = vtanh.f32 %v1042_v24  ;;  %v1043_v17 = vmul.f32 0.5, %v979_v16  ;;  %v6038_v25 = vpop.f32.mrb[44].mxu0  ;;  %1539 = vmatprep.mubr.bf16.mxu1 %v7358_v61 }
 0x214   : > { %v6039_v18 = vpop.f32.mrb[45].mxu0 }
 0x215   : > { %v6544_v26 = vpop.eup %6543  ;;  %6549 = vtanh.f32 %v1043_v17  ;;  %v6040_v27 = vadd.f32 %v6039_v18, %v6038_v25  ;;  %v6041_v28 = vpop.f32.mrb[46].mxu0  ;;  %v593_v25 = vld [vmem:[%s7671_s30 + $0xd0] sm:$0xff]  ;;  %v594_v18 = vld [vmem:[%s7671_s30 + $0xd8] sm:$0xff] }
 0x216   : > { %v6042_v44 = vpop.f32.mrb[47].mxu0  ;;  %vm1168_vm11 = vcmp.gt.f32.partialorder %v6544_v26, %v4889_v19  ;;  %v1113_v29 = vmul.f32 2.0, %v594_v18  ;;  %v1263_v18 = vld [vmem:[%s7887_s10 + $0x8] sm:$0xff] }
 0x217   : > { %v6546_v31 = vpop.eup %6545  ;;  %v984_v46 = vadd.f32 %v6040_v27, %v7764_v2  ;;  %v6043_v32 = vadd.f32 %v6042_v44, %v6041_v28  ;;  %v1112_v28 = vmul.f32 2.0, %v593_v25 }
 0x218   : > { %vm1169_vm12 = vcmp.gt.f32.partialorder %v6546_v31, %v4890_v20  ;;  %v4898_v34 = vadd.f32 -1.0, %v1113_v29 }
 0x219   : > { %v1044_v48 = vmul.f32 0.5, %v984_v46  ;;  %v987_v35 = vadd.f32 %v6043_v32, %v7764_v2  ;;  %vm4969_vm13 = vmpackc.low %vm1169_vm12, %vm1168_vm11  ;;  %v4897_v33 = vadd.f32 -1.0, %v1112_v28 }
 0x21a   : > { %4970 = vmatmul.mubr.msk.bf16.gmra.mrb[36].mxu1 %vm4969_vm13, %v7359_v57 }
 0x21b   : > { %6551 = vtanh.f32 %v1044_v48  ;;  %v1045_v36 = vmul.f32 0.5, %v987_v35  ;;  %v6044_v49 = vpop.f32.mrb[48].mxu0  ;;  %1549 = vmatprep.mubr.bf16.mxu1 %v7358_v61 }
 0x21c   : > { %v6045_v37 = vpop.f32.mrb[49].mxu0 }
 0x21d   : > { %v6548_v40 = vpop.eup %6547  ;;  %6553 = vtanh.f32 %v1045_v36  ;;  %v6046_v41 = vadd.f32 %v6045_v37, %v6044_v49  ;;  %v6047_v42 = vpop.f32.mrb[50].mxu0  ;;  %v595_v49 = vld [vmem:[%s7671_s30 + $0xe0] sm:$0xff]  ;;  %v596_v37 = vld [vmem:[%s7671_s30 + $0xe8] sm:$0xff] }
 0x21e   : > { %v6048_v50 = vpop.f32.mrb[51].mxu0  ;;  %vm1170_vm14 = vcmp.gt.f32.partialorder %v6548_v40, %v4891_v38  ;;  %v1115_v43 = vmul.f32 2.0, %v596_v37 }
 0x21f   : > { %v6550_v47 = vpop.eup %6549  ;;  %v992_v52 = vadd.f32 %v6046_v41, %v7764_v2  ;;  %v6049_v51 = vadd.f32 %v6048_v50, %v6047_v42  ;;  %v1114_v42 = vmul.f32 2.0, %v595_v49 }
 0x220   : > { %vm1171_vm15 = vcmp.gt.f32.partialorder %v6550_v47, %v4892_v39 }
 0x221   : > { %v1046_v54 = vmul.f32 0.5, %v992_v52  ;;  %v995_v62 = vadd.f32 %v6049_v51, %v7764_v2  ;;  %vm4971_vm0 = vmpackc.low %vm1171_vm15, %vm1170_vm14  ;;  %v4899_v52 = vadd.f32 -1.0, %v1114_v42  ;;  %v4900_v51 = vadd.f32 -1.0, %v1115_v43 }
 0x222   : > { %4972 = vmatmul.mubr.msk.bf16.gmra.mrb[40].mxu1 %vm4971_vm0, %v7359_v57 }
 0x223   : > { %6555 = vtanh.f32 %v1046_v54  ;;  %v1047_v63 = vmul.f32 0.5, %v995_v62  ;;  %v6050_v55 = vpop.f32.mrb[52].mxu0  ;;  %1559 = vmatprep.mubr.bf16.mxu1 %v7358_v61  ;;  %v598_v54 = vld [vmem:[%s7671_s30 + $0xf8] sm:$0xff] }
 0x224   : > { %v6051_v0 = vpop.f32.mrb[53].mxu0 }
 0x225   : > { %v6552_v4 = vpop.eup %6551  ;;  %6557 = vtanh.f32 %v1047_v63  ;;  %v6052_v5 = vadd.f32 %v6051_v0, %v6050_v55  ;;  %v6053_v6 = vpop.f32.mrb[54].mxu0  ;;  %v1116_v63 = vmul.f32 2.0, %v597_v59  ;;  %v1117_v55 = vmul.f32 2.0, %v598_v54 }
 0x226   : > { %v6054_v56 = vpop.f32.mrb[55].mxu0  ;;  %vm1172_vm1 = vcmp.gt.f32.partialorder %v6552_v4, %v4893_v1  ;;  %v1327_v4 = vlaneseq }
 0x227   : > { %v6554_v9 = vpop.eup %6553  ;;  %v1000_v58 = vadd.f32 %v6052_v5, %v7764_v2  ;;  %v6055_v10 = vadd.f32 %v6054_v56, %v6053_v6  ;;  %v4902_v0 = vadd.f32 -1.0, %v1117_v55 }
 0x228   : > { %vm1173_vm2 = vcmp.gt.f32.partialorder %v6554_v9, %v4894_v3  ;;  %v1328_v5 = vshrl.u32 %v1327_v4, 7 }
 0x229   : > { %v1048_v60 = vmul.f32 0.5, %v1000_v58  ;;  %v1003_v12 = vadd.f32 %v6055_v10, %v7764_v2  ;;  %vm4973_vm3 = vmpackc.low %vm1173_vm2, %vm1172_vm1 }
 0x22a   : > { %4974 = vmatmul.mubr.msk.bf16.gmra.mrb[44].mxu1 %vm4973_vm3, %v7359_v57  ;;  %v1329_v6 = vsub.s32 0, %v1328_v5  ;;  %v1333_v8 = vsub.s32 1, %v1328_v5 }
 0x22b   : > { %6559 = vtanh.f32 %v1048_v60  ;;  %v1049_v23 = vmul.f32 0.5, %v1003_v12  ;;  %v6056_v13 = vpop.f32.mrb[56].mxu0  ;;  %1569 = vmatprep.mubr.bf16.mxu1 %v7358_v61 }
 0x22c   : > { %v6057_v14 = vpop.f32.mrb[57].mxu0  ;;  %v7878_v56 = vrot.slane %v533_v7, %v1329_v6  ;;  %v7880_v9 = vrot.slane %v533_v7, %v1333_v8 }
 0x22d   : > { %v6556_v24 = vpop.eup %6555  ;;  %6561 = vtanh.f32 %v1049_v23  ;;  %v6058_v16 = vadd.f32 %v6057_v14, %v6056_v13  ;;  %v6059_v17 = vpop.f32.mrb[58].mxu0 }
 0x22e   : > { %v6060_v19 = vpop.f32.mrb[59].mxu0  ;;  %vm1174_vm4 = vcmp.gt.f32.partialorder %v6556_v24, %v4895_v21 }
 0x22f   : > { %v6558_v20 = vpop.eup %6557  ;;  %v1008_v26 = vadd.f32 %v6058_v16, %v7764_v2  ;;  %v6061_v27 = vadd.f32 %v6060_v19, %v6059_v17  ;;  %v1262_v16 = vld [vmem:[%s7887_s10] sm:$0xff]  ;;  %v1264_v17 = vld [vmem:[%s7887_s10 + $0x10] sm:$0xff]  ;;  %v1265_v19 = vld [vmem:[%s7887_s10 + $0x18] sm:$0xff] }
 0x230   : > { %vm1175_vm5 = vcmp.gt.f32.partialorder %v6558_v20, %v4896_v15  ;;  %v1738_v29 = vmul.f32 2.0, %v1262_v16  ;;  %v7084_v16 = vld [vmem:[#allocation7 + $0x48] sm:$0xff]  }
 0x231   : > { %v1050_v30 = vmul.f32 0.5, %v1008_v26  ;;  %v1011_v44 = vadd.f32 %v6061_v27, %v7764_v2  ;;  %vm4975_vm6 = vmpackc.low %vm1175_vm5, %vm1174_vm4 }
 0x232   : > { %4976 = vmatmul.mubr.msk.bf16.gmra.mrb[48].mxu1 %vm4975_vm6, %v7359_v57  ;;  %v4983_v49 = vadd.f32 -1.0, %v1738_v29 }
 0x233   : > { %6563 = vtanh.f32 %v1050_v30  ;;  %v1051_v31 = vmul.f32 0.5, %v1011_v44  ;;  %v6062_v46 = vpop.f32.mrb[60].mxu0  ;;  %1579 = vmatprep.mubr.bf16.mxu1 %v7358_v61  ;;  %v1740_v30 = vmul.f32 2.0, %v1264_v17 }
 0x234   : > { %v6063_v32 = vpop.f32.mrb[61].mxu0 }
 0x235   : > { %v6560_v48 = vpop.eup %6559  ;;  %6565 = vtanh.f32 %v1051_v31  ;;  %v6064_v35 = vadd.f32 %v6063_v32, %v6062_v46  ;;  %v6065_v36 = vpop.f32.mrb[62].mxu0  ;;  %v1739_v32 = vmul.f32 2.0, %v1263_v18  ;;  %v4985_v37 = vadd.f32 -1.0, %v1740_v30 }
 0x236   : > { %v6066_v38 = vpop.f32.mrb[63].mxu0  ;;  %vm1176_vm7 = vcmp.gt.f32.partialorder %v6560_v48, %v4897_v33  ;;  %v1741_v33 = vmul.f32 2.0, %v1265_v19 }
 0x237   : > { %v6562_v39 = vpop.eup %6561  ;;  %v1016_v40 = vadd.f32 %v6064_v35, %v7764_v2  ;;  %v6067_v41 = vadd.f32 %v6066_v38, %v6065_v36  ;;  %v1267_v38 = vld [vmem:[%s7887_s10 + $0x28] sm:$0xff]  ;;  %v4984_v42 = vadd.f32 -1.0, %v1739_v32 }
 0x238   : > { %vm1177_vm8 = vcmp.gt.f32.partialorder %v6562_v39, %v4898_v34  ;;  %v1266_v39 = vld [vmem:[%s7887_s10 + $0x20] sm:$0xff]  ;;  %v4986_v43 = vadd.f32 -1.0, %v1741_v33  ;;  %v1743_v59 = vmul.f32 2.0, %v1267_v38  ;;  %v1275_v38 = vld [vmem:[%s7887_s10 + $0x68] sm:$0xff] }
 0x239   : > { %v1052_v45 = vmul.f32 0.5, %v1016_v40  ;;  %v1019_v50 = vadd.f32 %v6067_v41, %v7764_v2  ;;  %vm4977_vm9 = vmpackc.low %vm1177_vm8, %vm1176_vm7  ;;  %v4901_v2 = vadd.f32 -1.0, %v1116_v63  ;;  %v1268_v40 = vld [vmem:[%s7887_s10 + $0x30] sm:$0xff]  ;;  %v1742_v54 = vmul.f32 2.0, %v1266_v39  ;;  %v7085_v32 = vld [vmem:[#allocation7 + $0x8] sm:$0xff]  }
 0x23a   : > { %4978 = vmatmul.mubr.msk.bf16.gmra.mrb[52].mxu1 %vm4977_vm9, %v7359_v57  ;;  %v1274_v39 = vld [vmem:[%s7887_s10 + $0x60] sm:$0xff] }
 0x23b   : > { %6567 = vtanh.f32 %v1052_v45  ;;  %v1053_v47 = vmul.f32 0.5, %v1019_v50  ;;  %1589 = vmatprep.mubr.bf16.mxu1 %v7358_v61  ;;  %v1269_v45 = vld [vmem:[%s7887_s10 + $0x38] sm:$0xff] }
 0x23d   : > { %v6564_v53 = vpop.eup %6563  ;;  %6569 = vtanh.f32 %v1053_v47 }
 0x23e   : > { %vm1178_vm10 = vcmp.gt.f32.partialorder %v6564_v53, %v4899_v52 }
 0x23f   : > { %v6566_v62 = vpop.eup %6565 }
 0x240   : > { %vm1179_vm11 = vcmp.gt.f32.partialorder %v6566_v62, %v4900_v51  ;;  %v1744_v62 = vmul.f32 2.0, %v1268_v40  ;;  %v1276_v40 = vld [vmem:[%s7887_s10 + $0x70] sm:$0xff] }
 0x241   : > { %vm4979_vm12 = vmpackc.low %vm1179_vm11, %vm1178_vm10 }
 0x242   : > { %4980 = vmatmul.mubr.msk.bf16.gmra.mrb[56].mxu1 %vm4979_vm12, %v7359_v57 }
 0x243   : > { %1599 = vmatprep.mubr.bf16.mxu1 %v7358_v61 }
 0x245   : > { %v6568_v1 = vpop.eup %6567 }
 0x246   : > { %vm1180_vm13 = vcmp.gt.f32.partialorder %v6568_v1, %v4901_v2 }
 0x247   : > { %v6570_v3 = vpop.eup %6569 }
 0x248   : > { %vm1181_vm14 = vcmp.gt.f32.partialorder %v6570_v3, %v4902_v0  ;;  %v1745_v0 = vmul.f32 2.0, %v1269_v45  ;;  %v1277_v45 = vld [vmem:[%s7887_s10 + $0x78] sm:$0xff] }
 0x249   : > { %vm4981_vm15 = vmpackc.low %vm1181_vm14, %vm1180_vm13 }
 0x24a   : > { %4982 = vmatmul.mubr.msk.bf16.gmra.mrb[60].mxu1 %vm4981_vm15, %v7359_v57 }
 0x24b   : > { %2621 = vmatprep.mubr.bf16.mxu1 %v7358_v61 }
 0x2a5   : > { %v1451_v58 = vpop.f32.mrb[0].mxu1 }
 0x2a6   : > { %v1452_v10 = vadd.f32 %v1451_v58, %v7878_v56  ;;  %v1453_v11 = vpop.f32.mrb[1].mxu1  ;;  %v4987_v58 = vadd.f32 -1.0, %v1742_v54 }
 0x2a7   : > { %v1454_v22 = vadd.f32 %v1453_v11, %v7880_v9  ;;  %v1455_v60 = vpop.f32.mrb[2].mxu1  ;;  %v1271_v11 = vld [vmem:[%s7887_s10 + $0x48] sm:$0xff] }
 0x2a8   : > { %v1610_v12 = vmul.f32 0.5, %v1452_v10  ;;  %v1456_v23 = vadd.f32 %v1455_v60, %v7878_v56  ;;  %v1457_v13 = vpop.f32.mrb[3].mxu1  ;;  %v4989_v10 = vadd.f32 -1.0, %v1744_v62  ;;  %v1272_v60 = vld [vmem:[%s7887_s10 + $0x50] sm:$0xff]  ;;  %v1747_v19 = vmul.f32 2.0, %v1271_v11 }
 0x2a9   : > { %v1611_v14 = vmul.f32 0.5, %v1454_v22  ;;  %v1458_v21 = vadd.f32 %v1457_v13, %v7880_v9  ;;  %v1270_v22 = vld [vmem:[%s7887_s10 + $0x40] sm:$0xff]  ;;  %v4990_v13 = vadd.f32 -1.0, %v1745_v0  ;;  %v1751_v62 = vmul.f32 2.0, %v1275_v38 }
 0x2aa   : > { %6571 = vtanh.f32 %v1610_v12  ;;  %v1612_v15 = vmul.f32 0.5, %v1456_v23  ;;  %v4988_v23 = vadd.f32 -1.0, %v1743_v59 }
 0x2ab   : > { %6573 = vtanh.f32 %v1611_v14  ;;  %v1613_v24 = vmul.f32 0.5, %v1458_v21  ;;  %v1273_v14 = vld [vmem:[%s7887_s10 + $0x58] sm:$0xff] }
 0x2ac   : > { %6575 = vtanh.f32 %v1612_v15  ;;  %v7083_v21 = vld [vmem:[#allocation7] sm:$0xff]   ;;  %v1749_v30 = vmul.f32 2.0, %v1273_v14  ;;  %v1280_v14 = vld [vmem:[%s7887_s10 + $0x90] sm:$0xff] }
 0x2ad   : > { %6577 = vtanh.f32 %v1613_v24  ;;  %v1461_v25 = vpop.f32.mrb[4].mxu1 }
 0x2ae   : > { %v1462_v20 = vadd.f32 %v1461_v25, %v7878_v56  ;;  %v1463_v26 = vpop.f32.mrb[5].mxu1 }
 0x2af   : > { %v1464_v27 = vadd.f32 %v1463_v26, %v7880_v9  ;;  %v1465_v28 = vpop.f32.mrb[6].mxu1  ;;  %v1748_v26 = vmul.f32 2.0, %v1272_v60 }
 0x2b0   : > { %v1614_v44 = vmul.f32 0.5, %v1462_v20  ;;  %v1466_v31 = vadd.f32 %v1465_v28, %v7878_v56  ;;  %v1467_v46 = vpop.f32.mrb[7].mxu1  ;;  %v1746_v20 = vmul.f32 2.0, %v1270_v22 }
 0x2b1   : > { %v1615_v34 = vmul.f32 0.5, %v1464_v27  ;;  %v1468_v48 = vadd.f32 %v1467_v46, %v7880_v9 }
 0x2b2   : > { %6579 = vtanh.f32 %v1614_v44  ;;  %v1616_v35 = vmul.f32 0.5, %v1466_v31 }
 0x2b3   : > { %6581 = vtanh.f32 %v1615_v34  ;;  %v1617_v36 = vmul.f32 0.5, %v1468_v48  ;;  %v7086_v48 = vld [vmem:[#allocation7 + $0x50] sm:$0xff]  }
 0x2b4   : > { %v6572_v41 = vpop.eup %6571  ;;  %6583 = vtanh.f32 %v1616_v35 }
 0x2b5   : > { %v6574_v50 = vpop.eup %6573  ;;  %6585 = vtanh.f32 %v1617_v36  ;;  %v1471_v47 = vpop.f32.mrb[8].mxu1  ;;  %vm1866_vm0 = vcmp.gt.f32.partialorder %v6572_v41, %v4983_v49  ;;  %v4991_v49 = vadd.f32 -1.0, %v1746_v20 }
 0x2b6   : > { %v6576_v52 = vpop.eup %6575  ;;  %v1472_v51 = vadd.f32 %v1471_v47, %v7878_v56  ;;  %v1473_v53 = vpop.f32.mrb[9].mxu1  ;;  %vm1867_vm2 = vcmp.gt.f32.partialorder %v6574_v50, %v4984_v42  ;;  %v4992_v42 = vadd.f32 -1.0, %v1747_v19  ;;  %v7087_v50 = vld [vmem:[#allocation7 + $0x10] sm:$0xff]   ;;  %v7092_v19 = vld [vmem:[#allocation7 + $0x68] sm:$0xff]  }
 0x2b7   : > { %v6578_v63 = vpop.eup %6577  ;;  %v1474_v55 = vadd.f32 %v1473_v53, %v7880_v9  ;;  %v1475_v2 = vpop.f32.mrb[10].mxu1  ;;  %vm1868_vm1 = vcmp.gt.f32.partialorder %v6576_v52, %v4985_v37  ;;  %v4993_v37 = vadd.f32 -1.0, %v1748_v26 }
 0x2b8   : > { %v1618_v1 = vmul.f32 0.5, %v1472_v51  ;;  %v1476_v3 = vadd.f32 %v1475_v2, %v7878_v56  ;;  %v1477_v4 = vpop.f32.mrb[11].mxu1  ;;  %vm1869_vm3 = vcmp.gt.f32.partialorder %v6578_v63, %v4986_v43  ;;  %vm5145_vm4 = vmpackc.low %vm1868_vm1, %vm1866_vm0  ;;  %v4994_v43 = vadd.f32 -1.0, %v1749_v30  ;;  %v7088_v51 = vld [vmem:[#allocation7 + $0x58] sm:$0xff]  }
 0x2b9   : > { %v1619_v5 = vmul.f32 0.5, %v1474_v55  ;;  %v1478_v6 = vadd.f32 %v1477_v4, %v7880_v9  ;;  %vm5143_vm5 = vmpackc.low %vm1869_vm3, %vm1867_vm2  ;;  %v1750_v63 = vmul.f32 2.0, %v1274_v39  ;;  %v1752_v55 = vmul.f32 2.0, %v1276_v40 }
 0x2ba   : > { %6587 = vtanh.f32 %v1618_v1  ;;  %v1620_v7 = vmul.f32 0.5, %v1476_v3  ;;  %5144 = vmatprep.mubr.msk.bf16.mxu0 %vm5143_vm5, %v7359_v57  ;;  %v1753_v3 = vmul.f32 2.0, %v1277_v45  ;;  %v1756_v30 = vmul.f32 2.0, %v1280_v14  ;;  %v1284_v45 = vld [vmem:[%s7887_s10 + $0xb0] sm:$0xff] }
 0x2bb   : > { %6589 = vtanh.f32 %v1619_v5  ;;  %v1621_v8 = vmul.f32 0.5, %v1478_v6  ;;  %5146 = vmatmul.mubr.msk.bf16.vlgmr.msra.gmra.mrb[64].mxu0 %vm5145_vm4, %v7359_v57  ;;  %v4995_v60 = vadd.f32 -1.0, %v1750_v63 }
 0x2bc   : > { %v6580_v12 = vpop.eup %6579  ;;  %6591 = vtanh.f32 %v1620_v7  ;;  %6181 = vmatpush3.bf16.msra.mxu0 %v7083_v21  ;;  %v7089_v7 = vld [vmem:[#allocation7 + $0x18] sm:$0xff]  }
 0x2bd   : > { %v6582_v15 = vpop.eup %6581  ;;  %6593 = vtanh.f32 %v1621_v8  ;;  %v1481_v24 = vpop.f32.mrb[12].mxu1  ;;  %6182 = vmatprep.subr.bf16.mxu0 %v7084_v16  ;;  %vm1870_vm6 = vcmp.gt.f32.partialorder %v6580_v12, %v4987_v58  ;;  %v4997_v12 = vadd.f32 -1.0, %v1752_v55  ;;  %v1281_v16 = vld [vmem:[%s7887_s10 + $0x98] sm:$0xff] }
 0x2be   : > { %v6584_v17 = vpop.eup %6583  ;;  %v1482_v25 = vadd.f32 %v1481_v24, %v7878_v56  ;;  %v1483_v18 = vpop.f32.mrb[13].mxu1  ;;  %vm1871_vm8 = vcmp.gt.f32.partialorder %v6582_v15, %v4988_v23  ;;  %v1279_v23 = vld [vmem:[%s7887_s10 + $0x88] sm:$0xff]  ;;  %v4996_v15 = vadd.f32 -1.0, %v1751_v62  ;;  %v4998_v24 = vadd.f32 -1.0, %v1753_v3  ;;  %v7096_v62 = vld [vmem:[#allocation7 + $0x78] sm:$0xff]  }
 0x2bf   : > { %v6586_v27 = vpop.eup %6585  ;;  %v1484_v28 = vadd.f32 %v1483_v18, %v7880_v9  ;;  %v1485_v29 = vpop.f32.mrb[14].mxu1  ;;  %vm1872_vm7 = vcmp.gt.f32.partialorder %v6584_v17, %v4989_v10  ;;  %v7090_v10 = vld [vmem:[#allocation7 + $0x60] sm:$0xff]   ;;  %v1760_v3 = vmul.f32 2.0, %v1284_v45 }
 0x2c0   : > { %v1622_v44 = vmul.f32 0.5, %v1482_v25  ;;  %v1486_v31 = vadd.f32 %v1485_v29, %v7878_v56  ;;  %v1487_v46 = vpop.f32.mrb[15].mxu1  ;;  %vm1873_vm9 = vcmp.gt.f32.partialorder %v6586_v27, %v4990_v13  ;;  %vm5149_vm10 = vmpackc.low %vm1872_vm7, %vm1870_vm6  ;;  %6183 = vmatpush3.bf16.msra.mxu0 %v7085_v32  ;;  %v1278_v13 = vld [vmem:[%s7887_s10 + $0x80] sm:$0xff]  ;;  %v1757_v32 = vmul.f32 2.0, %v1281_v16 }
 0x2c1   : > { %v1623_v33 = vmul.f32 0.5, %v1484_v28  ;;  %v1488_v34 = vadd.f32 %v1487_v46, %v7880_v9  ;;  %vm5147_vm11 = vmpackc.low %vm1873_vm9, %vm1871_vm8  ;;  %6184 = vmatprep.subr.bf16.mxu0 %v7086_v48  ;;  %v7091_v17 = vld [vmem:[#allocation7 + $0x20] sm:$0xff]   ;;  %v1755_v28 = vmul.f32 2.0, %v1279_v23  ;;  %v1754_v29 = vmul.f32 2.0, %v1278_v13 }
 0x2c2   : > { %6595 = vtanh.f32 %v1622_v44  ;;  %v1624_v35 = vmul.f32 0.5, %v1486_v31  ;;  %5148 = vmatprep.mubr.msk.bf16.mxu0 %vm5147_vm11, %v7359_v57  ;;  %v5005_v14 = vadd.f32 -1.0, %v1760_v3 }
 0x2c3   : > { %6597 = vtanh.f32 %v1623_v33  ;;  %v1625_v36 = vmul.f32 0.5, %v1488_v34  ;;  %5150 = vmatmul.mubr.msk.bf16.gmra.mrb[68].mxu0 %vm5149_vm10, %v7359_v57  ;;  %v4999_v40 = vadd.f32 -1.0, %v1754_v29 }
 0x2c4   : > { %v6588_v41 = vpop.eup %6587  ;;  %6599 = vtanh.f32 %v1624_v35  ;;  %6185 = vmatpush3.bf16.msra.mxu0 %v7087_v50  ;;  %v7093_v35 = vld [vmem:[#allocation7 + $0x28] sm:$0xff]  }
 0x2c5   : > { %v6590_v47 = vpop.eup %6589  ;;  %6601 = vtanh.f32 %v1625_v36  ;;  %v1491_v52 = vpop.f32.mrb[16].mxu1  ;;  %6186 = vmatprep.subr.bf16.mxu0 %v7088_v51  ;;  %vm1874_vm12 = vcmp.gt.f32.partialorder %v6588_v41, %v4991_v49  ;;  %v5001_v41 = vadd.f32 -1.0, %v1756_v30  ;;  %v1285_v51 = vld [vmem:[%s7887_s10 + $0xb8] sm:$0xff] }
 0x2c6   : > { %v6592_v53 = vpop.eup %6591  ;;  %v1492_v59 = vadd.f32 %v1491_v52, %v7878_v56  ;;  %v1493_v54 = vpop.f32.mrb[17].mxu1  ;;  %vm1875_vm14 = vcmp.gt.f32.partialorder %v6590_v47, %v4992_v42  ;;  %v1283_v42 = vld [vmem:[%s7887_s10 + $0xa8] sm:$0xff]  ;;  %v5000_v47 = vadd.f32 -1.0, %v1755_v28  ;;  %v5002_v52 = vadd.f32 -1.0, %v1757_v32 }
 0x2c7   : > { %v6594_v2 = vpop.eup %6593  ;;  %v1494_v0 = vadd.f32 %v1493_v54, %v7880_v9  ;;  %v1495_v1 = vpop.f32.mrb[18].mxu1  ;;  %vm1876_vm13 = vcmp.gt.f32.partialorder %v6592_v53, %v4993_v37  ;;  %v7094_v37 = vld [vmem:[#allocation7 + $0x70] sm:$0xff]  }
 0x2c8   : > { %v1626_v4 = vmul.f32 0.5, %v1492_v59  ;;  %v1496_v5 = vadd.f32 %v1495_v1, %v7878_v56  ;;  %v1497_v6 = vpop.f32.mrb[19].mxu1  ;;  %vm1877_vm15 = vcmp.gt.f32.partialorder %v6594_v2, %v4994_v43  ;;  %vm5153_vm0 = vmpackc.low %vm1876_vm13, %vm1874_vm12  ;;  %6187 = vmatpush3.bf16.msra.mxu0 %v7089_v7  ;;  %v1282_v43 = vld [vmem:[%s7887_s10 + $0xa0] sm:$0xff]  ;;  %v7095_v53 = vld [vmem:[#allocation7 + $0x30] sm:$0xff]   ;;  %v1761_v7 = vmul.f32 2.0, %v1285_v51 }
 0x2c9   : > { %v1627_v8 = vmul.f32 0.5, %v1494_v0  ;;  %v1498_v58 = vadd.f32 %v1497_v6, %v7880_v9  ;;  %vm5151_vm1 = vmpackc.low %vm1877_vm15, %vm1875_vm14  ;;  %6188 = vmatprep.subr.bf16.mxu0 %v7090_v10  ;;  %v1759_v0 = vmul.f32 2.0, %v1283_v42  ;;  %v1758_v1 = vmul.f32 2.0, %v1282_v43  ;;  %v1290_v42 = vld [vmem:[%s7887_s10 + $0xe0] sm:$0xff]  ;;  %v1292_v43 = vld [vmem:[%s7887_s10 + $0xf0] sm:$0xff] }
 0x2ca   : > { %6603 = vtanh.f32 %v1626_v4  ;;  %v1628_v11 = vmul.f32 0.5, %v1496_v5  ;;  %5152 = vmatprep.mubr.msk.bf16.mxu0 %vm5151_vm1, %v7359_v57 }
 0x2cb   : > { %6605 = vtanh.f32 %v1627_v8  ;;  %v1629_v22 = vmul.f32 0.5, %v1498_v58  ;;  %5154 = vmatmul.mubr.msk.bf16.gmra.mrb[72].mxu0 %vm5153_vm0, %v7359_v57  ;;  %v5003_v13 = vadd.f32 -1.0, %v1758_v1 }
 0x2cc   : > { %v6596_v21 = vpop.eup %6595  ;;  %6607 = vtanh.f32 %v1628_v11  ;;  %6189 = vmatpush3.bf16.msra.mxu0 %v7091_v17  ;;  %v7097_v11 = vld [vmem:[#allocation7 + $0x38] sm:$0xff]   ;;  %v5004_v17 = vadd.f32 -1.0, %v1759_v0 }
 0x2cd   : > { %v6598_v25 = vpop.eup %6597  ;;  %6609 = vtanh.f32 %v1629_v22  ;;  %v1501_v18 = vpop.f32.mrb[20].mxu1  ;;  %6190 = vmatprep.subr.bf16.mxu0 %v7092_v19  ;;  %vm1878_vm2 = vcmp.gt.f32.partialorder %v6596_v21, %v4995_v60  ;;  %v1287_v21 = vld [vmem:[%s7887_s10 + $0xc8] sm:$0xff] }
 0x2ce   : > { %v6600_v20 = vpop.eup %6599  ;;  %v1502_v26 = vadd.f32 %v1501_v18, %v7878_v56  ;;  %v1503_v27 = vpop.f32.mrb[21].mxu1  ;;  %vm1879_vm4 = vcmp.gt.f32.partialorder %v6598_v25, %v4996_v15  ;;  %v1286_v15 = vld [vmem:[%s7887_s10 + $0xc0] sm:$0xff]  ;;  %v5006_v25 = vadd.f32 -1.0, %v1761_v7  ;;  %v1289_v18 = vld [vmem:[%s7887_s10 + $0xd8] sm:$0xff]  ;;  %v1763_v29 = vmul.f32 2.0, %v1287_v21 }
 0x2cf   : > { %v6602_v44 = vpop.eup %6601  ;;  %v1504_v31 = vadd.f32 %v1503_v27, %v7880_v9  ;;  %v1505_v46 = vpop.f32.mrb[22].mxu1  ;;  %vm1880_vm3 = vcmp.gt.f32.partialorder %v6600_v20, %v4997_v12  ;;  %v1762_v30 = vmul.f32 2.0, %v1286_v15 }
 0x2d0   : > { %v1630_v33 = vmul.f32 0.5, %v1502_v26  ;;  %v1506_v34 = vadd.f32 %v1505_v46, %v7878_v56  ;;  %v1507_v48 = vpop.f32.mrb[23].mxu1  ;;  %vm1881_vm5 = vcmp.gt.f32.partialorder %v6602_v44, %v4998_v24  ;;  %vm5157_vm6 = vmpackc.low %vm1880_vm3, %vm1878_vm2  ;;  %6191 = vmatpush3.bf16.msra.mxu0 %v7093_v35  ;;  %v1288_v24 = vld [vmem:[%s7887_s10 + $0xd0] sm:$0xff] }
 0x2d1   : > { %v1631_v36 = vmul.f32 0.5, %v1504_v31  ;;  %v1508_v49 = vadd.f32 %v1507_v48, %v7880_v9  ;;  %vm5155_vm7 = vmpackc.low %vm1881_vm5, %vm1879_vm4  ;;  %6192 = vmatprep.subr.bf16.mxu0 %v7094_v37  ;;  %v1764_v44 = vmul.f32 2.0, %v1288_v24  ;;  %v1297_v24 = vld [vmem:[%s7887_s10 + $0x118] sm:$0xff] }
 0x2d2   : > { %6611 = vtanh.f32 %v1630_v33  ;;  %v1632_v38 = vmul.f32 0.5, %v1506_v34  ;;  %5156 = vmatprep.mubr.msk.bf16.mxu0 %vm5155_vm7, %v7359_v57  ;;  %v1765_v33 = vmul.f32 2.0, %v1289_v18 }
 0x2d3   : > { %6613 = vtanh.f32 %v1631_v36  ;;  %v1633_v39 = vmul.f32 0.5, %v1508_v49  ;;  %5158 = vmatmul.mubr.msk.bf16.gmra.mrb[76].mxu0 %vm5157_vm6, %v7359_v57 }
 0x2d4   : > { %v6604_v50 = vpop.eup %6603  ;;  %6615 = vtanh.f32 %v1632_v38  ;;  %6193 = vmatpush3.bf16.msra.mxu0 %v7095_v53 }
 0x2d5   : > { %v6606_v59 = vpop.eup %6605  ;;  %6617 = vtanh.f32 %v1633_v39  ;;  %v1511_v54 = vpop.f32.mrb[24].mxu1  ;;  %6194 = vmatprep.subr.bf16.mxu0 %v7096_v62  ;;  %vm1882_vm8 = vcmp.gt.f32.partialorder %v6604_v50, %v4999_v40  ;;  %v5007_v39 = vadd.f32 -1.0, %v1762_v30  ;;  %v5009_v40 = vadd.f32 -1.0, %v1764_v44 }
 0x2d6   : > { %v6608_v63 = vpop.eup %6607  ;;  %v1512_v55 = vadd.f32 %v1511_v54, %v7878_v56  ;;  %v1513_v2 = vpop.f32.mrb[25].mxu1  ;;  %vm1883_vm10 = vcmp.gt.f32.partialorder %v6606_v59, %v5000_v47  ;;  %v5008_v50 = vadd.f32 -1.0, %v1763_v29  ;;  %v5010_v47 = vadd.f32 -1.0, %v1765_v33 }
 0x2d7   : > { %v6610_v4 = vpop.eup %6609  ;;  %v1514_v5 = vadd.f32 %v1513_v2, %v7880_v9  ;;  %v1515_v6 = vpop.f32.mrb[26].mxu1  ;;  %vm1884_vm9 = vcmp.gt.f32.partialorder %v6608_v63, %v5001_v41  ;;  %v1291_v41 = vld [vmem:[%s7887_s10 + $0xe8] sm:$0xff]  ;;  %v1768_v2 = vmul.f32 2.0, %v1292_v43  ;;  %v1773_v44 = vmul.f32 2.0, %v1297_v24  ;;  %v1301_v43 = vld [vmem:[%s7887_s10 + $0x138] sm:$0xff] }
 0x2d8   : > { %v1634_v8 = vmul.f32 0.5, %v1512_v55  ;;  %v1516_v58 = vadd.f32 %v1515_v6, %v7878_v56  ;;  %v1517_v10 = vpop.f32.mrb[27].mxu1  ;;  %vm1885_vm11 = vcmp.gt.f32.partialorder %v6610_v4, %v5002_v52  ;;  %vm5161_vm12 = vmpackc.low %vm1884_vm9, %vm1882_vm8  ;;  %6195 = vmatpush3.bf16.msra.mxu0 %v7097_v11  ;;  %v1293_v52 = vld [vmem:[%s7887_s10 + $0xf8] sm:$0xff]  ;;  %v1767_v63 = vmul.f32 2.0, %v1291_v41 }
 0x2d9   : > { %v1635_v22 = vmul.f32 0.5, %v1514_v5  ;;  %v1518_v60 = vadd.f32 %v1517_v10, %v7880_v9  ;;  %vm5159_vm13 = vmpackc.low %vm1885_vm11, %vm1883_vm10  ;;  %v1766_v55 = vmul.f32 2.0, %v1290_v42  ;;  %v1769_v4 = vmul.f32 2.0, %v1293_v52 }
 0x2da   : > { %6619 = vtanh.f32 %v1634_v8  ;;  %v1636_v12 = vmul.f32 0.5, %v1516_v58  ;;  %5160 = vmatprep.mubr.msk.bf16.mxu0 %vm5159_vm13, %v7359_v57  ;;  %v5012_v21 = vadd.f32 -1.0, %v1767_v63  ;;  %v5018_v42 = vadd.f32 -1.0, %v1773_v44 }
 0x2db   : > { %6621 = vtanh.f32 %v1635_v22  ;;  %v1637_v23 = vmul.f32 0.5, %v1518_v60  ;;  %5162 = vmatmul.mubr.msk.bf16.gmra.mrb[80].mxu0 %vm5161_vm12, %v7359_v57  ;;  %v5011_v22 = vadd.f32 -1.0, %v1766_v55  ;;  %v5013_v60 = vadd.f32 -1.0, %v1768_v2 }
 0x2dc   : > { %v6612_v16 = vpop.eup %6611  ;;  %6623 = vtanh.f32 %v1636_v12  ;;  %v1295_v12 = vld [vmem:[%s7887_s10 + $0x108] sm:$0xff]  ;;  %v5014_v15 = vadd.f32 -1.0, %v1769_v4  ;;  %v1777_v2 = vmul.f32 2.0, %v1301_v43 }
 0x2dd   : > { %v6614_v19 = vpop.eup %6613  ;;  %6625 = vtanh.f32 %v1637_v23  ;;  %v1521_v20 = vpop.f32.mrb[28].mxu1  ;;  %vm1886_vm14 = vcmp.gt.f32.partialorder %v6612_v16, %v5003_v13  ;;  %v1294_v23 = vld [vmem:[%s7887_s10 + $0x100] sm:$0xff]  ;;  %v1296_v13 = vld [vmem:[%s7887_s10 + $0x110] sm:$0xff] }
 0x2de   : > { %v6616_v26 = vpop.eup %6615  ;;  %v1522_v27 = vadd.f32 %v1521_v20, %v7878_v56  ;;  %v1523_v28 = vpop.f32.mrb[29].mxu1  ;;  %vm1887_vm0 = vcmp.gt.f32.partialorder %v6614_v19, %v5004_v17  ;;  %v1771_v20 = vmul.f32 2.0, %v1295_v12 }
 0x2df   : > { %v6618_v31 = vpop.eup %6617  ;;  %v1524_v46 = vadd.f32 %v1523_v28, %v7880_v9  ;;  %v1525_v32 = vpop.f32.mrb[30].mxu1  ;;  %vm1888_vm15 = vcmp.gt.f32.partialorder %v6616_v26, %v5005_v14  ;;  %v1770_v26 = vmul.f32 2.0, %v1294_v23  ;;  %v5022_v23 = vadd.f32 -1.0, %v1777_v2 }
 0x2e0   : > { %v1638_v34 = vmul.f32 0.5, %v1522_v27  ;;  %v1526_v48 = vadd.f32 %v1525_v32, %v7878_v56  ;;  %v1527_v35 = vpop.f32.mrb[31].mxu1  ;;  %vm1889_vm1 = vcmp.gt.f32.partialorder %v6618_v31, %v5006_v25  ;;  %vm5165_vm2 = vmpackc.low %vm1888_vm15, %vm1886_vm14  ;;  %v1772_v27 = vmul.f32 2.0, %v1296_v13  ;;  %v1305_v13 = vld [vmem:[%s7887_s10 + $0x158] sm:$0xff] }
 0x2e1   : > { %v1639_v36 = vmul.f32 0.5, %v1524_v46  ;;  %v1528_v49 = vadd.f32 %v1527_v35, %v7880_v9  ;;  %vm5163_vm3 = vmpackc.low %vm1889_vm1, %vm1887_vm0  ;;  %v5016_v41 = vadd.f32 -1.0, %v1771_v20 }
 0x2e2   : > { %6627 = vtanh.f32 %v1638_v34  ;;  %v1640_v37 = vmul.f32 0.5, %v1526_v48  ;;  %5164 = vmatprep.mubr.msk.bf16.mxu0 %vm5163_vm3, %v7359_v57 }
 0x2e3   : > { %6629 = vtanh.f32 %v1639_v36  ;;  %v1641_v38 = vmul.f32 0.5, %v1528_v49  ;;  %5166 = vmatmul.mubr.msk.bf16.gmra.mrb[84].mxu0 %vm5165_vm2, %v7359_v57  ;;  %v5015_v36 = vadd.f32 -1.0, %v1770_v26  ;;  %v5017_v49 = vadd.f32 -1.0, %v1772_v27 }
 0x2e4   : > { %v6620_v45 = vpop.eup %6619  ;;  %6631 = vtanh.f32 %v1640_v37  ;;  %v1299_v37 = vld [vmem:[%s7887_s10 + $0x128] sm:$0xff]  ;;  %v1781_v27 = vmul.f32 2.0, %v1305_v13 }
 0x2e5   : > { %v6622_v51 = vpop.eup %6621  ;;  %6633 = vtanh.f32 %v1641_v38  ;;  %v1531_v53 = vpop.f32.mrb[32].mxu1  ;;  %vm1890_vm4 = vcmp.gt.f32.partialorder %v6620_v45, %v5007_v39  ;;  %v1298_v38 = vld [vmem:[%s7887_s10 + $0x120] sm:$0xff]  ;;  %v1300_v39 = vld [vmem:[%s7887_s10 + $0x130] sm:$0xff] }
 0x2e6   : > { %v6624_v59 = vpop.eup %6623  ;;  %v1532_v54 = vadd.f32 %v1531_v53, %v7878_v56  ;;  %v1533_v62 = vpop.f32.mrb[33].mxu1  ;;  %vm1891_vm6 = vcmp.gt.f32.partialorder %v6622_v51, %v5008_v50  ;;  %v1775_v53 = vmul.f32 2.0, %v1299_v37 }
 0x2e7   : > { %v6626_v0 = vpop.eup %6625  ;;  %v1534_v1 = vadd.f32 %v1533_v62, %v7880_v9  ;;  %v1535_v3 = vpop.f32.mrb[34].mxu1  ;;  %vm1892_vm5 = vcmp.gt.f32.partialorder %v6624_v59, %v5009_v40  ;;  %v1774_v59 = vmul.f32 2.0, %v1298_v38  ;;  %v5026_v38 = vadd.f32 -1.0, %v1781_v27 }
 0x2e8   : > { %v1642_v5 = vmul.f32 0.5, %v1532_v54  ;;  %v1536_v6 = vadd.f32 %v1535_v3, %v7878_v56  ;;  %v1537_v7 = vpop.f32.mrb[35].mxu1  ;;  %vm1893_vm7 = vcmp.gt.f32.partialorder %v6626_v0, %v5010_v47  ;;  %vm5169_vm8 = vmpackc.low %vm1892_vm5, %vm1890_vm4  ;;  %v1776_v54 = vmul.f32 2.0, %v1300_v39  ;;  %v1309_v39 = vld [vmem:[%s7887_s10 + $0x178] sm:$0xff] }
 0x2e9   : > { %v1643_v8 = vmul.f32 0.5, %v1534_v1  ;;  %v1538_v58 = vadd.f32 %v1537_v7, %v7880_v9  ;;  %vm5167_vm9 = vmpackc.low %vm1893_vm7, %vm1891_vm6  ;;  %v5020_v12 = vadd.f32 -1.0, %v1775_v53 }
 0x2ea   : > { %6635 = vtanh.f32 %v1642_v5  ;;  %v1644_v10 = vmul.f32 0.5, %v1536_v6  ;;  %5168 = vmatprep.mubr.msk.bf16.mxu0 %vm5167_vm9, %v7359_v57 }
 0x2eb   : > { %6637 = vtanh.f32 %v1643_v8  ;;  %v1645_v11 = vmul.f32 0.5, %v1538_v58  ;;  %5170 = vmatmul.mubr.msk.bf16.gmra.mrb[88].mxu0 %vm5169_vm8, %v7359_v57  ;;  %v5019_v8 = vadd.f32 -1.0, %v1774_v59  ;;  %v5021_v58 = vadd.f32 -1.0, %v1776_v54 }
 0x2ec   : > { %v6628_v14 = vpop.eup %6627  ;;  %6639 = vtanh.f32 %v1644_v10  ;;  %v1303_v10 = vld [vmem:[%s7887_s10 + $0x148] sm:$0xff]  ;;  %v1785_v54 = vmul.f32 2.0, %v1309_v39 }
 0x2ed   : > { %v6630_v16 = vpop.eup %6629  ;;  %6641 = vtanh.f32 %v1645_v11  ;;  %v1541_v17 = vpop.f32.mrb[36].mxu1  ;;  %vm1894_vm10 = vcmp.gt.f32.partialorder %v6628_v14, %v5011_v22  ;;  %v1302_v11 = vld [vmem:[%s7887_s10 + $0x140] sm:$0xff]  ;;  %v1304_v22 = vld [vmem:[%s7887_s10 + $0x150] sm:$0xff] }
 0x2ee   : > { %v6632_v25 = vpop.eup %6631  ;;  %v1542_v18 = vadd.f32 %v1541_v17, %v7878_v56  ;;  %v1543_v19 = vpop.f32.mrb[37].mxu1  ;;  %vm1895_vm12 = vcmp.gt.f32.partialorder %v6630_v16, %v5012_v21  ;;  %v1779_v17 = vmul.f32 2.0, %v1303_v10 }
 0x2ef   : > { %v6634_v28 = vpop.eup %6633  ;;  %v1544_v29 = vadd.f32 %v1543_v19, %v7880_v9  ;;  %v1545_v30 = vpop.f32.mrb[38].mxu1  ;;  %vm1896_vm11 = vcmp.gt.f32.partialorder %v6632_v25, %v5013_v60  ;;  %v1778_v25 = vmul.f32 2.0, %v1302_v11  ;;  %v5030_v11 = vadd.f32 -1.0, %v1785_v54 }
 0x2f0   : > { %v1646_v31 = vmul.f32 0.5, %v1542_v18  ;;  %v1546_v46 = vadd.f32 %v1545_v30, %v7878_v56  ;;  %v1547_v32 = vpop.f32.mrb[39].mxu1  ;;  %vm1897_vm13 = vcmp.gt.f32.partialorder %v6634_v28, %v5014_v15  ;;  %vm5173_vm14 = vmpackc.low %vm1896_vm11, %vm1894_vm10  ;;  %v1780_v18 = vmul.f32 2.0, %v1304_v22  ;;  %v1313_v22 = vld [vmem:[%s7887_s10 + $0x198] sm:$0xff] }
 0x2f1   : > { %v1647_v33 = vmul.f32 0.5, %v1544_v29  ;;  %v1548_v34 = vadd.f32 %v1547_v32, %v7880_v9  ;;  %vm5171_vm15 = vmpackc.low %vm1897_vm13, %vm1895_vm12  ;;  %v5024_v37 = vadd.f32 -1.0, %v1779_v17 }
 0x2f2   : > { %6643 = vtanh.f32 %v1646_v31  ;;  %v1648_v48 = vmul.f32 0.5, %v1546_v46  ;;  %5172 = vmatprep.mubr.msk.bf16.mxu0 %vm5171_vm15, %v7359_v57 }
 0x2f3   : > { %6645 = vtanh.f32 %v1647_v33  ;;  %v1649_v35 = vmul.f32 0.5, %v1548_v34  ;;  %5174 = vmatmul.mubr.msk.bf16.gmra.mrb[92].mxu0 %vm5173_vm14, %v7359_v57  ;;  %v5023_v33 = vadd.f32 -1.0, %v1778_v25  ;;  %v5025_v34 = vadd.f32 -1.0, %v1780_v18 }
 0x2f4   : > { %v6636_v40 = vpop.eup %6635  ;;  %6647 = vtanh.f32 %v1648_v48  ;;  %v1307_v48 = vld [vmem:[%s7887_s10 + $0x168] sm:$0xff]  ;;  %v1789_v18 = vmul.f32 2.0, %v1313_v22 }
 0x2f5   : > { %v6638_v45 = vpop.eup %6637  ;;  %6649 = vtanh.f32 %v1649_v35  ;;  %v1551_v50 = vpop.f32.mrb[40].mxu1  ;;  %vm1898_vm0 = vcmp.gt.f32.partialorder %v6636_v40, %v5015_v36  ;;  %v1306_v35 = vld [vmem:[%s7887_s10 + $0x160] sm:$0xff]  ;;  %v1308_v36 = vld [vmem:[%s7887_s10 + $0x170] sm:$0xff] }
 0x2f6   : > { %v6640_v47 = vpop.eup %6639  ;;  %v1552_v52 = vadd.f32 %v1551_v50, %v7878_v56  ;;  %v1553_v51 = vpop.f32.mrb[41].mxu1  ;;  %vm1899_vm2 = vcmp.gt.f32.partialorder %v6638_v45, %v5016_v41  ;;  %v1783_v50 = vmul.f32 2.0, %v1307_v48 }
 0x2f7   : > { %v6642_v62 = vpop.eup %6641  ;;  %v1554_v63 = vadd.f32 %v1553_v51, %v7880_v9  ;;  %v1555_v55 = vpop.f32.mrb[42].mxu1  ;;  %vm1900_vm1 = vcmp.gt.f32.partialorder %v6640_v47, %v5017_v49  ;;  %v1782_v47 = vmul.f32 2.0, %v1306_v35  ;;  %v5034_v35 = vadd.f32 -1.0, %v1789_v18 }
 0x2f8   : > { %v1650_v0 = vmul.f32 0.5, %v1552_v52  ;;  %v1556_v1 = vadd.f32 %v1555_v55, %v7878_v56  ;;  %v1557_v3 = vpop.f32.mrb[43].mxu1  ;;  %vm1901_vm3 = vcmp.gt.f32.partialorder %v6642_v62, %v5018_v42  ;;  %vm5177_vm4 = vmpackc.low %vm1900_vm1, %vm1898_vm0  ;;  %v1784_v52 = vmul.f32 2.0, %v1308_v36  ;;  %v1317_v36 = vld [vmem:[%s7887_s10 + $0x1b8] sm:$0xff] }
 0x2f9   : > { %v1651_v4 = vmul.f32 0.5, %v1554_v63  ;;  %v1558_v5 = vadd.f32 %v1557_v3, %v7880_v9  ;;  %vm5175_vm5 = vmpackc.low %vm1901_vm3, %vm1899_vm2  ;;  %v5028_v10 = vadd.f32 -1.0, %v1783_v50 }
 0x2fa   : > { %6651 = vtanh.f32 %v1650_v0  ;;  %v1652_v6 = vmul.f32 0.5, %v1556_v1  ;;  %5176 = vmatprep.mubr.msk.bf16.mxu0 %vm5175_vm5, %v7359_v57 }
 0x2fb   : > { %6653 = vtanh.f32 %v1651_v4  ;;  %v1653_v7 = vmul.f32 0.5, %v1558_v5  ;;  %5178 = vmatmul.mubr.msk.bf16.gmra.mrb[96].mxu0 %vm5177_vm4, %v7359_v57  ;;  %v5027_v4 = vadd.f32 -1.0, %v1782_v47  ;;  %v5029_v5 = vadd.f32 -1.0, %v1784_v52 }
 0x2fc   : > { %v6644_v60 = vpop.eup %6643  ;;  %6655 = vtanh.f32 %v1652_v6  ;;  %v1311_v6 = vld [vmem:[%s7887_s10 + $0x188] sm:$0xff]  ;;  %v1793_v52 = vmul.f32 2.0, %v1317_v36 }
 0x2fd   : > { %v6646_v14 = vpop.eup %6645  ;;  %6657 = vtanh.f32 %v1653_v7  ;;  %v1561_v21 = vpop.f32.mrb[44].mxu1  ;;  %vm1902_vm6 = vcmp.gt.f32.partialorder %v6644_v60, %v5019_v8  ;;  %v1310_v7 = vld [vmem:[%s7887_s10 + $0x180] sm:$0xff]  ;;  %v1312_v8 = vld [vmem:[%s7887_s10 + $0x190] sm:$0xff] }
 0x2fe   : > { %v6648_v15 = vpop.eup %6647  ;;  %v1562_v24 = vadd.f32 %v1561_v21, %v7878_v56  ;;  %v1563_v16 = vpop.f32.mrb[45].mxu1  ;;  %vm1903_vm8 = vcmp.gt.f32.partialorder %v6646_v14, %v5020_v12  ;;  %v1787_v21 = vmul.f32 2.0, %v1311_v6 }
 0x2ff   : > { %v6650_v19 = vpop.eup %6649  ;;  %v1564_v20 = vadd.f32 %v1563_v16, %v7880_v9  ;;  %v1565_v26 = vpop.f32.mrb[46].mxu1  ;;  %vm1904_vm7 = vcmp.gt.f32.partialorder %v6648_v15, %v5021_v58  ;;  %v1786_v15 = vmul.f32 2.0, %v1310_v7  ;;  %v5038_v7 = vadd.f32 -1.0, %v1793_v52 }
 0x300   : > { %v1654_v28 = vmul.f32 0.5, %v1562_v24  ;;  %v1566_v29 = vadd.f32 %v1565_v26, %v7878_v56  ;;  %v1567_v30 = vpop.f32.mrb[47].mxu1  ;;  %vm1905_vm9 = vcmp.gt.f32.partialorder %v6650_v19, %v5022_v23  ;;  %vm5181_vm10 = vmpackc.low %vm1904_vm7, %vm1902_vm6  ;;  %v1788_v24 = vmul.f32 2.0, %v1312_v8  ;;  %v1321_v8 = vld [vmem:[%s7887_s10 + $0x1d8] sm:$0xff] }
 0x301   : > { %v1655_v44 = vmul.f32 0.5, %v1564_v20  ;;  %v1568_v31 = vadd.f32 %v1567_v30, %v7880_v9  ;;  %vm5179_vm11 = vmpackc.low %vm1905_vm9, %vm1903_vm8  ;;  %v5032_v48 = vadd.f32 -1.0, %v1787_v21 }
 0x302   : > { %6659 = vtanh.f32 %v1654_v28  ;;  %v1656_v46 = vmul.f32 0.5, %v1566_v29  ;;  %5180 = vmatprep.mubr.msk.bf16.mxu0 %vm5179_vm11, %v7359_v57 }
 0x303   : > { %6661 = vtanh.f32 %v1655_v44  ;;  %v1657_v32 = vmul.f32 0.5, %v1568_v31  ;;  %5182 = vmatmul.mubr.msk.bf16.gmra.mrb[100].mxu0 %vm5181_vm10, %v7359_v57  ;;  %v5031_v44 = vadd.f32 -1.0, %v1786_v15  ;;  %v5033_v31 = vadd.f32 -1.0, %v1788_v24 }
 0x304   : > { %v6652_v49 = vpop.eup %6651  ;;  %6663 = vtanh.f32 %v1656_v46  ;;  %v1315_v46 = vld [vmem:[%s7887_s10 + $0x1a8] sm:$0xff]  ;;  %v1797_v24 = vmul.f32 2.0, %v1321_v8 }
 0x305   : > { %v6654_v40 = vpop.eup %6653  ;;  %6665 = vtanh.f32 %v1657_v32  ;;  %v1571_v41 = vpop.f32.mrb[48].mxu1  ;;  %vm1906_vm12 = vcmp.gt.f32.partialorder %v6652_v49, %v5023_v33  ;;  %v1314_v32 = vld [vmem:[%s7887_s10 + $0x1a0] sm:$0xff]  ;;  %v1316_v33 = vld [vmem:[%s7887_s10 + $0x1b0] sm:$0xff]  ;;  %v5112_v8 = vld [vmem:[%s7671_s30 + $0x108] sm:$0xff] }
 0x306   : > { %v6656_v42 = vpop.eup %6655  ;;  %v1572_v43 = vadd.f32 %v1571_v41, %v7878_v56  ;;  %v1573_v45 = vpop.f32.mrb[49].mxu1  ;;  %vm1907_vm14 = vcmp.gt.f32.partialorder %v6654_v40, %v5024_v37  ;;  %v1791_v41 = vmul.f32 2.0, %v1315_v46  ;;  %v1324_v46 = vld [vmem:[%s7887_s10 + $0x1f0] sm:$0xff] }
 0x307   : > { %v6658_v51 = vpop.eup %6657  ;;  %v1574_v53 = vadd.f32 %v1573_v45, %v7880_v9  ;;  %v1575_v59 = vpop.f32.mrb[50].mxu1  ;;  %vm1908_vm13 = vcmp.gt.f32.partialorder %v6656_v42, %v5025_v34  ;;  %v1790_v42 = vmul.f32 2.0, %v1314_v32 }
 0x308   : > { %v1658_v62 = vmul.f32 0.5, %v1572_v43  ;;  %v1576_v63 = vadd.f32 %v1575_v59, %v7878_v56  ;;  %v1577_v55 = vpop.f32.mrb[51].mxu1  ;;  %vm1909_vm15 = vcmp.gt.f32.partialorder %v6658_v51, %v5026_v38  ;;  %vm5185_vm0 = vmpackc.low %vm1908_vm13, %vm1906_vm12  ;;  %v1792_v43 = vmul.f32 2.0, %v1316_v33  ;;  %v1323_v33 = vld [vmem:[%s7887_s10 + $0x1e8] sm:$0xff] }
 0x309   : > { %v1659_v2 = vmul.f32 0.5, %v1574_v53  ;;  %v1578_v0 = vadd.f32 %v1577_v55, %v7880_v9  ;;  %vm5183_vm1 = vmpackc.low %vm1909_vm15, %vm1907_vm14  ;;  %v5036_v6 = vadd.f32 -1.0, %v1791_v41 }
 0x30a   : > { %6667 = vtanh.f32 %v1658_v62  ;;  %v1660_v1 = vmul.f32 0.5, %v1576_v63  ;;  %5184 = vmatprep.mubr.msk.bf16.mxu0 %vm5183_vm1, %v7359_v57 }
 0x30b   : > { %6669 = vtanh.f32 %v1659_v2  ;;  %v1661_v3 = vmul.f32 0.5, %v1578_v0  ;;  %5186 = vmatmul.mubr.msk.bf16.gmra.mrb[104].mxu0 %vm5185_vm0, %v7359_v57  ;;  %v5035_v2 = vadd.f32 -1.0, %v1790_v42  ;;  %v5037_v0 = vadd.f32 -1.0, %v1792_v43 }
 0x30c   : > { %v6660_v58 = vpop.eup %6659  ;;  %6671 = vtanh.f32 %v1660_v1  ;;  %v1319_v1 = vld [vmem:[%s7887_s10 + $0x1c8] sm:$0xff] }
 0x30d   : > { %v6662_v60 = vpop.eup %6661  ;;  %6673 = vtanh.f32 %v1661_v3  ;;  %v1581_v12 = vpop.f32.mrb[52].mxu1  ;;  %vm1910_vm2 = vcmp.gt.f32.partialorder %v6660_v58, %v5027_v4  ;;  %v1318_v3 = vld [vmem:[%s7887_s10 + $0x1c0] sm:$0xff]  ;;  %v1320_v4 = vld [vmem:[%s7887_s10 + $0x1d0] sm:$0xff] }
 0x30e   : > { %v6664_v23 = vpop.eup %6663  ;;  %v1582_v13 = vadd.f32 %v1581_v12, %v7878_v56  ;;  %v1583_v14 = vpop.f32.mrb[53].mxu1  ;;  %vm1911_vm4 = vcmp.gt.f32.partialorder %v6662_v60, %v5028_v10  ;;  %v1795_v12 = vmul.f32 2.0, %v1319_v1 }
 0x30f   : > { %v6666_v16 = vpop.eup %6665  ;;  %v1584_v17 = vadd.f32 %v1583_v14, %v7880_v9  ;;  %v1585_v25 = vpop.f32.mrb[54].mxu1  ;;  %vm1912_vm3 = vcmp.gt.f32.partialorder %v6664_v23, %v5029_v5  ;;  %v1794_v23 = vmul.f32 2.0, %v1318_v3 }
 0x310   : > { %v1662_v19 = vmul.f32 0.5, %v1582_v13  ;;  %v1586_v20 = vadd.f32 %v1585_v25, %v7878_v56  ;;  %v1587_v26 = vpop.f32.mrb[55].mxu1  ;;  %vm1913_vm5 = vcmp.gt.f32.partialorder %v6666_v16, %v5030_v11  ;;  %vm5189_vm6 = vmpackc.low %vm1912_vm3, %vm1910_vm2  ;;  %v1796_v13 = vmul.f32 2.0, %v1320_v4 }
 0x311   : > { %v1663_v27 = vmul.f32 0.5, %v1584_v17  ;;  %v1588_v28 = vadd.f32 %v1587_v26, %v7880_v9  ;;  %vm5187_vm7 = vmpackc.low %vm1913_vm5, %vm1911_vm4 }
 0x312   : > { %6675 = vtanh.f32 %v1662_v19  ;;  %v1664_v29 = vmul.f32 0.5, %v1586_v20  ;;  %5188 = vmatprep.mubr.msk.bf16.mxu0 %vm5187_vm7, %v7359_v57 }
 0x313   : > { %6677 = vtanh.f32 %v1663_v27  ;;  %v1665_v30 = vmul.f32 0.5, %v1588_v28  ;;  %5190 = vmatmul.mubr.msk.bf16.gmra.mrb[108].mxu0 %vm5189_vm6, %v7359_v57  ;;  %v5039_v27 = vadd.f32 -1.0, %v1794_v23  ;;  %v5041_v28 = vadd.f32 -1.0, %v1796_v13 }
 0x314   : > { %v6668_v34 = vpop.eup %6667  ;;  %6679 = vtanh.f32 %v1664_v29 }
 0x315   : > { %v6670_v49 = vpop.eup %6669  ;;  %6681 = vtanh.f32 %v1665_v30  ;;  %v1591_v37 = vpop.f32.mrb[56].mxu1  ;;  %vm1914_vm8 = vcmp.gt.f32.partialorder %v6668_v34, %v5031_v44  ;;  %v5040_v30 = vadd.f32 -1.0, %v1795_v12  ;;  %v5042_v44 = vadd.f32 -1.0, %v1797_v24  ;;  %v1325_v34 = vld [vmem:[%s7887_s10 + $0x1f8] sm:$0xff] }
 0x316   : > { %v6672_v38 = vpop.eup %6671  ;;  %v1592_v39 = vadd.f32 %v1591_v37, %v7878_v56  ;;  %v1593_v40 = vpop.f32.mrb[57].mxu1  ;;  %vm1915_vm10 = vcmp.gt.f32.partialorder %v6670_v49, %v5032_v48  ;;  %v1800_v49 = vmul.f32 2.0, %v1324_v46  ;;  %v1799_v37 = vmul.f32 2.0, %v1323_v33  ;;  %v7099_v33 = vld [vmem:[#allocation5] ss:$8 sps:$4 sm:$0xff]  }
 0x317   : > { %v6674_v45 = vpop.eup %6673  ;;  %v1594_v50 = vadd.f32 %v1593_v40, %v7880_v9  ;;  %v1595_v47 = vpop.f32.mrb[58].mxu1  ;;  %vm1916_vm9 = vcmp.gt.f32.partialorder %v6672_v38, %v5033_v31  ;;  %v1322_v31 = vld [vmem:[%s7887_s10 + $0x1e0] sm:$0xff]  ;;  %v1801_v38 = vmul.f32 2.0, %v1325_v34 }
 0x318   : > { %v1666_v51 = vmul.f32 0.5, %v1592_v39  ;;  %v1596_v53 = vadd.f32 %v1595_v47, %v7878_v56  ;;  %v1597_v59 = vpop.f32.mrb[59].mxu1  ;;  %vm1917_vm11 = vcmp.gt.f32.partialorder %v6674_v45, %v5034_v35  ;;  %vm5193_vm12 = vmpackc.low %vm1916_vm9, %vm1914_vm8  ;;  %v1798_v36 = vmul.f32 2.0, %v1322_v31 }
 0x319   : > { %v1667_v54 = vmul.f32 0.5, %v1594_v50  ;;  %v1598_v62 = vadd.f32 %v1597_v59, %v7880_v9  ;;  %vm5191_vm13 = vmpackc.low %vm1917_vm11, %vm1915_vm10  ;;  %v5045_v40 = vadd.f32 -1.0, %v1800_v49  ;;  %v5044_v42 = vadd.f32 -1.0, %v1799_v37 }
 0x31a   : > { %6683 = vtanh.f32 %v1666_v51  ;;  %v1668_v63 = vmul.f32 0.5, %v1596_v53  ;;  %5192 = vmatprep.mubr.msk.bf16.mxu0 %vm5191_vm13, %v7359_v57  ;;  %v5043_v39 = vadd.f32 -1.0, %v1798_v36  ;;  %v5046_v43 = vadd.f32 -1.0, %v1801_v38  ;;  %v7100_v36 = vld [vmem:[#allocation5 + $0x14] ss:$8 sps:$4 sm:$0xff]  }
 0x31b   : > { %6685 = vtanh.f32 %v1667_v54  ;;  %v1669_v55 = vmul.f32 0.5, %v1598_v62  ;;  %5194 = vmatmul.mubr.msk.bf16.gmra.mrb[112].mxu0 %vm5193_vm12, %v7359_v57  ;;  %v8045_v62 = vld [vmem:[#allocation10] ss:$0 sm:$0xff] }
 0x31c   : > { %v6676_v5 = vpop.eup %6675  ;;  %6687 = vtanh.f32 %v1668_v63 }
 0x31d   : > { %v6678_v58 = vpop.eup %6677  ;;  %6689 = vtanh.f32 %v1669_v55  ;;  %v1601_v10 = vpop.f32.mrb[60].mxu1  ;;  %vm1918_vm14 = vcmp.gt.f32.partialorder %v6676_v5, %v5035_v2 }
 0x31e   : > { %v6680_v11 = vpop.eup %6679  ;;  %v1602_v22 = vadd.f32 %v1601_v10, %v7878_v56  ;;  %v1603_v60 = vpop.f32.mrb[61].mxu1  ;;  %vm1919_vm0 = vcmp.gt.f32.partialorder %v6678_v58, %v5036_v6 }
 0x31f   : > { %v6682_v14 = vpop.eup %6681  ;;  %v1604_v21 = vadd.f32 %v1603_v60, %v7880_v9  ;;  %v1605_v15 = vpop.f32.mrb[62].mxu1  ;;  %vm1920_vm15 = vcmp.gt.f32.partialorder %v6680_v11, %v5037_v0  ;;  %v2349_v60 = vmul.f32 2.0, %v5112_v8  ;;  %v5118_v8 = vld [vmem:[%s7671_s30 + $0x138] sm:$0xff] }
 0x320   : > { %v1670_v16 = vmul.f32 0.5, %v1602_v22  ;;  %v1606_v17 = vadd.f32 %v1605_v15, %v7878_v56  ;;  %v1607_v25 = vpop.f32.mrb[63].mxu1  ;;  %vm1921_vm1 = vcmp.gt.f32.partialorder %v6682_v14, %v5038_v7  ;;  %vm5197_vm2 = vmpackc.low %vm1920_vm15, %vm1918_vm14  ;;  %v5111_v7 = vld [vmem:[%s7671_s30 + $0x100] sm:$0xff] }
 0x321   : > { %v1671_v18 = vmul.f32 0.5, %v1604_v21  ;;  %v1608_v19 = vadd.f32 %v1607_v25, %v7880_v9  ;;  %vm5195_vm3 = vmpackc.low %vm1921_vm1, %vm1919_vm0  ;;  %v2348_v22 = vmul.f32 2.0, %v5111_v7  ;;  %v5208_v24 = vadd.f32 -1.0, %v2349_v60  ;;  %v5117_v7 = vld [vmem:[%s7671_s30 + $0x130] sm:$0xff] }
 0x322   : > { %6691 = vtanh.f32 %v1670_v16  ;;  %v1672_v20 = vmul.f32 0.5, %v1606_v17  ;;  %5196 = vmatprep.mubr.msk.bf16.mxu0 %vm5195_vm3, %v7359_v57  ;;  %v7105_v60 = vld [vmem:[#allocation5 + $0x30] ss:$8 sps:$4 sm:$0xff]  }
 0x323   : > { %6693 = vtanh.f32 %v1671_v18  ;;  %v1673_v26 = vmul.f32 0.5, %v1608_v19  ;;  %5198 = vmatmul.mubr.msk.bf16.gmra.mrb[116].mxu0 %vm5197_vm2, %v7359_v57  ;;  %v5207_v15 = vadd.f32 -1.0, %v2348_v22  ;;  %v5113_v18 = vld [vmem:[%s7671_s30 + $0x110] sm:$0xff]  ;;  %v5114_v19 = vld [vmem:[%s7671_s30 + $0x118] sm:$0xff] }
 0x324   : > { %v6684_v29 = vpop.eup %6683  ;;  %6695 = vtanh.f32 %v1672_v20 }
 0x325   : > { %v6686_v32 = vpop.eup %6685  ;;  %6697 = vtanh.f32 %v1673_v26  ;;  %vm1922_vm4 = vcmp.gt.f32.partialorder %v6684_v29, %v5039_v27  ;;  %v2350_v29 = vmul.f32 2.0, %v5113_v18 }
 0x326   : > { %v6688_v48 = vpop.eup %6687  ;;  %vm1923_vm6 = vcmp.gt.f32.partialorder %v6686_v32, %v5040_v30  ;;  %v2351_v30 = vmul.f32 2.0, %v5114_v19  ;;  %v7108_v19 = vld [vmem:[#allocation5 + $0x54] ss:$8 sps:$4 sm:$0xff]  }
 0x327   : > { %v6690_v35 = vpop.eup %6689  ;;  %vm1924_vm5 = vcmp.gt.f32.partialorder %v6688_v48, %v5041_v28  ;;  %v5209_v48 = vadd.f32 -1.0, %v2350_v29  ;;  %v5120_v29 = vld [vmem:[%s7671_s30 + $0x148] sm:$0xff] }
 0x328   : > { %vm1925_vm7 = vcmp.gt.f32.partialorder %v6690_v35, %v5042_v44  ;;  %vm5201_vm8 = vmpackc.low %vm1924_vm5, %vm1922_vm4  ;;  %v5210_v35 = vadd.f32 -1.0, %v2351_v30 }
 0x329   : > { %vm5199_vm9 = vmpackc.low %vm1925_vm7, %vm1923_vm6 }
 0x32a   : > { %5200 = vmatprep.mubr.msk.bf16.mxu0 %vm5199_vm9, %v7359_v57 }
 0x32b   : > { %5202 = vmatmul.mubr.msk.bf16.gmra.mrb[120].mxu0 %vm5201_vm8, %v7359_v57 }
 0x32c   : > { %v6692_v41 = vpop.eup %6691 }
 0x32d   : > { %v6694_v45 = vpop.eup %6693  ;;  %vm1926_vm10 = vcmp.gt.f32.partialorder %v6692_v41, %v5043_v39  ;;  %v5115_v39 = vld [vmem:[%s7671_s30 + $0x120] sm:$0xff] }
 0x32e   : > { %v6696_v50 = vpop.eup %6695  ;;  %vm1927_vm12 = vcmp.gt.f32.partialorder %v6694_v45, %v5044_v42 }
 0x32f   : > { %v6698_v47 = vpop.eup %6697  ;;  %vm1928_vm11 = vcmp.gt.f32.partialorder %v6696_v50, %v5045_v40  ;;  %v5116_v40 = vld [vmem:[%s7671_s30 + $0x128] sm:$0xff] }
 0x330   : > { %vm1929_vm13 = vcmp.gt.f32.partialorder %v6698_v47, %v5046_v43  ;;  %vm5205_vm14 = vmpackc.low %vm1928_vm11, %vm1926_vm10  ;;  %v7101_v50 = vld [vmem:[#allocation5 + $0x10] ss:$8 sps:$4 sm:$0xff]   ;;  %v2352_v47 = vmul.f32 2.0, %v5115_v39 }
 0x331   : > { %vm5203_vm15 = vmpackc.low %vm1929_vm13, %vm1927_vm12 }
 0x332   : > { %5204 = vmatprep.mubr.msk.bf16.mxu0 %vm5203_vm15, %v7359_v57 }
 0x333   : > { %5206 = vmatmul.mubr.msk.bf16.gmra.mrb[124].mxu0 %vm5205_vm14, %v7359_v57 }
 0x38e   : > { %v6084_v52 = vpop.f32.mrb[64].mxu0 }
 0x38f   : > { %v6085_v51 = vpop.f32.mrb[65].mxu0 }
 0x390   : > { %v6086_v53 = vadd.f32 %v6085_v51, %v6084_v52  ;;  %v6087_v59 = vpop.f32.mrb[66].mxu0  ;;  %v2353_v52 = vmul.f32 2.0, %v5116_v40  ;;  %v7102_v51 = vld [vmem:[#allocation5 + $0x24] ss:$8 sps:$4 sm:$0xff]  }
 0x391   : > { %v6088_v54 = vpop.f32.mrb[67].mxu0 }
 0x392   : > { %v2158_v63 = vadd.f32 %v8045_v62, %v6086_v53  ;;  %v6089_v55 = vadd.f32 %v6088_v54, %v6087_v59 }
 0x394   : > { %v2284_v2 = vmul.f32 0.5, %v2158_v63  ;;  %v2161_v0 = vadd.f32 %v8045_v62, %v6089_v55  ;;  %v7103_v55 = vld [vmem:[#allocation5 + $0x20] ss:$8 sps:$4 sm:$0xff]  }
 0x396   : > { %6699 = vtanh.f32 %v2284_v2  ;;  %v2285_v1 = vmul.f32 0.5, %v2161_v0  ;;  %v6090_v3 = vpop.f32.mrb[68].mxu0  ;;  %v5211_v0 = vadd.f32 -1.0, %v2352_v47  ;;  %v5121_v47 = vld [vmem:[%s7671_s30 + $0x150] sm:$0xff] }
 0x397   : > { %v6091_v4 = vpop.f32.mrb[69].mxu0 }
 0x398   : > { %6701 = vtanh.f32 %v2285_v1  ;;  %v6092_v5 = vadd.f32 %v6091_v4, %v6090_v3  ;;  %v6093_v6 = vpop.f32.mrb[70].mxu0  ;;  %v5212_v1 = vadd.f32 -1.0, %v2353_v52  ;;  %v7104_v3 = vld [vmem:[#allocation5 + $0x34] ss:$8 sps:$4 sm:$0xff]  }
 0x399   : > { %v6094_v58 = vpop.f32.mrb[71].mxu0  ;;  %v5122_v52 = vld [vmem:[%s7671_s30 + $0x158] sm:$0xff] }
 0x39a   : > { %v2166_v10 = vadd.f32 %v8045_v62, %v6092_v5  ;;  %v6095_v11 = vadd.f32 %v6094_v58, %v6093_v6 }
 0x39c   : > { %v2286_v12 = vmul.f32 0.5, %v2166_v10  ;;  %v2169_v23 = vadd.f32 %v8045_v62, %v6095_v11 }
 0x39e   : > { %6703 = vtanh.f32 %v2286_v12  ;;  %v2287_v13 = vmul.f32 0.5, %v2169_v23  ;;  %v6096_v14 = vpop.f32.mrb[72].mxu0  ;;  %v2354_v12 = vmul.f32 2.0, %v5117_v7  ;;  %v2355_v23 = vmul.f32 2.0, %v5118_v8 }
 0x39f   : > { %v6097_v21 = vpop.f32.mrb[73].mxu0 }
 0x3a0   : > { %v6700_v16 = vpop.eup %6699  ;;  %6705 = vtanh.f32 %v2287_v13  ;;  %v6098_v17 = vadd.f32 %v6097_v21, %v6096_v14  ;;  %v6099_v25 = vpop.f32.mrb[74].mxu0  ;;  %v7106_v13 = vld [vmem:[#allocation5 + $0x44] ss:$8 sps:$4 sm:$0xff]   ;;  %v5214_v18 = vadd.f32 -1.0, %v2355_v23 }
 0x3a1   : > { %v6100_v20 = vpop.f32.mrb[75].mxu0  ;;  %vm2412_vm0 = vcmp.gt.f32.partialorder %v6700_v16, %v5207_v15  ;;  %v7107_v16 = vld [vmem:[#allocation5 + $0x40] ss:$8 sps:$4 sm:$0xff]  }
 0x3a2   : > { %v6702_v26 = vpop.eup %6701  ;;  %v2174_v27 = vadd.f32 %v8045_v62, %v6098_v17  ;;  %v6101_v28 = vadd.f32 %v6100_v20, %v6099_v25  ;;  %v5213_v25 = vadd.f32 -1.0, %v2354_v12 }
 0x3a3   : > { %vm2413_vm1 = vcmp.gt.f32.partialorder %v6702_v26, %v5208_v24 }
 0x3a4   : > { %v2288_v44 = vmul.f32 0.5, %v2174_v27  ;;  %v2177_v31 = vadd.f32 %v8045_v62, %v6101_v28  ;;  %vm5335_vm2 = vmpackc.low %vm2413_vm1, %vm2412_vm0  ;;  %v5119_v28 = vld [vmem:[%s7671_s30 + $0x140] sm:$0xff] }
 0x3a5   : > { %5336 = vmatmul.mubr.msk.bf16.vlgmr.msra.gmra.mrb[64].mxu1 %vm5335_vm2, %v7359_v57 }
 0x3a6   : > { %6707 = vtanh.f32 %v2288_v44  ;;  %v2289_v46 = vmul.f32 0.5, %v2177_v31  ;;  %v6102_v32 = vpop.f32.mrb[76].mxu0  ;;  %2631 = vmatprep.mubr.bf16.mxu1 %v7358_v61  ;;  %3762 = vmatpush1.bf16.msra.mxu1 %v7099_v33  ;;  %v2356_v33 = vmul.f32 2.0, %v5119_v28  ;;  %v5125_v28 = vld [vmem:[%s7671_s30 + $0x170] sm:$0xff] }
 0x3a7   : > { %v6103_v34 = vpop.f32.mrb[77].mxu0  ;;  %3763 = vmatprep.subr.bf16.mxu1 %v7100_v36 }
 0x3a8   : > { %v6704_v49 = vpop.eup %6703  ;;  %6709 = vtanh.f32 %v2289_v46  ;;  %v6104_v37 = vadd.f32 %v6103_v34, %v6102_v32  ;;  %v6105_v38 = vpop.f32.mrb[78].mxu0  ;;  %v7109_v32 = vld [vmem:[#allocation5 + $0x50] ss:$8 sps:$4 sm:$0xff]   ;;  %v2357_v34 = vmul.f32 2.0, %v5120_v29  ;;  %v5215_v40 = vadd.f32 -1.0, %v2356_v33  ;;  %v5126_v29 = vld [vmem:[%s7671_s30 + $0x178] sm:$0xff] }
 0x3a9   : > { %v6106_v41 = vpop.f32.mrb[79].mxu0  ;;  %vm2414_vm3 = vcmp.gt.f32.partialorder %v6704_v49, %v5209_v48  ;;  %v7110_v48 = vld [vmem:[#allocation5 + $0x64] ss:$8 sps:$4 sm:$0xff]   ;;  %v2363_v33 = vmul.f32 2.0, %v5126_v29 }
 0x3aa   : > { %v6706_v42 = vpop.eup %6705  ;;  %v2182_v43 = vadd.f32 %v8045_v62, %v6104_v37  ;;  %v6107_v45 = vadd.f32 %v6106_v41, %v6105_v38  ;;  %3764 = vmatpush1.bf16.msra.mxu1 %v7101_v50  ;;  %v7111_v38 = vld [vmem:[#allocation5 + $0x60] ss:$8 sps:$4 sm:$0xff]   ;;  %v5216_v41 = vadd.f32 -1.0, %v2357_v34 }
 0x3ab   : > { %vm2415_vm4 = vcmp.gt.f32.partialorder %v6706_v42, %v5210_v35  ;;  %3765 = vmatprep.subr.bf16.mxu1 %v7102_v51  ;;  %v7112_v42 = vld [vmem:[#allocation5 + $0x74] ss:$8 sps:$4 sm:$0xff]  }
 0x3ac   : > { %v2290_v53 = vmul.f32 0.5, %v2182_v43  ;;  %v2185_v59 = vadd.f32 %v8045_v62, %v6107_v45  ;;  %vm5337_vm5 = vmpackc.low %vm2415_vm4, %vm2414_vm3 }
 0x3ad   : > { %5338 = vmatmul.mubr.msk.bf16.gmra.mrb[68].mxu1 %vm5337_vm5, %v7359_v57 }
 0x3ae   : > { %6711 = vtanh.f32 %v2290_v53  ;;  %v2291_v54 = vmul.f32 0.5, %v2185_v59  ;;  %v6108_v63 = vpop.f32.mrb[80].mxu0  ;;  %2641 = vmatprep.mubr.bf16.mxu1 %v7358_v61  ;;  %3766 = vmatpush1.bf16.msra.mxu1 %v7103_v55  ;;  %v2358_v55 = vmul.f32 2.0, %v5121_v47 }
 0x3af   : > { %v6109_v2 = vpop.f32.mrb[81].mxu0  ;;  %3767 = vmatprep.subr.bf16.mxu1 %v7104_v3 }
 0x3b0   : > { %v6708_v4 = vpop.eup %6707  ;;  %6713 = vtanh.f32 %v2291_v54  ;;  %v6110_v5 = vadd.f32 %v6109_v2, %v6108_v63  ;;  %v6111_v6 = vpop.f32.mrb[82].mxu0  ;;  %v7113_v63 = vld [vmem:[#allocation5 + $0x70] ss:$8 sps:$4 sm:$0xff]   ;;  %v2359_v2 = vmul.f32 2.0, %v5122_v52 }
 0x3b1   : > { %v6112_v58 = vpop.f32.mrb[83].mxu0  ;;  %vm2416_vm6 = vcmp.gt.f32.partialorder %v6708_v4, %v5211_v0 }
 0x3b2   : > { %v6710_v10 = vpop.eup %6709  ;;  %v2190_v11 = vadd.f32 %v8045_v62, %v6110_v5  ;;  %v6113_v22 = vadd.f32 %v6112_v58, %v6111_v6  ;;  %3768 = vmatpush1.bf16.msra.mxu1 %v7105_v60  ;;  %v5217_v6 = vadd.f32 -1.0, %v2358_v55  ;;  %v5218_v7 = vadd.f32 -1.0, %v2359_v2 }
 0x3b3   : > { %vm2417_vm7 = vcmp.gt.f32.partialorder %v6710_v10, %v5212_v1  ;;  %3769 = vmatprep.subr.bf16.mxu1 %v7106_v13 }
 0x3b4   : > { %v2292_v14 = vmul.f32 0.5, %v2190_v11  ;;  %v2193_v21 = vadd.f32 %v8045_v62, %v6113_v22  ;;  %vm5339_vm8 = vmpackc.low %vm2417_vm7, %vm2416_vm6  ;;  %v5123_v11 = vld [vmem:[%s7671_s30 + $0x160] sm:$0xff]  ;;  %v5124_v22 = vld [vmem:[%s7671_s30 + $0x168] sm:$0xff] }
 0x3b5   : > { %5340 = vmatmul.mubr.msk.bf16.gmra.mrb[72].mxu1 %vm5339_vm8, %v7359_v57 }
 0x3b6   : > { %6715 = vtanh.f32 %v2292_v14  ;;  %v2293_v15 = vmul.f32 0.5, %v2193_v21  ;;  %v6114_v24 = vpop.f32.mrb[84].mxu0  ;;  %2651 = vmatprep.mubr.bf16.mxu1 %v7358_v61  ;;  %3770 = vmatpush1.bf16.msra.mxu1 %v7107_v16  ;;  %v2360_v14 = vmul.f32 2.0, %v5123_v11  ;;  %v2361_v21 = vmul.f32 2.0, %v5124_v22 }
 0x3b7   : > { %v6115_v17 = vpop.f32.mrb[85].mxu0  ;;  %3771 = vmatprep.subr.bf16.mxu1 %v7108_v19 }
 0x3b8   : > { %v6712_v20 = vpop.eup %6711  ;;  %6717 = vtanh.f32 %v2293_v15  ;;  %v6116_v26 = vadd.f32 %v6115_v17, %v6114_v24  ;;  %v6117_v27 = vpop.f32.mrb[86].mxu0  ;;  %v5220_v19 = vadd.f32 -1.0, %v2361_v21 }
 0x3b9   : > { %v6118_v30 = vpop.f32.mrb[87].mxu0  ;;  %vm2418_vm9 = vcmp.gt.f32.partialorder %v6712_v20, %v5213_v25 }
 0x3ba   : > { %v6714_v44 = vpop.eup %6713  ;;  %v2198_v31 = vadd.f32 %v8045_v62, %v6116_v26  ;;  %v6119_v46 = vadd.f32 %v6118_v30, %v6117_v27  ;;  %3772 = vmatpush1.bf16.msra.mxu1 %v7109_v32  ;;  %v2362_v32 = vmul.f32 2.0, %v5125_v28 }
 0x3bb   : > { %vm2419_vm10 = vcmp.gt.f32.partialorder %v6714_v44, %v5214_v18  ;;  %3773 = vmatprep.subr.bf16.mxu1 %v7110_v48  ;;  %v5219_v18 = vadd.f32 -1.0, %v2360_v14 }
 0x3bc   : > { %v2294_v35 = vmul.f32 0.5, %v2198_v31  ;;  %v2201_v36 = vadd.f32 %v8045_v62, %v6119_v46  ;;  %vm5341_vm11 = vmpackc.low %vm2419_vm10, %vm2418_vm9 }
 0x3bd   : > { %5342 = vmatmul.mubr.msk.bf16.gmra.mrb[76].mxu1 %vm5341_vm11, %v7359_v57 }
 0x3be   : > { %6719 = vtanh.f32 %v2294_v35  ;;  %v2295_v49 = vmul.f32 0.5, %v2201_v36  ;;  %v6120_v37 = vpop.f32.mrb[88].mxu0  ;;  %2661 = vmatprep.mubr.bf16.mxu1 %v7358_v61  ;;  %3774 = vmatpush1.bf16.msra.mxu1 %v7111_v38  ;;  %v5222_v38 = vadd.f32 -1.0, %v2363_v33 }
 0x3bf   : > { %v6121_v39 = vpop.f32.mrb[89].mxu0  ;;  %3775 = vmatprep.subr.bf16.mxu1 %v7112_v42  ;;  %v5127_v42 = vld [vmem:[%s7671_s30 + $0x180] sm:$0xff] }
 0x3c0   : > { %v6716_v43 = vpop.eup %6715  ;;  %6721 = vtanh.f32 %v2295_v49  ;;  %v6122_v45 = vadd.f32 %v6121_v39, %v6120_v37  ;;  %v6123_v50 = vpop.f32.mrb[90].mxu0  ;;  %v5221_v37 = vadd.f32 -1.0, %v2362_v32 }
 0x3c1   : > { %v6124_v51 = vpop.f32.mrb[91].mxu0  ;;  %vm2420_vm12 = vcmp.gt.f32.partialorder %v6716_v43, %v5215_v40  ;;  %v5128_v43 = vld [vmem:[%s7671_s30 + $0x188] sm:$0xff] }
 0x3c2   : > { %v6718_v53 = vpop.eup %6717  ;;  %v2206_v59 = vadd.f32 %v8045_v62, %v6122_v45  ;;  %v6125_v54 = vadd.f32 %v6124_v51, %v6123_v50  ;;  %3776 = vmatpush1.bf16.msra.mxu1 %v7113_v63  ;;  %v2364_v51 = vmul.f32 2.0, %v5127_v42 }
 0x3c3   : > { %vm2421_vm13 = vcmp.gt.f32.partialorder %v6718_v53, %v5216_v41  ;;  %v2365_v53 = vmul.f32 2.0, %v5128_v43 }
 0x3c4   : > { %v2296_v0 = vmul.f32 0.5, %v2206_v59  ;;  %v2209_v1 = vadd.f32 %v8045_v62, %v6125_v54  ;;  %vm5343_vm14 = vmpackc.low %vm2421_vm13, %vm2420_vm12 }
 0x3c5   : > { %5344 = vmatmul.mubr.msk.bf16.gmra.mrb[80].mxu1 %vm5343_vm14, %v7359_v57 }
 0x3c6   : > { %6723 = vtanh.f32 %v2296_v0  ;;  %v2297_v3 = vmul.f32 0.5, %v2209_v1  ;;  %v6126_v4 = vpop.f32.mrb[92].mxu0  ;;  %2671 = vmatprep.mubr.bf16.mxu1 %v7358_v61  ;;  %v5223_v0 = vadd.f32 -1.0, %v2364_v51  ;;  %v5224_v1 = vadd.f32 -1.0, %v2365_v53 }
 0x3c7   : > { %v6127_v5 = vpop.f32.mrb[93].mxu0 }
 0x3c8   : > { %v6720_v8 = vpop.eup %6719  ;;  %6725 = vtanh.f32 %v2297_v3  ;;  %v6128_v58 = vadd.f32 %v6127_v5, %v6126_v4  ;;  %v6129_v10 = vpop.f32.mrb[94].mxu0 }
 0x3c9   : > { %v6130_v60 = vpop.f32.mrb[95].mxu0  ;;  %vm2422_vm15 = vcmp.gt.f32.partialorder %v6720_v8, %v5217_v6  ;;  %v5129_v6 = vld [vmem:[%s7671_s30 + $0x190] sm:$0xff] }
 0x3ca   : > { %v6722_v12 = vpop.eup %6721  ;;  %v2214_v23 = vadd.f32 %v8045_v62, %v6128_v58  ;;  %v6131_v13 = vadd.f32 %v6130_v60, %v6129_v10  ;;  %v2366_v22 = vmul.f32 2.0, %v5129_v6 }
 0x3cb   : > { %vm2423_vm0 = vcmp.gt.f32.partialorder %v6722_v12, %v5218_v7  ;;  %v5130_v7 = vld [vmem:[%s7671_s30 + $0x198] sm:$0xff] }
 0x3cc   : > { %v2298_v15 = vmul.f32 0.5, %v2214_v23  ;;  %v2217_v24 = vadd.f32 %v8045_v62, %v6131_v13  ;;  %vm5345_vm1 = vmpackc.low %vm2423_vm0, %vm2422_vm15  ;;  %v2367_v60 = vmul.f32 2.0, %v5130_v7 }
 0x3cd   : > { %5346 = vmatmul.mubr.msk.bf16.gmra.mrb[84].mxu1 %vm5345_vm1, %v7359_v57 }
 0x3ce   : > { %6727 = vtanh.f32 %v2298_v15  ;;  %v2299_v16 = vmul.f32 0.5, %v2217_v24  ;;  %v6132_v17 = vpop.f32.mrb[96].mxu0  ;;  %2681 = vmatprep.mubr.bf16.mxu1 %v7358_v61  ;;  %v5225_v15 = vadd.f32 -1.0, %v2366_v22  ;;  %v5226_v24 = vadd.f32 -1.0, %v2367_v60 }
 0x3cf   : > { %v6133_v25 = vpop.f32.mrb[97].mxu0 }
 0x3d0   : > { %v6724_v20 = vpop.eup %6723  ;;  %6729 = vtanh.f32 %v2299_v16  ;;  %v6134_v26 = vadd.f32 %v6133_v25, %v6132_v17  ;;  %v6135_v27 = vpop.f32.mrb[98].mxu0 }
 0x3d1   : > { %v6136_v30 = vpop.f32.mrb[99].mxu0  ;;  %vm2424_vm2 = vcmp.gt.f32.partialorder %v6724_v20, %v5219_v18  ;;  %v5131_v18 = vld [vmem:[%s7671_s30 + $0x1a0] sm:$0xff] }
 0x3d2   : > { %v6726_v44 = vpop.eup %6725  ;;  %v2222_v31 = vadd.f32 %v8045_v62, %v6134_v26  ;;  %v6137_v46 = vadd.f32 %v6136_v30, %v6135_v27  ;;  %v2368_v29 = vmul.f32 2.0, %v5131_v18 }
 0x3d3   : > { %vm2425_vm3 = vcmp.gt.f32.partialorder %v6726_v44, %v5220_v19  ;;  %v5132_v19 = vld [vmem:[%s7671_s30 + $0x1a8] sm:$0xff] }
 0x3d4   : > { %v2300_v34 = vmul.f32 0.5, %v2222_v31  ;;  %v2225_v48 = vadd.f32 %v8045_v62, %v6137_v46  ;;  %vm5347_vm4 = vmpackc.low %vm2425_vm3, %vm2424_vm2  ;;  %v2369_v30 = vmul.f32 2.0, %v5132_v19 }
 0x3d5   : > { %5348 = vmatmul.mubr.msk.bf16.gmra.mrb[88].mxu1 %vm5347_vm4, %v7359_v57 }
 0x3d6   : > { %6731 = vtanh.f32 %v2300_v34  ;;  %v2301_v35 = vmul.f32 0.5, %v2225_v48  ;;  %v6138_v36 = vpop.f32.mrb[100].mxu0  ;;  %2691 = vmatprep.mubr.bf16.mxu1 %v7358_v61  ;;  %v5227_v34 = vadd.f32 -1.0, %v2368_v29  ;;  %v5228_v48 = vadd.f32 -1.0, %v2369_v30 }
 0x3d7   : > { %v6139_v49 = vpop.f32.mrb[101].mxu0 }
 0x3d8   : > { %v6728_v39 = vpop.eup %6727  ;;  %6733 = vtanh.f32 %v2301_v35  ;;  %v6140_v40 = vadd.f32 %v6139_v49, %v6138_v36  ;;  %v6141_v41 = vpop.f32.mrb[102].mxu0 }
 0x3d9   : > { %v6142_v45 = vpop.f32.mrb[103].mxu0  ;;  %vm2426_vm5 = vcmp.gt.f32.partialorder %v6728_v39, %v5221_v37  ;;  %v5133_v37 = vld [vmem:[%s7671_s30 + $0x1b0] sm:$0xff] }
 0x3da   : > { %v6730_v50 = vpop.eup %6729  ;;  %v2230_v47 = vadd.f32 %v8045_v62, %v6140_v40  ;;  %v6143_v52 = vadd.f32 %v6142_v45, %v6141_v41  ;;  %v2370_v43 = vmul.f32 2.0, %v5133_v37 }
 0x3db   : > { %vm2427_vm6 = vcmp.gt.f32.partialorder %v6730_v50, %v5222_v38  ;;  %v5134_v38 = vld [vmem:[%s7671_s30 + $0x1b8] sm:$0xff] }
 0x3dc   : > { %v2302_v59 = vmul.f32 0.5, %v2230_v47  ;;  %v2233_v54 = vadd.f32 %v8045_v62, %v6143_v52  ;;  %vm5349_vm7 = vmpackc.low %vm2427_vm6, %vm2426_vm5  ;;  %v2371_v45 = vmul.f32 2.0, %v5134_v38 }
 0x3dd   : > { %5350 = vmatmul.mubr.msk.bf16.gmra.mrb[92].mxu1 %vm5349_vm7, %v7359_v57 }
 0x3de   : > { %6735 = vtanh.f32 %v2302_v59  ;;  %v2303_v63 = vmul.f32 0.5, %v2233_v54  ;;  %v6144_v55 = vpop.f32.mrb[104].mxu0  ;;  %2701 = vmatprep.mubr.bf16.mxu1 %v7358_v61  ;;  %v5229_v59 = vadd.f32 -1.0, %v2370_v43  ;;  %v5230_v54 = vadd.f32 -1.0, %v2371_v45 }
 0x3df   : > { %v6145_v2 = vpop.f32.mrb[105].mxu0 }
 0x3e0   : > { %v6732_v3 = vpop.eup %6731  ;;  %6737 = vtanh.f32 %v2303_v63  ;;  %v6146_v4 = vadd.f32 %v6145_v2, %v6144_v55  ;;  %v6147_v5 = vpop.f32.mrb[106].mxu0 }
 0x3e1   : > { %v6148_v8 = vpop.f32.mrb[107].mxu0  ;;  %vm2428_vm8 = vcmp.gt.f32.partialorder %v6732_v3, %v5223_v0  ;;  %v5135_v0 = vld [vmem:[%s7671_s30 + $0x1c0] sm:$0xff] }
 0x3e2   : > { %v6734_v58 = vpop.eup %6733  ;;  %v2238_v10 = vadd.f32 %v8045_v62, %v6146_v4  ;;  %v6149_v11 = vadd.f32 %v6148_v8, %v6147_v5  ;;  %v2372_v7 = vmul.f32 2.0, %v5135_v0 }
 0x3e3   : > { %vm2429_vm9 = vcmp.gt.f32.partialorder %v6734_v58, %v5224_v1  ;;  %v5136_v1 = vld [vmem:[%s7671_s30 + $0x1c8] sm:$0xff] }
 0x3e4   : > { %v2304_v12 = vmul.f32 0.5, %v2238_v10  ;;  %v2241_v23 = vadd.f32 %v8045_v62, %v6149_v11  ;;  %vm5351_vm10 = vmpackc.low %vm2429_vm9, %vm2428_vm8  ;;  %v2373_v8 = vmul.f32 2.0, %v5136_v1 }
 0x3e5   : > { %5352 = vmatmul.mubr.msk.bf16.gmra.mrb[96].mxu1 %vm5351_vm10, %v7359_v57 }
 0x3e6   : > { %6739 = vtanh.f32 %v2304_v12  ;;  %v2305_v13 = vmul.f32 0.5, %v2241_v23  ;;  %v6150_v14 = vpop.f32.mrb[108].mxu0  ;;  %2711 = vmatprep.mubr.bf16.mxu1 %v7358_v61  ;;  %v5231_v12 = vadd.f32 -1.0, %v2372_v7  ;;  %v5232_v23 = vadd.f32 -1.0, %v2373_v8 }
 0x3e7   : > { %v6151_v21 = vpop.f32.mrb[109].mxu0 }
 0x3e8   : > { %v6736_v16 = vpop.eup %6735  ;;  %6741 = vtanh.f32 %v2305_v13  ;;  %v6152_v17 = vadd.f32 %v6151_v21, %v6150_v14  ;;  %v6153_v25 = vpop.f32.mrb[110].mxu0 }
 0x3e9   : > { %v6154_v20 = vpop.f32.mrb[111].mxu0  ;;  %vm2430_vm11 = vcmp.gt.f32.partialorder %v6736_v16, %v5225_v15  ;;  %v5137_v15 = vld [vmem:[%s7671_s30 + $0x1d0] sm:$0xff] }
 0x3ea   : > { %v6738_v26 = vpop.eup %6737  ;;  %v2246_v27 = vadd.f32 %v8045_v62, %v6152_v17  ;;  %v6155_v28 = vadd.f32 %v6154_v20, %v6153_v25  ;;  %v2374_v19 = vmul.f32 2.0, %v5137_v15 }
 0x3eb   : > { %vm2431_vm12 = vcmp.gt.f32.partialorder %v6738_v26, %v5226_v24  ;;  %v5138_v24 = vld [vmem:[%s7671_s30 + $0x1d8] sm:$0xff] }
 0x3ec   : > { %v2306_v44 = vmul.f32 0.5, %v2246_v27  ;;  %v2249_v31 = vadd.f32 %v8045_v62, %v6155_v28  ;;  %vm5353_vm13 = vmpackc.low %vm2431_vm12, %vm2430_vm11  ;;  %v2375_v20 = vmul.f32 2.0, %v5138_v24 }
 0x3ed   : > { %5354 = vmatmul.mubr.msk.bf16.gmra.mrb[100].mxu1 %vm5353_vm13, %v7359_v57 }
 0x3ee   : > { %6743 = vtanh.f32 %v2306_v44  ;;  %v2307_v46 = vmul.f32 0.5, %v2249_v31  ;;  %v6156_v32 = vpop.f32.mrb[112].mxu0  ;;  %2721 = vmatprep.mubr.bf16.mxu1 %v7358_v61  ;;  %v5233_v44 = vadd.f32 -1.0, %v2374_v19  ;;  %v5234_v31 = vadd.f32 -1.0, %v2375_v20 }
 0x3ef   : > { %v6157_v33 = vpop.f32.mrb[113].mxu0 }
 0x3f0   : > { %v6740_v35 = vpop.eup %6739  ;;  %6745 = vtanh.f32 %v2307_v46  ;;  %v6158_v36 = vadd.f32 %v6157_v33, %v6156_v32  ;;  %v6159_v49 = vpop.f32.mrb[114].mxu0 }
 0x3f1   : > { %v6160_v39 = vpop.f32.mrb[115].mxu0  ;;  %vm2432_vm14 = vcmp.gt.f32.partialorder %v6740_v35, %v5227_v34  ;;  %v5139_v34 = vld [vmem:[%s7671_s30 + $0x1e0] sm:$0xff] }
 0x3f2   : > { %v6742_v40 = vpop.eup %6741  ;;  %v2254_v41 = vadd.f32 %v8045_v62, %v6158_v36  ;;  %v6161_v42 = vadd.f32 %v6160_v39, %v6159_v49  ;;  %v2376_v38 = vmul.f32 2.0, %v5139_v34 }
 0x3f3   : > { %vm2433_vm15 = vcmp.gt.f32.partialorder %v6742_v40, %v5228_v48  ;;  %v5140_v48 = vld [vmem:[%s7671_s30 + $0x1e8] sm:$0xff] }
 0x3f4   : > { %v2308_v50 = vmul.f32 0.5, %v2254_v41  ;;  %v2257_v47 = vadd.f32 %v8045_v62, %v6161_v42  ;;  %vm5355_vm0 = vmpackc.low %vm2433_vm15, %vm2432_vm14  ;;  %v2377_v39 = vmul.f32 2.0, %v5140_v48  ;;  %v5235_v43 = vadd.f32 -1.0, %v2376_v38 }
 0x3f5   : > { %5356 = vmatmul.mubr.msk.bf16.gmra.mrb[104].mxu1 %vm5355_vm0, %v7359_v57 }
 0x3f6   : > { %6747 = vtanh.f32 %v2308_v50  ;;  %v2309_v52 = vmul.f32 0.5, %v2257_v47  ;;  %v6162_v51 = vpop.f32.mrb[116].mxu0  ;;  %2731 = vmatprep.mubr.bf16.mxu1 %v7358_v61  ;;  %v5236_v45 = vadd.f32 -1.0, %v2377_v39  ;;  %v5141_v47 = vld [vmem:[%s7671_s30 + $0x1f0] sm:$0xff] }
 0x3f7   : > { %v6163_v53 = vpop.f32.mrb[117].mxu0 }
 0x3f8   : > { %v6744_v63 = vpop.eup %6743  ;;  %6749 = vtanh.f32 %v2309_v52  ;;  %v6164_v55 = vadd.f32 %v6163_v53, %v6162_v51  ;;  %v6165_v2 = vpop.f32.mrb[118].mxu0  ;;  %v5142_v52 = vld [vmem:[%s7671_s30 + $0x1f8] sm:$0xff]  ;;  %v2378_v53 = vmul.f32 2.0, %v5141_v47 }
 0x3f9   : > { %v6166_v3 = vpop.f32.mrb[119].mxu0  ;;  %vm2434_vm1 = vcmp.gt.f32.partialorder %v6744_v63, %v5229_v59  ;;  %v2379_v59 = vmul.f32 2.0, %v5142_v52 }
 0x3fa   : > { %v6746_v4 = vpop.eup %6745  ;;  %v2262_v5 = vadd.f32 %v8045_v62, %v6164_v55  ;;  %v6167_v6 = vadd.f32 %v6166_v3, %v6165_v2 }
 0x3fb   : > { %vm2435_vm2 = vcmp.gt.f32.partialorder %v6746_v4, %v5230_v54  ;;  %v5238_v54 = vadd.f32 -1.0, %v2379_v59 }
 0x3fc   : > { %v2310_v58 = vmul.f32 0.5, %v2262_v5  ;;  %v2265_v10 = vadd.f32 %v8045_v62, %v6167_v6  ;;  %vm5357_vm3 = vmpackc.low %vm2435_vm2, %vm2434_vm1 }
 0x3fd   : > { %5358 = vmatmul.mubr.msk.bf16.gmra.mrb[108].mxu1 %vm5357_vm3, %v7359_v57 }
 0x3fe   : > { %6751 = vtanh.f32 %v2310_v58  ;;  %v2311_v11 = vmul.f32 0.5, %v2265_v10  ;;  %v6168_v22 = vpop.f32.mrb[120].mxu0  ;;  %2741 = vmatprep.mubr.bf16.mxu1 %v7358_v61 }
 0x3ff   : > { %v6169_v60 = vpop.f32.mrb[121].mxu0 }
 0x400   : > { %v6748_v13 = vpop.eup %6747  ;;  %6753 = vtanh.f32 %v2311_v11  ;;  %v6170_v14 = vadd.f32 %v6169_v60, %v6168_v22  ;;  %v6171_v21 = vpop.f32.mrb[122].mxu0  ;;  %v5271_v22 = vld [vmem:[%s7887_s10 + $0x200] sm:$0xff]  ;;  %v5273_v60 = vld [vmem:[%s7887_s10 + $0x210] sm:$0xff] }
 0x401   : > { %v6172_v16 = vpop.f32.mrb[123].mxu0  ;;  %vm2436_vm4 = vcmp.gt.f32.partialorder %v6748_v13, %v5231_v12  ;;  %v5274_v13 = vld [vmem:[%s7887_s10 + $0x218] sm:$0xff] }
 0x402   : > { %v6750_v17 = vpop.eup %6749  ;;  %v2270_v25 = vadd.f32 %v8045_v62, %v6170_v14  ;;  %v6173_v18 = vadd.f32 %v6172_v16, %v6171_v21  ;;  %v2910_v16 = vmul.f32 2.0, %v5271_v22 }
 0x403   : > { %vm2437_vm5 = vcmp.gt.f32.partialorder %v6750_v17, %v5232_v23  ;;  %v5272_v23 = vld [vmem:[%s7887_s10 + $0x208] sm:$0xff]  ;;  %v2912_v17 = vmul.f32 2.0, %v5273_v60 }
 0x404   : > { %v2312_v26 = vmul.f32 0.5, %v2270_v25  ;;  %v2273_v27 = vadd.f32 %v8045_v62, %v6173_v18  ;;  %vm5359_vm6 = vmpackc.low %vm2437_vm5, %vm2436_vm4  ;;  %v2911_v20 = vmul.f32 2.0, %v5272_v23 }
 0x405   : > { %5360 = vmatmul.mubr.msk.bf16.gmra.mrb[112].mxu1 %vm5359_vm6, %v7359_v57 }
 0x406   : > { %6755 = vtanh.f32 %v2312_v26  ;;  %v2313_v28 = vmul.f32 0.5, %v2273_v27  ;;  %v6174_v29 = vpop.f32.mrb[124].mxu0  ;;  %2751 = vmatprep.mubr.bf16.mxu1 %v7358_v61  ;;  %v2913_v26 = vmul.f32 2.0, %v5274_v13  ;;  %v5368_v48 = vadd.f32 -1.0, %v2911_v20 }
 0x407   : > { %v6175_v30 = vpop.f32.mrb[125].mxu0 }
 0x408   : > { %v6752_v46 = vpop.eup %6751  ;;  %6757 = vtanh.f32 %v2313_v28  ;;  %v6176_v32 = vadd.f32 %v6175_v30, %v6174_v29  ;;  %v6177_v33 = vpop.f32.mrb[126].mxu0 }
 0x409   : > { %v6178_v35 = vpop.f32.mrb[127].mxu0  ;;  %vm2438_vm7 = vcmp.gt.f32.partialorder %v6752_v46, %v5233_v44  ;;  %v5367_v44 = vadd.f32 -1.0, %v2910_v16  ;;  %v5276_v46 = vld [vmem:[%s7887_s10 + $0x228] sm:$0xff] }
 0x40a   : > { %v6754_v36 = vpop.eup %6753  ;;  %v2278_v49 = vadd.f32 %v8045_v62, %v6176_v32  ;;  %v6179_v37 = vadd.f32 %v6178_v35, %v6177_v33  ;;  %v5275_v32 = vld [vmem:[%s7887_s10 + $0x220] sm:$0xff]  ;;  %v5277_v33 = vld [vmem:[%s7887_s10 + $0x230] sm:$0xff]  ;;  %v5370_v35 = vadd.f32 -1.0, %v2913_v26 }
 0x40b   : > { %vm2439_vm8 = vcmp.gt.f32.partialorder %v6754_v36, %v5234_v31  ;;  %v5369_v31 = vadd.f32 -1.0, %v2912_v17  ;;  %v5278_v36 = vld [vmem:[%s7887_s10 + $0x238] sm:$0xff] }
 0x40c   : > { %v2314_v40 = vmul.f32 0.5, %v2278_v49  ;;  %v2281_v41 = vadd.f32 %v8045_v62, %v6179_v37  ;;  %vm5361_vm9 = vmpackc.low %vm2439_vm8, %vm2438_vm7  ;;  %v5237_v62 = vadd.f32 -1.0, %v2378_v53  ;;  %v2917_v52 = vmul.f32 2.0, %v5278_v36 }
 0x40d   : > { %5362 = vmatmul.mubr.msk.bf16.gmra.mrb[116].mxu1 %vm5361_vm9, %v7359_v57 }
 0x40e   : > { %6759 = vtanh.f32 %v2314_v40  ;;  %v2315_v42 = vmul.f32 0.5, %v2281_v41  ;;  %2761 = vmatprep.mubr.bf16.mxu1 %v7358_v61  ;;  %v2915_v41 = vmul.f32 2.0, %v5276_v46 }
 0x410   : > { %v6756_v50 = vpop.eup %6755  ;;  %6761 = vtanh.f32 %v2315_v42  ;;  %v2914_v42 = vmul.f32 2.0, %v5275_v32 }
 0x411   : > { %vm2440_vm10 = vcmp.gt.f32.partialorder %v6756_v50, %v5235_v43  ;;  %v2916_v43 = vmul.f32 2.0, %v5277_v33  ;;  %v5286_v33 = vld [vmem:[%s7887_s10 + $0x278] sm:$0xff] }
 0x412   : > { %v6758_v51 = vpop.eup %6757 }
 0x413   : > { %vm2441_vm11 = vcmp.gt.f32.partialorder %v6758_v51, %v5236_v45 }
 0x414   : > { %vm5363_vm12 = vmpackc.low %vm2441_vm11, %vm2440_vm10 }
 0x415   : > { %5364 = vmatmul.mubr.msk.bf16.gmra.mrb[120].mxu1 %vm5363_vm12, %v7359_v57 }
 0x416   : > { %2771 = vmatprep.mubr.bf16.mxu1 %v7358_v61 }
 0x418   : > { %v6760_v63 = vpop.eup %6759 }
 0x419   : > { %vm2442_vm13 = vcmp.gt.f32.partialorder %v6760_v63, %v5237_v62 }
 0x41a   : > { %v6762_v55 = vpop.eup %6761 }
 0x41b   : > { %vm2443_vm14 = vcmp.gt.f32.partialorder %v6762_v55, %v5238_v54 }
 0x41c   : > { %vm5365_vm15 = vmpackc.low %vm2443_vm14, %vm2442_vm13 }
 0x41d   : > { %5366 = vmatmul.mubr.msk.bf16.gmra.mrb[124].mxu1 %vm5365_vm15, %v7359_v57 }
 0x41e   : > { %3793 = vmatprep.mubr.bf16.mxu1 %v7358_v61 }
 0x478   : > { %v2623_v2 = vpop.f32.mrb[64].mxu1 }
 0x479   : > { %v2624_v0 = vadd.f32 %v2623_v2, %v7878_v56  ;;  %v2625_v1 = vpop.f32.mrb[65].mxu1  ;;  %v5371_v2 = vadd.f32 -1.0, %v2914_v42 }
 0x47a   : > { %v2626_v3 = vadd.f32 %v2625_v1, %v7880_v9  ;;  %v2627_v4 = vpop.f32.mrb[66].mxu1  ;;  %v5280_v1 = vld [vmem:[%s7887_s10 + $0x248] sm:$0xff] }
 0x47b   : > { %v2782_v5 = vmul.f32 0.5, %v2624_v0  ;;  %v2628_v6 = vadd.f32 %v2627_v4, %v7878_v56  ;;  %v2629_v7 = vpop.f32.mrb[67].mxu1  ;;  %v5373_v0 = vadd.f32 -1.0, %v2916_v43  ;;  %v5281_v4 = vld [vmem:[%s7887_s10 + $0x250] sm:$0xff]  ;;  %v2925_v43 = vmul.f32 2.0, %v5286_v33 }
 0x47c   : > { %v2783_v8 = vmul.f32 0.5, %v2626_v3  ;;  %v2630_v58 = vadd.f32 %v2629_v7, %v7880_v9  ;;  %v5279_v3 = vld [vmem:[%s7887_s10 + $0x240] sm:$0xff]  ;;  %v5374_v7 = vadd.f32 -1.0, %v2917_v52  ;;  %v2920_v13 = vmul.f32 2.0, %v5281_v4  ;;  %v5290_v4 = vld [vmem:[%s7887_s10 + $0x298] sm:$0xff] }
 0x47d   : > { %6763 = vtanh.f32 %v2782_v5  ;;  %v2784_v10 = vmul.f32 0.5, %v2628_v6  ;;  %v5372_v6 = vadd.f32 -1.0, %v2915_v41  ;;  %v2918_v23 = vmul.f32 2.0, %v5279_v3 }
 0x47e   : > { %6765 = vtanh.f32 %v2783_v8  ;;  %v2785_v11 = vmul.f32 0.5, %v2630_v58  ;;  %v5282_v8 = vld [vmem:[%s7887_s10 + $0x258] sm:$0xff]  ;;  %v5382_v3 = vadd.f32 -1.0, %v2925_v43 }
 0x47f   : > { %6767 = vtanh.f32 %v2784_v10 }
 0x480   : > { %6769 = vtanh.f32 %v2785_v11  ;;  %v2633_v12 = vpop.f32.mrb[68].mxu1 }
 0x481   : > { %v2634_v14 = vadd.f32 %v2633_v12, %v7878_v56  ;;  %v2635_v21 = vpop.f32.mrb[69].mxu1  ;;  %v2919_v12 = vmul.f32 2.0, %v5280_v1 }
 0x482   : > { %v2636_v15 = vadd.f32 %v2635_v21, %v7880_v9  ;;  %v2637_v24 = vpop.f32.mrb[70].mxu1 }
 0x483   : > { %v2786_v25 = vmul.f32 0.5, %v2634_v14  ;;  %v2638_v18 = vadd.f32 %v2637_v24, %v7878_v56  ;;  %v2639_v19 = vpop.f32.mrb[71].mxu1  ;;  %v2921_v24 = vmul.f32 2.0, %v5282_v8  ;;  %v5376_v46 = vadd.f32 -1.0, %v2919_v12 }
 0x484   : > { %v2787_v27 = vmul.f32 0.5, %v2636_v15  ;;  %v2640_v28 = vadd.f32 %v2639_v19, %v7880_v9 }
 0x485   : > { %6771 = vtanh.f32 %v2786_v25  ;;  %v2788_v29 = vmul.f32 0.5, %v2638_v18  ;;  %v5378_v32 = vadd.f32 -1.0, %v2921_v24 }
 0x486   : > { %6773 = vtanh.f32 %v2787_v27  ;;  %v2789_v30 = vmul.f32 0.5, %v2640_v28  ;;  %v5375_v27 = vadd.f32 -1.0, %v2918_v23  ;;  %v5377_v28 = vadd.f32 -1.0, %v2920_v13 }
 0x487   : > { %v6764_v34 = vpop.eup %6763  ;;  %6775 = vtanh.f32 %v2788_v29  ;;  %v5284_v29 = vld [vmem:[%s7887_s10 + $0x268] sm:$0xff]  ;;  %v2929_v13 = vmul.f32 2.0, %v5290_v4 }
 0x488   : > { %v6766_v49 = vpop.eup %6765  ;;  %6777 = vtanh.f32 %v2789_v30  ;;  %v2643_v37 = vpop.f32.mrb[72].mxu1  ;;  %vm3038_vm0 = vcmp.gt.f32.partialorder %v6764_v34, %v5367_v44  ;;  %v5283_v30 = vld [vmem:[%s7887_s10 + $0x260] sm:$0xff]  ;;  %v5285_v44 = vld [vmem:[%s7887_s10 + $0x270] sm:$0xff] }
 0x489   : > { %v6768_v38 = vpop.eup %6767  ;;  %v2644_v39 = vadd.f32 %v2643_v37, %v7878_v56  ;;  %v2645_v40 = vpop.f32.mrb[73].mxu1  ;;  %vm3039_vm2 = vcmp.gt.f32.partialorder %v6766_v49, %v5368_v48  ;;  %v2923_v37 = vmul.f32 2.0, %v5284_v29 }
 0x48a   : > { %v6770_v45 = vpop.eup %6769  ;;  %v2646_v50 = vadd.f32 %v2645_v40, %v7880_v9  ;;  %v2647_v47 = vpop.f32.mrb[74].mxu1  ;;  %vm3040_vm1 = vcmp.gt.f32.partialorder %v6768_v38, %v5369_v31  ;;  %v2922_v38 = vmul.f32 2.0, %v5283_v30  ;;  %v5386_v30 = vadd.f32 -1.0, %v2929_v13 }
 0x48b   : > { %v2790_v51 = vmul.f32 0.5, %v2644_v39  ;;  %v2648_v53 = vadd.f32 %v2647_v47, %v7878_v56  ;;  %v2649_v59 = vpop.f32.mrb[75].mxu1  ;;  %vm3041_vm3 = vcmp.gt.f32.partialorder %v6770_v45, %v5370_v35  ;;  %vm5529_vm4 = vmpackc.low %vm3040_vm1, %vm3038_vm0  ;;  %v2924_v39 = vmul.f32 2.0, %v5285_v44  ;;  %v5294_v44 = vld [vmem:[%s7887_s10 + $0x2b8] sm:$0xff] }
 0x48c   : > { %v2791_v62 = vmul.f32 0.5, %v2646_v50  ;;  %v2650_v54 = vadd.f32 %v2649_v59, %v7880_v9  ;;  %vm5527_vm5 = vmpackc.low %vm3041_vm3, %vm3039_vm2  ;;  %v5380_v1 = vadd.f32 -1.0, %v2923_v37 }
 0x48d   : > { %6779 = vtanh.f32 %v2790_v51  ;;  %v2792_v63 = vmul.f32 0.5, %v2648_v53  ;;  %5528 = vmatprep.mubr.msk.bf16.mxu0 %vm5527_vm5, %v7359_v57 }
 0x48e   : > { %6781 = vtanh.f32 %v2791_v62  ;;  %v2793_v55 = vmul.f32 0.5, %v2650_v54  ;;  %5530 = vmatmul.mubr.msk.bf16.vlgmr.msra.gmra.mrb[128].mxu0 %vm5529_vm4, %v7359_v57  ;;  %v5379_v62 = vadd.f32 -1.0, %v2922_v38  ;;  %v5381_v54 = vadd.f32 -1.0, %v2924_v39 }
 0x48f   : > { %v6772_v5 = vpop.eup %6771  ;;  %6783 = vtanh.f32 %v2792_v63  ;;  %v5288_v63 = vld [vmem:[%s7887_s10 + $0x288] sm:$0xff]  ;;  %v2933_v39 = vmul.f32 2.0, %v5294_v44 }
 0x490   : > { %v6774_v58 = vpop.eup %6773  ;;  %6785 = vtanh.f32 %v2793_v55  ;;  %v2653_v10 = vpop.f32.mrb[76].mxu1  ;;  %vm3042_vm6 = vcmp.gt.f32.partialorder %v6772_v5, %v5371_v2  ;;  %v5287_v55 = vld [vmem:[%s7887_s10 + $0x280] sm:$0xff]  ;;  %v5289_v2 = vld [vmem:[%s7887_s10 + $0x290] sm:$0xff] }
 0x491   : > { %v6776_v11 = vpop.eup %6775  ;;  %v2654_v22 = vadd.f32 %v2653_v10, %v7878_v56  ;;  %v2655_v60 = vpop.f32.mrb[77].mxu1  ;;  %vm3043_vm8 = vcmp.gt.f32.partialorder %v6774_v58, %v5372_v6  ;;  %v2927_v10 = vmul.f32 2.0, %v5288_v63 }
 0x492   : > { %v6778_v14 = vpop.eup %6777  ;;  %v2656_v21 = vadd.f32 %v2655_v60, %v7880_v9  ;;  %v2657_v15 = vpop.f32.mrb[78].mxu1  ;;  %vm3044_vm7 = vcmp.gt.f32.partialorder %v6776_v11, %v5373_v0  ;;  %v2926_v11 = vmul.f32 2.0, %v5287_v55  ;;  %v5390_v55 = vadd.f32 -1.0, %v2933_v39 }
 0x493   : > { %v2794_v16 = vmul.f32 0.5, %v2654_v22  ;;  %v2658_v17 = vadd.f32 %v2657_v15, %v7878_v56  ;;  %v2659_v25 = vpop.f32.mrb[79].mxu1  ;;  %vm3045_vm9 = vcmp.gt.f32.partialorder %v6778_v14, %v5374_v7  ;;  %vm5533_vm10 = vmpackc.low %vm3044_vm7, %vm3042_vm6  ;;  %v2928_v22 = vmul.f32 2.0, %v5289_v2  ;;  %v5298_v2 = vld [vmem:[%s7887_s10 + $0x2d8] sm:$0xff] }
 0x494   : > { %v2795_v18 = vmul.f32 0.5, %v2656_v21  ;;  %v2660_v19 = vadd.f32 %v2659_v25, %v7880_v9  ;;  %vm5531_vm11 = vmpackc.low %vm3045_vm9, %vm3043_vm8  ;;  %v5384_v29 = vadd.f32 -1.0, %v2927_v10 }
 0x495   : > { %6787 = vtanh.f32 %v2794_v16  ;;  %v2796_v20 = vmul.f32 0.5, %v2658_v17  ;;  %5532 = vmatprep.mubr.msk.bf16.mxu0 %vm5531_vm11, %v7359_v57 }
 0x496   : > { %6789 = vtanh.f32 %v2795_v18  ;;  %v2797_v26 = vmul.f32 0.5, %v2660_v19  ;;  %5534 = vmatmul.mubr.msk.bf16.gmra.mrb[132].mxu0 %vm5533_vm10, %v7359_v57  ;;  %v5383_v18 = vadd.f32 -1.0, %v2926_v11  ;;  %v5385_v19 = vadd.f32 -1.0, %v2928_v22 }
 0x497   : > { %v6780_v31 = vpop.eup %6779  ;;  %6791 = vtanh.f32 %v2796_v20  ;;  %v5292_v20 = vld [vmem:[%s7887_s10 + $0x2a8] sm:$0xff]  ;;  %v2937_v22 = vmul.f32 2.0, %v5298_v2 }
 0x498   : > { %v6782_v34 = vpop.eup %6781  ;;  %6793 = vtanh.f32 %v2797_v26  ;;  %v2663_v48 = vpop.f32.mrb[80].mxu1  ;;  %vm3046_vm12 = vcmp.gt.f32.partialorder %v6780_v31, %v5375_v27  ;;  %v5291_v26 = vld [vmem:[%s7887_s10 + $0x2a0] sm:$0xff]  ;;  %v5293_v27 = vld [vmem:[%s7887_s10 + $0x2b0] sm:$0xff] }
 0x499   : > { %v6784_v35 = vpop.eup %6783  ;;  %v2664_v36 = vadd.f32 %v2663_v48, %v7878_v56  ;;  %v2665_v49 = vpop.f32.mrb[81].mxu1  ;;  %vm3047_vm14 = vcmp.gt.f32.partialorder %v6782_v34, %v5376_v46  ;;  %v2931_v48 = vmul.f32 2.0, %v5292_v20 }
 0x49a   : > { %v6786_v40 = vpop.eup %6785  ;;  %v2666_v41 = vadd.f32 %v2665_v49, %v7880_v9  ;;  %v2667_v42 = vpop.f32.mrb[82].mxu1  ;;  %vm3048_vm13 = vcmp.gt.f32.partialorder %v6784_v35, %v5377_v28  ;;  %v2930_v35 = vmul.f32 2.0, %v5291_v26  ;;  %v5394_v26 = vadd.f32 -1.0, %v2937_v22 }
 0x49b   : > { %v2798_v45 = vmul.f32 0.5, %v2664_v36  ;;  %v2668_v50 = vadd.f32 %v2667_v42, %v7878_v56  ;;  %v2669_v47 = vpop.f32.mrb[83].mxu1  ;;  %vm3049_vm15 = vcmp.gt.f32.partialorder %v6786_v40, %v5378_v32  ;;  %vm5537_vm0 = vmpackc.low %vm3048_vm13, %vm3046_vm12  ;;  %v2932_v36 = vmul.f32 2.0, %v5293_v27  ;;  %v5302_v27 = vld [vmem:[%s7887_s10 + $0x2f8] sm:$0xff] }
 0x49c   : > { %v2799_v52 = vmul.f32 0.5, %v2666_v41  ;;  %v2670_v51 = vadd.f32 %v2669_v47, %v7880_v9  ;;  %vm5535_vm1 = vmpackc.low %vm3049_vm15, %vm3047_vm14  ;;  %v5388_v63 = vadd.f32 -1.0, %v2931_v48 }
 0x49d   : > { %6795 = vtanh.f32 %v2798_v45  ;;  %v2800_v53 = vmul.f32 0.5, %v2668_v50  ;;  %5536 = vmatprep.mubr.msk.bf16.mxu0 %vm5535_vm1, %v7359_v57 }
 0x49e   : > { %6797 = vtanh.f32 %v2799_v52  ;;  %v2801_v59 = vmul.f32 0.5, %v2670_v51  ;;  %5538 = vmatmul.mubr.msk.bf16.gmra.mrb[136].mxu0 %vm5537_vm0, %v7359_v57  ;;  %v5387_v52 = vadd.f32 -1.0, %v2930_v35  ;;  %v5389_v51 = vadd.f32 -1.0, %v2932_v36 }
 0x49f   : > { %v6788_v0 = vpop.eup %6787  ;;  %6799 = vtanh.f32 %v2800_v53  ;;  %v5296_v53 = vld [vmem:[%s7887_s10 + $0x2c8] sm:$0xff]  ;;  %v2941_v36 = vmul.f32 2.0, %v5302_v27 }
 0x4a0   : > { %v6790_v5 = vpop.eup %6789  ;;  %6801 = vtanh.f32 %v2801_v59  ;;  %v2673_v6 = vpop.f32.mrb[84].mxu1  ;;  %vm3050_vm2 = vcmp.gt.f32.partialorder %v6788_v0, %v5379_v62  ;;  %v5295_v59 = vld [vmem:[%s7887_s10 + $0x2c0] sm:$0xff]  ;;  %v5297_v62 = vld [vmem:[%s7887_s10 + $0x2d0] sm:$0xff] }
 0x4a1   : > { %v6792_v7 = vpop.eup %6791  ;;  %v2674_v8 = vadd.f32 %v2673_v6, %v7878_v56  ;;  %v2675_v58 = vpop.f32.mrb[85].mxu1  ;;  %vm3051_vm4 = vcmp.gt.f32.partialorder %v6790_v5, %v5380_v1  ;;  %v2935_v6 = vmul.f32 2.0, %v5296_v53 }
 0x4a2   : > { %v6794_v60 = vpop.eup %6793  ;;  %v2676_v12 = vadd.f32 %v2675_v58, %v7880_v9  ;;  %v2677_v23 = vpop.f32.mrb[86].mxu1  ;;  %vm3052_vm3 = vcmp.gt.f32.partialorder %v6792_v7, %v5381_v54  ;;  %v2934_v7 = vmul.f32 2.0, %v5295_v59  ;;  %v5398_v59 = vadd.f32 -1.0, %v2941_v36 }
 0x4a3   : > { %v2802_v14 = vmul.f32 0.5, %v2674_v8  ;;  %v2678_v21 = vadd.f32 %v2677_v23, %v7878_v56  ;;  %v2679_v15 = vpop.f32.mrb[87].mxu1  ;;  %vm3053_vm5 = vcmp.gt.f32.partialorder %v6794_v60, %v5382_v3  ;;  %vm5541_vm6 = vmpackc.low %vm3052_vm3, %vm3050_vm2  ;;  %v2936_v8 = vmul.f32 2.0, %v5297_v62  ;;  %v5306_v62 = vld [vmem:[%s7887_s10 + $0x318] sm:$0xff] }
 0x4a4   : > { %v2803_v24 = vmul.f32 0.5, %v2676_v12  ;;  %v2680_v16 = vadd.f32 %v2679_v15, %v7880_v9  ;;  %vm5539_vm7 = vmpackc.low %vm3053_vm5, %vm3051_vm4  ;;  %v5392_v20 = vadd.f32 -1.0, %v2935_v6 }
 0x4a5   : > { %6803 = vtanh.f32 %v2802_v14  ;;  %v2804_v17 = vmul.f32 0.5, %v2678_v21  ;;  %5540 = vmatprep.mubr.msk.bf16.mxu0 %vm5539_vm7, %v7359_v57 }
 0x4a6   : > { %6805 = vtanh.f32 %v2803_v24  ;;  %v2805_v25 = vmul.f32 0.5, %v2680_v16  ;;  %5542 = vmatmul.mubr.msk.bf16.gmra.mrb[140].mxu0 %vm5541_vm6, %v7359_v57  ;;  %v5391_v24 = vadd.f32 -1.0, %v2934_v7  ;;  %v5393_v16 = vadd.f32 -1.0, %v2936_v8 }
 0x4a7   : > { %v6796_v28 = vpop.eup %6795  ;;  %6807 = vtanh.f32 %v2804_v17  ;;  %v5300_v17 = vld [vmem:[%s7887_s10 + $0x2e8] sm:$0xff]  ;;  %v2945_v8 = vmul.f32 2.0, %v5306_v62 }
 0x4a8   : > { %v6798_v31 = vpop.eup %6797  ;;  %6809 = vtanh.f32 %v2805_v25  ;;  %v2683_v46 = vpop.f32.mrb[88].mxu1  ;;  %vm3054_vm8 = vcmp.gt.f32.partialorder %v6796_v28, %v5383_v18  ;;  %v5299_v25 = vld [vmem:[%s7887_s10 + $0x2e0] sm:$0xff]  ;;  %v5301_v18 = vld [vmem:[%s7887_s10 + $0x2f0] sm:$0xff] }
 0x4a9   : > { %v6800_v32 = vpop.eup %6799  ;;  %v2684_v33 = vadd.f32 %v2683_v46, %v7878_v56  ;;  %v2685_v34 = vpop.f32.mrb[89].mxu1  ;;  %vm3055_vm10 = vcmp.gt.f32.partialorder %v6798_v31, %v5384_v29  ;;  %v2939_v46 = vmul.f32 2.0, %v5300_v17 }
 0x4aa   : > { %v6802_v49 = vpop.eup %6801  ;;  %v2686_v37 = vadd.f32 %v2685_v34, %v7880_v9  ;;  %v2687_v38 = vpop.f32.mrb[90].mxu1  ;;  %vm3056_vm9 = vcmp.gt.f32.partialorder %v6800_v32, %v5385_v19  ;;  %v2938_v32 = vmul.f32 2.0, %v5299_v25  ;;  %v5402_v25 = vadd.f32 -1.0, %v2945_v8 }
 0x4ab   : > { %v2806_v40 = vmul.f32 0.5, %v2684_v33  ;;  %v2688_v41 = vadd.f32 %v2687_v38, %v7878_v56  ;;  %v2689_v42 = vpop.f32.mrb[91].mxu1  ;;  %vm3057_vm11 = vcmp.gt.f32.partialorder %v6802_v49, %v5386_v30  ;;  %vm5545_vm12 = vmpackc.low %vm3056_vm9, %vm3054_vm8  ;;  %v2940_v33 = vmul.f32 2.0, %v5301_v18  ;;  %v5310_v18 = vld [vmem:[%s7887_s10 + $0x338] sm:$0xff] }
 0x4ac   : > { %v2807_v43 = vmul.f32 0.5, %v2686_v37  ;;  %v2690_v45 = vadd.f32 %v2689_v42, %v7880_v9  ;;  %vm5543_vm13 = vmpackc.low %vm3057_vm11, %vm3055_vm10  ;;  %v5396_v53 = vadd.f32 -1.0, %v2939_v46 }
 0x4ad   : > { %6811 = vtanh.f32 %v2806_v40  ;;  %v2808_v50 = vmul.f32 0.5, %v2688_v41  ;;  %5544 = vmatprep.mubr.msk.bf16.mxu0 %vm5543_vm13, %v7359_v57 }
 0x4ae   : > { %6813 = vtanh.f32 %v2807_v43  ;;  %v2809_v47 = vmul.f32 0.5, %v2690_v45  ;;  %5546 = vmatmul.mubr.msk.bf16.gmra.mrb[144].mxu0 %vm5545_vm12, %v7359_v57  ;;  %v5395_v43 = vadd.f32 -1.0, %v2938_v32  ;;  %v5397_v45 = vadd.f32 -1.0, %v2940_v33 }
 0x4af   : > { %v6804_v54 = vpop.eup %6803  ;;  %6815 = vtanh.f32 %v2808_v50  ;;  %v5304_v50 = vld [vmem:[%s7887_s10 + $0x308] sm:$0xff]  ;;  %v2949_v33 = vmul.f32 2.0, %v5310_v18 }
 0x4b0   : > { %v6806_v0 = vpop.eup %6805  ;;  %6817 = vtanh.f32 %v2809_v47  ;;  %v2693_v1 = vpop.f32.mrb[92].mxu1  ;;  %vm3058_vm14 = vcmp.gt.f32.partialorder %v6804_v54, %v5387_v52  ;;  %v5303_v47 = vld [vmem:[%s7887_s10 + $0x300] sm:$0xff]  ;;  %v5305_v52 = vld [vmem:[%s7887_s10 + $0x310] sm:$0xff] }
 0x4b1   : > { %v6808_v3 = vpop.eup %6807  ;;  %v2694_v4 = vadd.f32 %v2693_v1, %v7878_v56  ;;  %v2695_v5 = vpop.f32.mrb[93].mxu1  ;;  %vm3059_vm0 = vcmp.gt.f32.partialorder %v6806_v0, %v5388_v63  ;;  %v2943_v1 = vmul.f32 2.0, %v5304_v50 }
 0x4b2   : > { %v6810_v58 = vpop.eup %6809  ;;  %v2696_v10 = vadd.f32 %v2695_v5, %v7880_v9  ;;  %v2697_v11 = vpop.f32.mrb[94].mxu1  ;;  %vm3060_vm15 = vcmp.gt.f32.partialorder %v6808_v3, %v5389_v51  ;;  %v2942_v3 = vmul.f32 2.0, %v5303_v47  ;;  %v5406_v47 = vadd.f32 -1.0, %v2949_v33 }
 0x4b3   : > { %v2810_v60 = vmul.f32 0.5, %v2694_v4  ;;  %v2698_v12 = vadd.f32 %v2697_v11, %v7878_v56  ;;  %v2699_v23 = vpop.f32.mrb[95].mxu1  ;;  %vm3061_vm1 = vcmp.gt.f32.partialorder %v6810_v58, %v5390_v55  ;;  %vm5549_vm2 = vmpackc.low %vm3060_vm15, %vm3058_vm14  ;;  %v2944_v4 = vmul.f32 2.0, %v5305_v52  ;;  %v5314_v52 = vld [vmem:[%s7887_s10 + $0x358] sm:$0xff] }
 0x4b4   : > { %v2811_v13 = vmul.f32 0.5, %v2696_v10  ;;  %v2700_v14 = vadd.f32 %v2699_v23, %v7880_v9  ;;  %vm5547_vm3 = vmpackc.low %vm3061_vm1, %vm3059_vm0  ;;  %v5400_v17 = vadd.f32 -1.0, %v2943_v1 }
 0x4b5   : > { %6819 = vtanh.f32 %v2810_v60  ;;  %v2812_v21 = vmul.f32 0.5, %v2698_v12  ;;  %5548 = vmatprep.mubr.msk.bf16.mxu0 %vm5547_vm3, %v7359_v57 }
 0x4b6   : > { %6821 = vtanh.f32 %v2811_v13  ;;  %v2813_v15 = vmul.f32 0.5, %v2700_v14  ;;  %5550 = vmatmul.mubr.msk.bf16.gmra.mrb[148].mxu0 %vm5549_vm2, %v7359_v57  ;;  %v5399_v13 = vadd.f32 -1.0, %v2942_v3  ;;  %v5401_v14 = vadd.f32 -1.0, %v2944_v4 }
 0x4b7   : > { %v6812_v19 = vpop.eup %6811  ;;  %6823 = vtanh.f32 %v2812_v21  ;;  %v5308_v21 = vld [vmem:[%s7887_s10 + $0x328] sm:$0xff]  ;;  %v2953_v4 = vmul.f32 2.0, %v5314_v52 }
 0x4b8   : > { %v6814_v28 = vpop.eup %6813  ;;  %6825 = vtanh.f32 %v2813_v15  ;;  %v2703_v29 = vpop.f32.mrb[96].mxu1  ;;  %vm3062_vm4 = vcmp.gt.f32.partialorder %v6812_v19, %v5391_v24  ;;  %v5307_v15 = vld [vmem:[%s7887_s10 + $0x320] sm:$0xff]  ;;  %v5309_v24 = vld [vmem:[%s7887_s10 + $0x330] sm:$0xff] }
 0x4b9   : > { %v6816_v30 = vpop.eup %6815  ;;  %v2704_v44 = vadd.f32 %v2703_v29, %v7878_v56  ;;  %v2705_v31 = vpop.f32.mrb[97].mxu1  ;;  %vm3063_vm6 = vcmp.gt.f32.partialorder %v6814_v28, %v5392_v20  ;;  %v2947_v29 = vmul.f32 2.0, %v5308_v21 }
 0x4ba   : > { %v6818_v34 = vpop.eup %6817  ;;  %v2706_v48 = vadd.f32 %v2705_v31, %v7880_v9  ;;  %v2707_v35 = vpop.f32.mrb[98].mxu1  ;;  %vm3064_vm5 = vcmp.gt.f32.partialorder %v6816_v30, %v5393_v16  ;;  %v2946_v30 = vmul.f32 2.0, %v5307_v15  ;;  %v5410_v15 = vadd.f32 -1.0, %v2953_v4 }
 0x4bb   : > { %v2814_v49 = vmul.f32 0.5, %v2704_v44  ;;  %v2708_v37 = vadd.f32 %v2707_v35, %v7878_v56  ;;  %v2709_v38 = vpop.f32.mrb[99].mxu1  ;;  %vm3065_vm7 = vcmp.gt.f32.partialorder %v6818_v34, %v5394_v26  ;;  %vm5553_vm8 = vmpackc.low %vm3064_vm5, %vm3062_vm4  ;;  %v2948_v44 = vmul.f32 2.0, %v5309_v24  ;;  %v5318_v24 = vld [vmem:[%s7887_s10 + $0x378] sm:$0xff] }
 0x4bc   : > { %v2815_v39 = vmul.f32 0.5, %v2706_v48  ;;  %v2710_v40 = vadd.f32 %v2709_v38, %v7880_v9  ;;  %vm5551_vm9 = vmpackc.low %vm3065_vm7, %vm3063_vm6  ;;  %v5404_v50 = vadd.f32 -1.0, %v2947_v29 }
 0x4bd   : > { %6827 = vtanh.f32 %v2814_v49  ;;  %v2816_v41 = vmul.f32 0.5, %v2708_v37  ;;  %5552 = vmatprep.mubr.msk.bf16.mxu0 %vm5551_vm9, %v7359_v57 }
 0x4be   : > { %6829 = vtanh.f32 %v2815_v39  ;;  %v2817_v42 = vmul.f32 0.5, %v2710_v40  ;;  %5554 = vmatmul.mubr.msk.bf16.gmra.mrb[152].mxu0 %vm5553_vm8, %v7359_v57  ;;  %v5403_v39 = vadd.f32 -1.0, %v2946_v30  ;;  %v5405_v40 = vadd.f32 -1.0, %v2948_v44 }
 0x4bf   : > { %v6820_v51 = vpop.eup %6819  ;;  %6831 = vtanh.f32 %v2816_v41  ;;  %v5312_v41 = vld [vmem:[%s7887_s10 + $0x348] sm:$0xff]  ;;  %v2957_v44 = vmul.f32 2.0, %v5318_v24 }
 0x4c0   : > { %v6822_v54 = vpop.eup %6821  ;;  %6833 = vtanh.f32 %v2817_v42  ;;  %v2713_v63 = vpop.f32.mrb[100].mxu1  ;;  %vm3066_vm10 = vcmp.gt.f32.partialorder %v6820_v51, %v5395_v43  ;;  %v5311_v42 = vld [vmem:[%s7887_s10 + $0x340] sm:$0xff]  ;;  %v5313_v43 = vld [vmem:[%s7887_s10 + $0x350] sm:$0xff] }
 0x4c1   : > { %v6824_v55 = vpop.eup %6823  ;;  %v2714_v2 = vadd.f32 %v2713_v63, %v7878_v56  ;;  %v2715_v0 = vpop.f32.mrb[101].mxu1  ;;  %vm3067_vm12 = vcmp.gt.f32.partialorder %v6822_v54, %v5396_v53  ;;  %v2951_v63 = vmul.f32 2.0, %v5312_v41 }
 0x4c2   : > { %v6826_v5 = vpop.eup %6825  ;;  %v2716_v6 = vadd.f32 %v2715_v0, %v7880_v9  ;;  %v2717_v7 = vpop.f32.mrb[102].mxu1  ;;  %vm3068_vm11 = vcmp.gt.f32.partialorder %v6824_v55, %v5397_v45  ;;  %v2950_v55 = vmul.f32 2.0, %v5311_v42  ;;  %v5414_v42 = vadd.f32 -1.0, %v2957_v44 }
 0x4c3   : > { %v2818_v58 = vmul.f32 0.5, %v2714_v2  ;;  %v2718_v10 = vadd.f32 %v2717_v7, %v7878_v56  ;;  %v2719_v11 = vpop.f32.mrb[103].mxu1  ;;  %vm3069_vm13 = vcmp.gt.f32.partialorder %v6826_v5, %v5398_v59  ;;  %vm5557_vm14 = vmpackc.low %vm3068_vm11, %vm3066_vm10  ;;  %v2952_v2 = vmul.f32 2.0, %v5313_v43  ;;  %v5322_v43 = vld [vmem:[%s7887_s10 + $0x398] sm:$0xff] }
 0x4c4   : > { %v2819_v22 = vmul.f32 0.5, %v2716_v6  ;;  %v2720_v60 = vadd.f32 %v2719_v11, %v7880_v9  ;;  %vm5555_vm15 = vmpackc.low %vm3069_vm13, %vm3067_vm12  ;;  %v5408_v21 = vadd.f32 -1.0, %v2951_v63 }
 0x4c5   : > { %6835 = vtanh.f32 %v2818_v58  ;;  %v2820_v12 = vmul.f32 0.5, %v2718_v10  ;;  %5556 = vmatprep.mubr.msk.bf16.mxu0 %vm5555_vm15, %v7359_v57 }
 0x4c6   : > { %6837 = vtanh.f32 %v2819_v22  ;;  %v2821_v23 = vmul.f32 0.5, %v2720_v60  ;;  %5558 = vmatmul.mubr.msk.bf16.gmra.mrb[156].mxu0 %vm5557_vm14, %v7359_v57  ;;  %v5407_v22 = vadd.f32 -1.0, %v2950_v55  ;;  %v5409_v60 = vadd.f32 -1.0, %v2952_v2 }
 0x4c7   : > { %v6828_v16 = vpop.eup %6827  ;;  %6839 = vtanh.f32 %v2820_v12  ;;  %v5316_v12 = vld [vmem:[%s7887_s10 + $0x368] sm:$0xff]  ;;  %v2961_v2 = vmul.f32 2.0, %v5322_v43 }
 0x4c8   : > { %v6830_v19 = vpop.eup %6829  ;;  %6841 = vtanh.f32 %v2821_v23  ;;  %v2723_v20 = vpop.f32.mrb[104].mxu1  ;;  %vm3070_vm0 = vcmp.gt.f32.partialorder %v6828_v16, %v5399_v13  ;;  %v5315_v23 = vld [vmem:[%s7887_s10 + $0x360] sm:$0xff]  ;;  %v5317_v13 = vld [vmem:[%s7887_s10 + $0x370] sm:$0xff] }
 0x4c9   : > { %v6832_v26 = vpop.eup %6831  ;;  %v2724_v27 = vadd.f32 %v2723_v20, %v7878_v56  ;;  %v2725_v28 = vpop.f32.mrb[105].mxu1  ;;  %vm3071_vm2 = vcmp.gt.f32.partialorder %v6830_v19, %v5400_v17  ;;  %v2955_v20 = vmul.f32 2.0, %v5316_v12 }
 0x4ca   : > { %v6834_v31 = vpop.eup %6833  ;;  %v2726_v46 = vadd.f32 %v2725_v28, %v7880_v9  ;;  %v2727_v32 = vpop.f32.mrb[106].mxu1  ;;  %vm3072_vm1 = vcmp.gt.f32.partialorder %v6832_v26, %v5401_v14  ;;  %v2954_v26 = vmul.f32 2.0, %v5315_v23  ;;  %v5418_v23 = vadd.f32 -1.0, %v2961_v2 }
 0x4cb   : > { %v2822_v34 = vmul.f32 0.5, %v2724_v27  ;;  %v2728_v48 = vadd.f32 %v2727_v32, %v7878_v56  ;;  %v2729_v35 = vpop.f32.mrb[107].mxu1  ;;  %vm3073_vm3 = vcmp.gt.f32.partialorder %v6834_v31, %v5402_v25  ;;  %vm5561_vm4 = vmpackc.low %vm3072_vm1, %vm3070_vm0  ;;  %v2956_v27 = vmul.f32 2.0, %v5317_v13  ;;  %v5326_v13 = vld [vmem:[%s7887_s10 + $0x3b8] sm:$0xff] }
 0x4cc   : > { %v2823_v36 = vmul.f32 0.5, %v2726_v46  ;;  %v2730_v49 = vadd.f32 %v2729_v35, %v7880_v9  ;;  %vm5559_vm5 = vmpackc.low %vm3073_vm3, %vm3071_vm2  ;;  %v5412_v41 = vadd.f32 -1.0, %v2955_v20 }
 0x4cd   : > { %6843 = vtanh.f32 %v2822_v34  ;;  %v2824_v37 = vmul.f32 0.5, %v2728_v48  ;;  %5560 = vmatprep.mubr.msk.bf16.mxu0 %vm5559_vm5, %v7359_v57 }
 0x4ce   : > { %6845 = vtanh.f32 %v2823_v36  ;;  %v2825_v38 = vmul.f32 0.5, %v2730_v49  ;;  %5562 = vmatmul.mubr.msk.bf16.gmra.mrb[160].mxu0 %vm5561_vm4, %v7359_v57  ;;  %v5411_v36 = vadd.f32 -1.0, %v2954_v26  ;;  %v5413_v49 = vadd.f32 -1.0, %v2956_v27 }
 0x4cf   : > { %v6836_v45 = vpop.eup %6835  ;;  %6847 = vtanh.f32 %v2824_v37  ;;  %v5320_v37 = vld [vmem:[%s7887_s10 + $0x388] sm:$0xff]  ;;  %v2965_v27 = vmul.f32 2.0, %v5326_v13 }
 0x4d0   : > { %v6838_v51 = vpop.eup %6837  ;;  %6849 = vtanh.f32 %v2825_v38  ;;  %v2733_v53 = vpop.f32.mrb[108].mxu1  ;;  %vm3074_vm6 = vcmp.gt.f32.partialorder %v6836_v45, %v5403_v39  ;;  %v5319_v38 = vld [vmem:[%s7887_s10 + $0x380] sm:$0xff]  ;;  %v5321_v39 = vld [vmem:[%s7887_s10 + $0x390] sm:$0xff] }
 0x4d1   : > { %v6840_v59 = vpop.eup %6839  ;;  %v2734_v62 = vadd.f32 %v2733_v53, %v7878_v56  ;;  %v2735_v54 = vpop.f32.mrb[109].mxu1  ;;  %vm3075_vm8 = vcmp.gt.f32.partialorder %v6838_v51, %v5404_v50  ;;  %v2959_v53 = vmul.f32 2.0, %v5320_v37 }
 0x4d2   : > { %v6842_v0 = vpop.eup %6841  ;;  %v2736_v1 = vadd.f32 %v2735_v54, %v7880_v9  ;;  %v2737_v3 = vpop.f32.mrb[110].mxu1  ;;  %vm3076_vm7 = vcmp.gt.f32.partialorder %v6840_v59, %v5405_v40  ;;  %v2958_v59 = vmul.f32 2.0, %v5319_v38  ;;  %v5422_v38 = vadd.f32 -1.0, %v2965_v27 }
 0x4d3   : > { %v2826_v5 = vmul.f32 0.5, %v2734_v62  ;;  %v2738_v6 = vadd.f32 %v2737_v3, %v7878_v56  ;;  %v2739_v7 = vpop.f32.mrb[111].mxu1  ;;  %vm3077_vm9 = vcmp.gt.f32.partialorder %v6842_v0, %v5406_v47  ;;  %vm5565_vm10 = vmpackc.low %vm3076_vm7, %vm3074_vm6  ;;  %v2960_v62 = vmul.f32 2.0, %v5321_v39  ;;  %v5330_v39 = vld [vmem:[%s7887_s10 + $0x3d8] sm:$0xff] }
 0x4d4   : > { %v2827_v8 = vmul.f32 0.5, %v2736_v1  ;;  %v2740_v58 = vadd.f32 %v2739_v7, %v7880_v9  ;;  %vm5563_vm11 = vmpackc.low %vm3077_vm9, %vm3075_vm8  ;;  %v5416_v12 = vadd.f32 -1.0, %v2959_v53 }
 0x4d5   : > { %6851 = vtanh.f32 %v2826_v5  ;;  %v2828_v10 = vmul.f32 0.5, %v2738_v6  ;;  %5564 = vmatprep.mubr.msk.bf16.mxu0 %vm5563_vm11, %v7359_v57 }
 0x4d6   : > { %6853 = vtanh.f32 %v2827_v8  ;;  %v2829_v11 = vmul.f32 0.5, %v2740_v58  ;;  %5566 = vmatmul.mubr.msk.bf16.gmra.mrb[164].mxu0 %vm5565_vm10, %v7359_v57  ;;  %v5415_v8 = vadd.f32 -1.0, %v2958_v59  ;;  %v5417_v58 = vadd.f32 -1.0, %v2960_v62 }
 0x4d7   : > { %v6844_v14 = vpop.eup %6843  ;;  %6855 = vtanh.f32 %v2828_v10  ;;  %v5324_v10 = vld [vmem:[%s7887_s10 + $0x3a8] sm:$0xff]  ;;  %v2969_v62 = vmul.f32 2.0, %v5330_v39 }
 0x4d8   : > { %v6846_v16 = vpop.eup %6845  ;;  %6857 = vtanh.f32 %v2829_v11  ;;  %v2743_v17 = vpop.f32.mrb[112].mxu1  ;;  %vm3078_vm12 = vcmp.gt.f32.partialorder %v6844_v14, %v5407_v22  ;;  %v5323_v11 = vld [vmem:[%s7887_s10 + $0x3a0] sm:$0xff]  ;;  %v5325_v22 = vld [vmem:[%s7887_s10 + $0x3b0] sm:$0xff]  ;;  %v5496_v39 = vld [vmem:[%s7671_s30 + $0x208] sm:$0xff] }
 0x4d9   : > { %v6848_v25 = vpop.eup %6847  ;;  %v2744_v18 = vadd.f32 %v2743_v17, %v7878_v56  ;;  %v2745_v19 = vpop.f32.mrb[113].mxu1  ;;  %vm3079_vm14 = vcmp.gt.f32.partialorder %v6846_v16, %v5408_v21  ;;  %v2963_v17 = vmul.f32 2.0, %v5324_v10  ;;  %v5333_v10 = vld [vmem:[%s7887_s10 + $0x3f0] sm:$0xff] }
 0x4da   : > { %v6850_v28 = vpop.eup %6849  ;;  %v2746_v29 = vadd.f32 %v2745_v19, %v7880_v9  ;;  %v2747_v30 = vpop.f32.mrb[114].mxu1  ;;  %vm3080_vm13 = vcmp.gt.f32.partialorder %v6848_v25, %v5409_v60  ;;  %v2962_v25 = vmul.f32 2.0, %v5323_v11 }
 0x4db   : > { %v2830_v31 = vmul.f32 0.5, %v2744_v18  ;;  %v2748_v46 = vadd.f32 %v2747_v30, %v7878_v56  ;;  %v2749_v32 = vpop.f32.mrb[115].mxu1  ;;  %vm3081_vm15 = vcmp.gt.f32.partialorder %v6850_v28, %v5410_v15  ;;  %vm5569_vm0 = vmpackc.low %vm3080_vm13, %vm3078_vm12  ;;  %v2964_v18 = vmul.f32 2.0, %v5325_v22  ;;  %v5332_v22 = vld [vmem:[%s7887_s10 + $0x3e8] sm:$0xff] }
 0x4dc   : > { %v2831_v33 = vmul.f32 0.5, %v2746_v29  ;;  %v2750_v34 = vadd.f32 %v2749_v32, %v7880_v9  ;;  %vm5567_vm1 = vmpackc.low %vm3081_vm15, %vm3079_vm14  ;;  %v5420_v37 = vadd.f32 -1.0, %v2963_v17 }
 0x4dd   : > { %6859 = vtanh.f32 %v2830_v31  ;;  %v2832_v48 = vmul.f32 0.5, %v2748_v46  ;;  %5568 = vmatprep.mubr.msk.bf16.mxu0 %vm5567_vm1, %v7359_v57 }
 0x4de   : > { %6861 = vtanh.f32 %v2831_v33  ;;  %v2833_v35 = vmul.f32 0.5, %v2750_v34  ;;  %5570 = vmatmul.mubr.msk.bf16.gmra.mrb[168].mxu0 %vm5569_vm0, %v7359_v57  ;;  %v5419_v33 = vadd.f32 -1.0, %v2962_v25  ;;  %v5421_v34 = vadd.f32 -1.0, %v2964_v18 }
 0x4df   : > { %v6852_v40 = vpop.eup %6851  ;;  %6863 = vtanh.f32 %v2832_v48  ;;  %v5328_v48 = vld [vmem:[%s7887_s10 + $0x3c8] sm:$0xff] }
 0x4e0   : > { %v6854_v45 = vpop.eup %6853  ;;  %6865 = vtanh.f32 %v2833_v35  ;;  %v2753_v50 = vpop.f32.mrb[116].mxu1  ;;  %vm3082_vm2 = vcmp.gt.f32.partialorder %v6852_v40, %v5411_v36  ;;  %v5327_v35 = vld [vmem:[%s7887_s10 + $0x3c0] sm:$0xff]  ;;  %v5329_v36 = vld [vmem:[%s7887_s10 + $0x3d0] sm:$0xff] }
 0x4e1   : > { %v6856_v47 = vpop.eup %6855  ;;  %v2754_v52 = vadd.f32 %v2753_v50, %v7878_v56  ;;  %v2755_v51 = vpop.f32.mrb[117].mxu1  ;;  %vm3083_vm4 = vcmp.gt.f32.partialorder %v6854_v45, %v5412_v41  ;;  %v2967_v50 = vmul.f32 2.0, %v5328_v48 }
 0x4e2   : > { %v6858_v54 = vpop.eup %6857  ;;  %v2756_v63 = vadd.f32 %v2755_v51, %v7880_v9  ;;  %v2757_v55 = vpop.f32.mrb[118].mxu1  ;;  %vm3084_vm3 = vcmp.gt.f32.partialorder %v6856_v47, %v5413_v49  ;;  %v2966_v47 = vmul.f32 2.0, %v5327_v35 }
 0x4e3   : > { %v2834_v0 = vmul.f32 0.5, %v2754_v52  ;;  %v2758_v1 = vadd.f32 %v2757_v55, %v7878_v56  ;;  %v2759_v3 = vpop.f32.mrb[119].mxu1  ;;  %vm3085_vm5 = vcmp.gt.f32.partialorder %v6858_v54, %v5414_v42  ;;  %vm5573_vm6 = vmpackc.low %vm3084_vm3, %vm3082_vm2  ;;  %v2968_v52 = vmul.f32 2.0, %v5329_v36 }
 0x4e4   : > { %v2835_v4 = vmul.f32 0.5, %v2756_v63  ;;  %v2760_v5 = vadd.f32 %v2759_v3, %v7880_v9  ;;  %vm5571_vm7 = vmpackc.low %vm3085_vm5, %vm3083_vm4 }
 0x4e5   : > { %6867 = vtanh.f32 %v2834_v0  ;;  %v2836_v6 = vmul.f32 0.5, %v2758_v1  ;;  %5572 = vmatprep.mubr.msk.bf16.mxu0 %vm5571_vm7, %v7359_v57 }
 0x4e6   : > { %6869 = vtanh.f32 %v2835_v4  ;;  %v2837_v7 = vmul.f32 0.5, %v2760_v5  ;;  %5574 = vmatmul.mubr.msk.bf16.gmra.mrb[172].mxu0 %vm5573_vm6, %v7359_v57  ;;  %v5423_v4 = vadd.f32 -1.0, %v2966_v47  ;;  %v5425_v5 = vadd.f32 -1.0, %v2968_v52 }
 0x4e7   : > { %v6860_v60 = vpop.eup %6859  ;;  %6871 = vtanh.f32 %v2836_v6 }
 0x4e8   : > { %v6862_v14 = vpop.eup %6861  ;;  %6873 = vtanh.f32 %v2837_v7  ;;  %v2763_v21 = vpop.f32.mrb[120].mxu1  ;;  %vm3086_vm8 = vcmp.gt.f32.partialorder %v6860_v60, %v5415_v8  ;;  %v5424_v7 = vadd.f32 -1.0, %v2967_v50  ;;  %v5426_v8 = vadd.f32 -1.0, %v2969_v62  ;;  %v5334_v60 = vld [vmem:[%s7887_s10 + $0x3f8] sm:$0xff] }
 0x4e9   : > { %v6864_v15 = vpop.eup %6863  ;;  %v2764_v24 = vadd.f32 %v2763_v21, %v7878_v56  ;;  %v2765_v16 = vpop.f32.mrb[121].mxu1  ;;  %vm3087_vm10 = vcmp.gt.f32.partialorder %v6862_v14, %v5416_v12  ;;  %v2972_v14 = vmul.f32 2.0, %v5333_v10  ;;  %v2971_v21 = vmul.f32 2.0, %v5332_v22 }
 0x4ea   : > { %v6866_v19 = vpop.eup %6865  ;;  %v2766_v20 = vadd.f32 %v2765_v16, %v7880_v9  ;;  %v2767_v26 = vpop.f32.mrb[122].mxu1  ;;  %vm3088_vm9 = vcmp.gt.f32.partialorder %v6864_v15, %v5417_v58  ;;  %v5331_v58 = vld [vmem:[%s7887_s10 + $0x3e0] sm:$0xff]  ;;  %v2973_v15 = vmul.f32 2.0, %v5334_v60 }
 0x4eb   : > { %v2838_v28 = vmul.f32 0.5, %v2764_v24  ;;  %v2768_v29 = vadd.f32 %v2767_v26, %v7878_v56  ;;  %v2769_v30 = vpop.f32.mrb[123].mxu1  ;;  %vm3089_vm11 = vcmp.gt.f32.partialorder %v6866_v19, %v5418_v23  ;;  %vm5577_vm12 = vmpackc.low %vm3088_vm9, %vm3086_vm8  ;;  %v2970_v13 = vmul.f32 2.0, %v5331_v58 }
 0x4ec   : > { %v2839_v44 = vmul.f32 0.5, %v2766_v20  ;;  %v2770_v31 = vadd.f32 %v2769_v30, %v7880_v9  ;;  %vm5575_vm13 = vmpackc.low %vm3089_vm11, %vm3087_vm10  ;;  %v5429_v16 = vadd.f32 -1.0, %v2972_v14  ;;  %v5428_v25 = vadd.f32 -1.0, %v2971_v21  ;;  %v5499_v21 = vld [vmem:[%s7671_s30 + $0x220] sm:$0xff] }
 0x4ed   : > { %6875 = vtanh.f32 %v2838_v28  ;;  %v2840_v46 = vmul.f32 0.5, %v2768_v29  ;;  %5576 = vmatprep.mubr.msk.bf16.mxu0 %vm5575_vm13, %v7359_v57  ;;  %v5427_v24 = vadd.f32 -1.0, %v2970_v13  ;;  %v5430_v18 = vadd.f32 -1.0, %v2973_v15  ;;  %v5500_v15 = vld [vmem:[%s7671_s30 + $0x228] sm:$0xff] }
 0x4ee   : > { %6877 = vtanh.f32 %v2839_v44  ;;  %v2841_v32 = vmul.f32 0.5, %v2770_v31  ;;  %5578 = vmatmul.mubr.msk.bf16.gmra.mrb[176].mxu0 %vm5577_vm12, %v7359_v57  ;;  %v8303_v31 = vld [vmem:[#allocation10] ss:$0 sm:$0xff] }
 0x4ef   : > { %v6868_v49 = vpop.eup %6867  ;;  %6879 = vtanh.f32 %v2840_v46 }
 0x4f0   : > { %v6870_v40 = vpop.eup %6869  ;;  %6881 = vtanh.f32 %v2841_v32  ;;  %v2773_v41 = vpop.f32.mrb[124].mxu1  ;;  %vm3090_vm14 = vcmp.gt.f32.partialorder %v6868_v49, %v5419_v33 }
 0x4f1   : > { %v6872_v42 = vpop.eup %6871  ;;  %v2774_v43 = vadd.f32 %v2773_v41, %v7878_v56  ;;  %v2775_v45 = vpop.f32.mrb[125].mxu1  ;;  %vm3091_vm0 = vcmp.gt.f32.partialorder %v6870_v40, %v5420_v37 }
 0x4f2   : > { %v6874_v51 = vpop.eup %6873  ;;  %v2776_v53 = vadd.f32 %v2775_v45, %v7880_v9  ;;  %v2777_v59 = vpop.f32.mrb[126].mxu1  ;;  %vm3092_vm15 = vcmp.gt.f32.partialorder %v6872_v42, %v5421_v34  ;;  %v3521_v45 = vmul.f32 2.0, %v5496_v39 }
 0x4f3   : > { %v2842_v54 = vmul.f32 0.5, %v2774_v43  ;;  %v2778_v63 = vadd.f32 %v2777_v59, %v7878_v56  ;;  %v2779_v55 = vpop.f32.mrb[127].mxu1  ;;  %vm3093_vm1 = vcmp.gt.f32.partialorder %v6874_v51, %v5422_v38  ;;  %vm5581_vm2 = vmpackc.low %vm3092_vm15, %vm3090_vm14  ;;  %v5495_v38 = vld [vmem:[%s7671_s30 + $0x200] sm:$0xff] }
 0x4f4   : > { %v2843_v2 = vmul.f32 0.5, %v2776_v53  ;;  %v2780_v0 = vadd.f32 %v2779_v55, %v7880_v9  ;;  %vm5579_vm3 = vmpackc.low %vm3093_vm1, %vm3091_vm0  ;;  %v3520_v43 = vmul.f32 2.0, %v5495_v38  ;;  %v5592_v62 = vadd.f32 -1.0, %v3521_v45 }
 0x4f5   : > { %6883 = vtanh.f32 %v2842_v54  ;;  %v2844_v1 = vmul.f32 0.5, %v2778_v63  ;;  %5580 = vmatprep.mubr.msk.bf16.mxu0 %vm5579_vm3, %v7359_v57 }
 0x4f6   : > { %6885 = vtanh.f32 %v2843_v2  ;;  %v2845_v3 = vmul.f32 0.5, %v2780_v0  ;;  %5582 = vmatmul.mubr.msk.bf16.gmra.mrb[180].mxu0 %vm5581_vm2, %v7359_v57  ;;  %v5591_v59 = vadd.f32 -1.0, %v3520_v43  ;;  %v5497_v2 = vld [vmem:[%s7671_s30 + $0x210] sm:$0xff]  ;;  %v5498_v0 = vld [vmem:[%s7671_s30 + $0x218] sm:$0xff] }
 0x4f7   : > { %v6876_v6 = vpop.eup %6875  ;;  %6887 = vtanh.f32 %v2844_v1 }
 0x4f8   : > { %v6878_v11 = vpop.eup %6877  ;;  %6889 = vtanh.f32 %v2845_v3  ;;  %vm3094_vm4 = vcmp.gt.f32.partialorder %v6876_v6, %v5423_v4  ;;  %v3522_v6 = vmul.f32 2.0, %v5497_v2 }
 0x4f9   : > { %v6880_v12 = vpop.eup %6879  ;;  %vm3095_vm6 = vcmp.gt.f32.partialorder %v6878_v11, %v5424_v7  ;;  %v3523_v7 = vmul.f32 2.0, %v5498_v0 }
 0x4fa   : > { %v6882_v23 = vpop.eup %6881  ;;  %vm3096_vm5 = vcmp.gt.f32.partialorder %v6880_v12, %v5425_v5  ;;  %v5593_v60 = vadd.f32 -1.0, %v3522_v6 }
 0x4fb   : > { %vm3097_vm7 = vcmp.gt.f32.partialorder %v6882_v23, %v5426_v8  ;;  %vm5585_vm8 = vmpackc.low %vm3096_vm5, %vm3094_vm4  ;;  %v5594_v12 = vadd.f32 -1.0, %v3523_v7 }
 0x4fc   : > { %vm5583_vm9 = vmpackc.low %vm3097_vm7, %vm3095_vm6 }
 0x4fd   : > { %5584 = vmatprep.mubr.msk.bf16.mxu0 %vm5583_vm9, %v7359_v57 }
 0x4fe   : > { %5586 = vmatmul.mubr.msk.bf16.gmra.mrb[184].mxu0 %vm5585_vm8, %v7359_v57 }
 0x4ff   : > { %v6884_v17 = vpop.eup %6883 }
 0x500   : > { %v6886_v19 = vpop.eup %6885  ;;  %vm3098_vm10 = vcmp.gt.f32.partialorder %v6884_v17, %v5427_v24 }
 0x501   : > { %v6888_v20 = vpop.eup %6887  ;;  %vm3099_vm12 = vcmp.gt.f32.partialorder %v6886_v19, %v5428_v25  ;;  %v3525_v19 = vmul.f32 2.0, %v5500_v15 }
 0x502   : > { %v6890_v26 = vpop.eup %6889  ;;  %vm3100_vm11 = vcmp.gt.f32.partialorder %v6888_v20, %v5429_v16 }
 0x503   : > { %vm3101_vm13 = vcmp.gt.f32.partialorder %v6890_v26, %v5430_v18  ;;  %vm5589_vm14 = vmpackc.low %vm3100_vm11, %vm3098_vm10  ;;  %v3524_v18 = vmul.f32 2.0, %v5499_v21 }
 0x504   : > { %vm5587_vm15 = vmpackc.low %vm3101_vm13, %vm3099_vm12 }
 0x505   : > { %5588 = vmatprep.mubr.msk.bf16.mxu0 %vm5587_vm15, %v7359_v57 }
 0x506   : > { %5590 = vmatmul.mubr.msk.bf16.gmra.mrb[188].mxu0 %vm5589_vm14, %v7359_v57 }
 0x561   : > { %v6196_v27 = vpop.f32.mrb[128].mxu0 }
 0x562   : > { %v6197_v28 = vpop.f32.mrb[129].mxu0 }
 0x563   : > { %v6198_v29 = vadd.f32 %v6197_v28, %v6196_v27  ;;  %v6199_v30 = vpop.f32.mrb[130].mxu0 }
 0x564   : > { %v6200_v44 = vpop.f32.mrb[131].mxu0 }
 0x565   : > { %v3330_v46 = vadd.f32 %v8303_v31, %v6198_v29  ;;  %v6201_v32 = vadd.f32 %v6200_v44, %v6199_v30  ;;  %v5595_v30 = vadd.f32 -1.0, %v3524_v18  ;;  %v5596_v44 = vadd.f32 -1.0, %v3525_v19 }
 0x567   : > { %v3456_v33 = vmul.f32 0.5, %v3330_v46  ;;  %v3333_v34 = vadd.f32 %v8303_v31, %v6201_v32 }
 0x569   : > { %6891 = vtanh.f32 %v3456_v33  ;;  %v3457_v48 = vmul.f32 0.5, %v3333_v34  ;;  %v6202_v35 = vpop.f32.mrb[132].mxu0  ;;  %v5501_v34 = vld [vmem:[%s7671_s30 + $0x230] sm:$0xff] }
 0x56a   : > { %v6203_v36 = vpop.f32.mrb[133].mxu0  ;;  %v3526_v38 = vmul.f32 2.0, %v5501_v34 }
 0x56b   : > { %6893 = vtanh.f32 %v3457_v48  ;;  %v6204_v49 = vadd.f32 %v6203_v36, %v6202_v35  ;;  %v6205_v37 = vpop.f32.mrb[134].mxu0  ;;  %v5502_v48 = vld [vmem:[%s7671_s30 + $0x238] sm:$0xff] }
 0x56c   : > { %v6206_v40 = vpop.f32.mrb[135].mxu0  ;;  %v3527_v39 = vmul.f32 2.0, %v5502_v48 }
 0x56d   : > { %v3338_v41 = vadd.f32 %v8303_v31, %v6204_v49  ;;  %v6207_v42 = vadd.f32 %v6206_v40, %v6205_v37 }
 0x56f   : > { %v3458_v50 = vmul.f32 0.5, %v3338_v41  ;;  %v3341_v47 = vadd.f32 %v8303_v31, %v6207_v42 }
 0x571   : > { %6895 = vtanh.f32 %v3458_v50  ;;  %v3459_v52 = vmul.f32 0.5, %v3341_v47  ;;  %v6208_v51 = vpop.f32.mrb[136].mxu0  ;;  %v5597_v50 = vadd.f32 -1.0, %v3526_v38  ;;  %v5598_v47 = vadd.f32 -1.0, %v3527_v39 }
 0x572   : > { %v6209_v53 = vpop.f32.mrb[137].mxu0 }
 0x573   : > { %v6892_v54 = vpop.eup %6891  ;;  %6897 = vtanh.f32 %v3459_v52  ;;  %v6210_v63 = vadd.f32 %v6209_v53, %v6208_v51  ;;  %v6211_v55 = vpop.f32.mrb[138].mxu0 }
 0x574   : > { %v6212_v1 = vpop.f32.mrb[139].mxu0  ;;  %vm3584_vm0 = vcmp.gt.f32.partialorder %v6892_v54, %v5591_v59  ;;  %v5503_v59 = vld [vmem:[%s7671_s30 + $0x240] sm:$0xff] }
 0x575   : > { %v6894_v3 = vpop.eup %6893  ;;  %v3346_v4 = vadd.f32 %v8303_v31, %v6210_v63  ;;  %v6213_v5 = vadd.f32 %v6212_v1, %v6211_v55  ;;  %v3528_v0 = vmul.f32 2.0, %v5503_v59 }
 0x576   : > { %vm3585_vm1 = vcmp.gt.f32.partialorder %v6894_v3, %v5592_v62  ;;  %v5504_v62 = vld [vmem:[%s7671_s30 + $0x248] sm:$0xff] }
 0x577   : > { %v3460_v8 = vmul.f32 0.5, %v3346_v4  ;;  %v3349_v58 = vadd.f32 %v8303_v31, %v6213_v5  ;;  %vm5719_vm2 = vmpackc.low %vm3585_vm1, %vm3584_vm0  ;;  %v3529_v1 = vmul.f32 2.0, %v5504_v62 }
 0x578   : > { %5720 = vmatmul.mubr.msk.bf16.vlgmr.msra.gmra.mrb[128].mxu1 %vm5719_vm2, %v7359_v57 }
 0x579   : > { %6899 = vtanh.f32 %v3460_v8  ;;  %v3461_v10 = vmul.f32 0.5, %v3349_v58  ;;  %v6214_v11 = vpop.f32.mrb[140].mxu0  ;;  %3803 = vmatprep.mubr.bf16.mxu1 %v7358_v61  ;;  %v5599_v8 = vadd.f32 -1.0, %v3528_v0  ;;  %v5600_v58 = vadd.f32 -1.0, %v3529_v1 }
 0x57a   : > { %v6215_v22 = vpop.f32.mrb[141].mxu0 }
 0x57b   : > { %v6896_v23 = vpop.eup %6895  ;;  %6901 = vtanh.f32 %v3461_v10  ;;  %v6216_v13 = vadd.f32 %v6215_v22, %v6214_v11  ;;  %v6217_v14 = vpop.f32.mrb[142].mxu0 }
 0x57c   : > { %v6218_v24 = vpop.f32.mrb[143].mxu0  ;;  %vm3586_vm3 = vcmp.gt.f32.partialorder %v6896_v23, %v5593_v60  ;;  %v5505_v60 = vld [vmem:[%s7671_s30 + $0x250] sm:$0xff] }
 0x57d   : > { %v6898_v16 = vpop.eup %6897  ;;  %v3354_v17 = vadd.f32 %v8303_v31, %v6216_v13  ;;  %v6219_v25 = vadd.f32 %v6218_v24, %v6217_v14  ;;  %v3530_v15 = vmul.f32 2.0, %v5505_v60 }
 0x57e   : > { %vm3587_vm4 = vcmp.gt.f32.partialorder %v6898_v16, %v5594_v12  ;;  %v5506_v12 = vld [vmem:[%s7671_s30 + $0x258] sm:$0xff] }
 0x57f   : > { %v3462_v20 = vmul.f32 0.5, %v3354_v17  ;;  %v3357_v26 = vadd.f32 %v8303_v31, %v6219_v25  ;;  %vm5721_vm5 = vmpackc.low %vm3587_vm4, %vm3586_vm3  ;;  %v3531_v24 = vmul.f32 2.0, %v5506_v12 }
 0x580   : > { %5722 = vmatmul.mubr.msk.bf16.gmra.mrb[132].mxu1 %vm5721_vm5, %v7359_v57 }
 0x581   : > { %6903 = vtanh.f32 %v3462_v20  ;;  %v3463_v27 = vmul.f32 0.5, %v3357_v26  ;;  %v6220_v28 = vpop.f32.mrb[144].mxu0  ;;  %3813 = vmatprep.mubr.bf16.mxu1 %v7358_v61  ;;  %v5601_v20 = vadd.f32 -1.0, %v3530_v15  ;;  %v5602_v26 = vadd.f32 -1.0, %v3531_v24 }
 0x582   : > { %v6221_v29 = vpop.f32.mrb[145].mxu0 }
 0x583   : > { %v6900_v46 = vpop.eup %6899  ;;  %6905 = vtanh.f32 %v3463_v27  ;;  %v6222_v32 = vadd.f32 %v6221_v29, %v6220_v28  ;;  %v6223_v33 = vpop.f32.mrb[146].mxu0 }
 0x584   : > { %v6224_v35 = vpop.f32.mrb[147].mxu0  ;;  %vm3588_vm6 = vcmp.gt.f32.partialorder %v6900_v46, %v5595_v30  ;;  %v5507_v30 = vld [vmem:[%s7671_s30 + $0x260] sm:$0xff] }
 0x585   : > { %v6902_v36 = vpop.eup %6901  ;;  %v3362_v49 = vadd.f32 %v8303_v31, %v6222_v32  ;;  %v6225_v37 = vadd.f32 %v6224_v35, %v6223_v33  ;;  %v3532_v48 = vmul.f32 2.0, %v5507_v30 }
 0x586   : > { %vm3589_vm7 = vcmp.gt.f32.partialorder %v6902_v36, %v5596_v44  ;;  %v5508_v44 = vld [vmem:[%s7671_s30 + $0x268] sm:$0xff] }
 0x587   : > { %v3464_v40 = vmul.f32 0.5, %v3362_v49  ;;  %v3365_v41 = vadd.f32 %v8303_v31, %v6225_v37  ;;  %vm5723_vm8 = vmpackc.low %vm3589_vm7, %vm3588_vm6  ;;  %v3533_v35 = vmul.f32 2.0, %v5508_v44 }
 0x588   : > { %5724 = vmatmul.mubr.msk.bf16.gmra.mrb[136].mxu1 %vm5723_vm8, %v7359_v57 }
 0x589   : > { %6907 = vtanh.f32 %v3464_v40  ;;  %v3465_v42 = vmul.f32 0.5, %v3365_v41  ;;  %v6226_v43 = vpop.f32.mrb[148].mxu0  ;;  %3823 = vmatprep.mubr.bf16.mxu1 %v7358_v61  ;;  %v5603_v40 = vadd.f32 -1.0, %v3532_v48  ;;  %v5604_v41 = vadd.f32 -1.0, %v3533_v35 }
 0x58a   : > { %v6227_v45 = vpop.f32.mrb[149].mxu0 }
 0x58b   : > { %v6904_v52 = vpop.eup %6903  ;;  %6909 = vtanh.f32 %v3465_v42  ;;  %v6228_v51 = vadd.f32 %v6227_v45, %v6226_v43  ;;  %v6229_v53 = vpop.f32.mrb[150].mxu0 }
 0x58c   : > { %v6230_v54 = vpop.f32.mrb[151].mxu0  ;;  %vm3590_vm9 = vcmp.gt.f32.partialorder %v6904_v52, %v5597_v50  ;;  %v5509_v50 = vld [vmem:[%s7671_s30 + $0x270] sm:$0xff] }
 0x58d   : > { %v6906_v63 = vpop.eup %6905  ;;  %v3370_v55 = vadd.f32 %v8303_v31, %v6228_v51  ;;  %v6231_v2 = vadd.f32 %v6230_v54, %v6229_v53  ;;  %v3534_v62 = vmul.f32 2.0, %v5509_v50 }
 0x58e   : > { %vm3591_vm10 = vcmp.gt.f32.partialorder %v6906_v63, %v5598_v47  ;;  %v5510_v47 = vld [vmem:[%s7671_s30 + $0x278] sm:$0xff] }
 0x58f   : > { %v3466_v3 = vmul.f32 0.5, %v3370_v55  ;;  %v3373_v4 = vadd.f32 %v8303_v31, %v6231_v2  ;;  %vm5725_vm11 = vmpackc.low %vm3591_vm10, %vm3590_vm9  ;;  %v3535_v54 = vmul.f32 2.0, %v5510_v47 }
 0x590   : > { %5726 = vmatmul.mubr.msk.bf16.gmra.mrb[140].mxu1 %vm5725_vm11, %v7359_v57 }
 0x591   : > { %6911 = vtanh.f32 %v3466_v3  ;;  %v3467_v5 = vmul.f32 0.5, %v3373_v4  ;;  %v6232_v6 = vpop.f32.mrb[152].mxu0  ;;  %3833 = vmatprep.mubr.bf16.mxu1 %v7358_v61  ;;  %v5605_v3 = vadd.f32 -1.0, %v3534_v62  ;;  %v5606_v4 = vadd.f32 -1.0, %v3535_v54 }
 0x592   : > { %v6233_v7 = vpop.f32.mrb[153].mxu0 }
 0x593   : > { %v6908_v10 = vpop.eup %6907  ;;  %6913 = vtanh.f32 %v3467_v5  ;;  %v6234_v11 = vadd.f32 %v6233_v7, %v6232_v6  ;;  %v6235_v22 = vpop.f32.mrb[154].mxu0 }
 0x594   : > { %v6236_v23 = vpop.f32.mrb[155].mxu0  ;;  %vm3592_vm12 = vcmp.gt.f32.partialorder %v6908_v10, %v5599_v8  ;;  %v5511_v8 = vld [vmem:[%s7671_s30 + $0x280] sm:$0xff] }
 0x595   : > { %v6910_v13 = vpop.eup %6909  ;;  %v3378_v14 = vadd.f32 %v8303_v31, %v6234_v11  ;;  %v6237_v21 = vadd.f32 %v6236_v23, %v6235_v22  ;;  %v3536_v12 = vmul.f32 2.0, %v5511_v8 }
 0x596   : > { %vm3593_vm13 = vcmp.gt.f32.partialorder %v6910_v13, %v5600_v58  ;;  %v5512_v58 = vld [vmem:[%s7671_s30 + $0x288] sm:$0xff] }
 0x597   : > { %v3468_v16 = vmul.f32 0.5, %v3378_v14  ;;  %v3381_v17 = vadd.f32 %v8303_v31, %v6237_v21  ;;  %vm5727_vm14 = vmpackc.low %vm3593_vm13, %vm3592_vm12  ;;  %v3537_v23 = vmul.f32 2.0, %v5512_v58 }
 0x598   : > { %5728 = vmatmul.mubr.msk.bf16.gmra.mrb[144].mxu1 %vm5727_vm14, %v7359_v57 }
 0x599   : > { %6915 = vtanh.f32 %v3468_v16  ;;  %v3469_v25 = vmul.f32 0.5, %v3381_v17  ;;  %v6238_v18 = vpop.f32.mrb[156].mxu0  ;;  %3843 = vmatprep.mubr.bf16.mxu1 %v7358_v61  ;;  %v5607_v16 = vadd.f32 -1.0, %v3536_v12  ;;  %v5608_v17 = vadd.f32 -1.0, %v3537_v23 }
 0x59a   : > { %v6239_v19 = vpop.f32.mrb[157].mxu0 }
 0x59b   : > { %v6912_v27 = vpop.eup %6911  ;;  %6917 = vtanh.f32 %v3469_v25  ;;  %v6240_v28 = vadd.f32 %v6239_v19, %v6238_v18  ;;  %v6241_v29 = vpop.f32.mrb[158].mxu0 }
 0x59c   : > { %v6242_v46 = vpop.f32.mrb[159].mxu0  ;;  %vm3594_vm15 = vcmp.gt.f32.partialorder %v6912_v27, %v5601_v20  ;;  %v5513_v20 = vld [vmem:[%s7671_s30 + $0x290] sm:$0xff] }
 0x59d   : > { %v6914_v32 = vpop.eup %6913  ;;  %v3386_v33 = vadd.f32 %v8303_v31, %v6240_v28  ;;  %v6243_v34 = vadd.f32 %v6242_v46, %v6241_v29  ;;  %v3538_v44 = vmul.f32 2.0, %v5513_v20 }
 0x59e   : > { %vm3595_vm0 = vcmp.gt.f32.partialorder %v6914_v32, %v5602_v26  ;;  %v5514_v26 = vld [vmem:[%s7671_s30 + $0x298] sm:$0xff] }
 0x59f   : > { %v3470_v36 = vmul.f32 0.5, %v3386_v33  ;;  %v3389_v49 = vadd.f32 %v8303_v31, %v6243_v34  ;;  %vm5729_vm1 = vmpackc.low %vm3595_vm0, %vm3594_vm15  ;;  %v3539_v46 = vmul.f32 2.0, %v5514_v26 }
 0x5a0   : > { %5730 = vmatmul.mubr.msk.bf16.gmra.mrb[148].mxu1 %vm5729_vm1, %v7359_v57 }
 0x5a1   : > { %6919 = vtanh.f32 %v3470_v36  ;;  %v3471_v37 = vmul.f32 0.5, %v3389_v49  ;;  %v6244_v38 = vpop.f32.mrb[160].mxu0  ;;  %3853 = vmatprep.mubr.bf16.mxu1 %v7358_v61  ;;  %v5609_v36 = vadd.f32 -1.0, %v3538_v44  ;;  %v5610_v49 = vadd.f32 -1.0, %v3539_v46 }
 0x5a2   : > { %v6245_v39 = vpop.f32.mrb[161].mxu0 }
 0x5a3   : > { %v6916_v42 = vpop.eup %6915  ;;  %6921 = vtanh.f32 %v3471_v37  ;;  %v6246_v43 = vadd.f32 %v6245_v39, %v6244_v38  ;;  %v6247_v45 = vpop.f32.mrb[162].mxu0 }
 0x5a4   : > { %v6248_v52 = vpop.f32.mrb[163].mxu0  ;;  %vm3596_vm2 = vcmp.gt.f32.partialorder %v6916_v42, %v5603_v40  ;;  %v5515_v40 = vld [vmem:[%s7671_s30 + $0x2a0] sm:$0xff] }
 0x5a5   : > { %v6918_v51 = vpop.eup %6917  ;;  %v3394_v53 = vadd.f32 %v8303_v31, %v6246_v43  ;;  %v6249_v59 = vadd.f32 %v6248_v52, %v6247_v45  ;;  %v3540_v47 = vmul.f32 2.0, %v5515_v40 }
 0x5a6   : > { %vm3597_vm3 = vcmp.gt.f32.partialorder %v6918_v51, %v5604_v41  ;;  %v5516_v41 = vld [vmem:[%s7671_s30 + $0x2a8] sm:$0xff] }
 0x5a7   : > { %v3472_v63 = vmul.f32 0.5, %v3394_v53  ;;  %v3397_v55 = vadd.f32 %v8303_v31, %v6249_v59  ;;  %vm5731_vm4 = vmpackc.low %vm3597_vm3, %vm3596_vm2  ;;  %v3541_v52 = vmul.f32 2.0, %v5516_v41 }
 0x5a8   : > { %5732 = vmatmul.mubr.msk.bf16.gmra.mrb[152].mxu1 %vm5731_vm4, %v7359_v57 }
 0x5a9   : > { %6923 = vtanh.f32 %v3472_v63  ;;  %v3473_v2 = vmul.f32 0.5, %v3397_v55  ;;  %v6250_v0 = vpop.f32.mrb[164].mxu0  ;;  %3863 = vmatprep.mubr.bf16.mxu1 %v7358_v61  ;;  %v5611_v63 = vadd.f32 -1.0, %v3540_v47  ;;  %v5612_v55 = vadd.f32 -1.0, %v3541_v52 }
 0x5aa   : > { %v6251_v1 = vpop.f32.mrb[165].mxu0 }
 0x5ab   : > { %v6920_v5 = vpop.eup %6919  ;;  %6925 = vtanh.f32 %v3473_v2  ;;  %v6252_v6 = vadd.f32 %v6251_v1, %v6250_v0  ;;  %v6253_v7 = vpop.f32.mrb[166].mxu0 }
 0x5ac   : > { %v6254_v10 = vpop.f32.mrb[167].mxu0  ;;  %vm3598_vm5 = vcmp.gt.f32.partialorder %v6920_v5, %v5605_v3  ;;  %v5517_v3 = vld [vmem:[%s7671_s30 + $0x2b0] sm:$0xff] }
 0x5ad   : > { %v6922_v11 = vpop.eup %6921  ;;  %v3402_v22 = vadd.f32 %v8303_v31, %v6252_v6  ;;  %v6255_v60 = vadd.f32 %v6254_v10, %v6253_v7  ;;  %v3542_v58 = vmul.f32 2.0, %v5517_v3 }
 0x5ae   : > { %vm3599_vm6 = vcmp.gt.f32.partialorder %v6922_v11, %v5606_v4  ;;  %v5518_v4 = vld [vmem:[%s7671_s30 + $0x2b8] sm:$0xff] }
 0x5af   : > { %v3474_v13 = vmul.f32 0.5, %v3402_v22  ;;  %v3405_v14 = vadd.f32 %v8303_v31, %v6255_v60  ;;  %vm5733_vm7 = vmpackc.low %vm3599_vm6, %vm3598_vm5  ;;  %v3543_v10 = vmul.f32 2.0, %v5518_v4 }
 0x5b0   : > { %5734 = vmatmul.mubr.msk.bf16.gmra.mrb[156].mxu1 %vm5733_vm7, %v7359_v57 }
 0x5b1   : > { %6927 = vtanh.f32 %v3474_v13  ;;  %v3475_v21 = vmul.f32 0.5, %v3405_v14  ;;  %v6256_v15 = vpop.f32.mrb[168].mxu0  ;;  %3873 = vmatprep.mubr.bf16.mxu1 %v7358_v61  ;;  %v5613_v13 = vadd.f32 -1.0, %v3542_v58  ;;  %v5614_v14 = vadd.f32 -1.0, %v3543_v10 }
 0x5b2   : > { %v6257_v24 = vpop.f32.mrb[169].mxu0 }
 0x5b3   : > { %v6924_v25 = vpop.eup %6923  ;;  %6929 = vtanh.f32 %v3475_v21  ;;  %v6258_v18 = vadd.f32 %v6257_v24, %v6256_v15  ;;  %v6259_v19 = vpop.f32.mrb[170].mxu0 }
 0x5b4   : > { %v6260_v27 = vpop.f32.mrb[171].mxu0  ;;  %vm3600_vm8 = vcmp.gt.f32.partialorder %v6924_v25, %v5607_v16  ;;  %v5519_v16 = vld [vmem:[%s7671_s30 + $0x2c0] sm:$0xff] }
 0x5b5   : > { %v6926_v28 = vpop.eup %6925  ;;  %v3410_v29 = vadd.f32 %v8303_v31, %v6258_v18  ;;  %v6261_v30 = vadd.f32 %v6260_v27, %v6259_v19  ;;  %v3544_v26 = vmul.f32 2.0, %v5519_v16 }
 0x5b6   : > { %vm3601_vm9 = vcmp.gt.f32.partialorder %v6926_v28, %v5608_v17  ;;  %v5520_v17 = vld [vmem:[%s7671_s30 + $0x2c8] sm:$0xff] }
 0x5b7   : > { %v3476_v32 = vmul.f32 0.5, %v3410_v29  ;;  %v3413_v33 = vadd.f32 %v8303_v31, %v6261_v30  ;;  %vm5735_vm10 = vmpackc.low %vm3601_vm9, %vm3600_vm8  ;;  %v3545_v27 = vmul.f32 2.0, %v5520_v17 }
 0x5b8   : > { %5736 = vmatmul.mubr.msk.bf16.gmra.mrb[160].mxu1 %vm5735_vm10, %v7359_v57 }
 0x5b9   : > { %6931 = vtanh.f32 %v3476_v32  ;;  %v3477_v34 = vmul.f32 0.5, %v3413_v33  ;;  %v6262_v48 = vpop.f32.mrb[172].mxu0  ;;  %3883 = vmatprep.mubr.bf16.mxu1 %v7358_v61  ;;  %v5615_v32 = vadd.f32 -1.0, %v3544_v26  ;;  %v5616_v33 = vadd.f32 -1.0, %v3545_v27 }
 0x5ba   : > { %v6263_v35 = vpop.f32.mrb[173].mxu0 }
 0x5bb   : > { %v6928_v37 = vpop.eup %6927  ;;  %6933 = vtanh.f32 %v3477_v34  ;;  %v6264_v38 = vadd.f32 %v6263_v35, %v6262_v48  ;;  %v6265_v39 = vpop.f32.mrb[174].mxu0 }
 0x5bc   : > { %v6266_v42 = vpop.f32.mrb[175].mxu0  ;;  %vm3602_vm11 = vcmp.gt.f32.partialorder %v6928_v37, %v5609_v36  ;;  %v5521_v36 = vld [vmem:[%s7671_s30 + $0x2d0] sm:$0xff] }
 0x5bd   : > { %v6930_v43 = vpop.eup %6929  ;;  %v3418_v45 = vadd.f32 %v8303_v31, %v6264_v38  ;;  %v6267_v50 = vadd.f32 %v6266_v42, %v6265_v39  ;;  %v3546_v41 = vmul.f32 2.0, %v5521_v36 }
 0x5be   : > { %vm3603_vm12 = vcmp.gt.f32.partialorder %v6930_v43, %v5610_v49  ;;  %v5522_v49 = vld [vmem:[%s7671_s30 + $0x2d8] sm:$0xff] }
 0x5bf   : > { %v3478_v51 = vmul.f32 0.5, %v3418_v45  ;;  %v3421_v53 = vadd.f32 %v8303_v31, %v6267_v50  ;;  %vm5737_vm13 = vmpackc.low %vm3603_vm12, %vm3602_vm11  ;;  %v3547_v42 = vmul.f32 2.0, %v5522_v49 }
 0x5c0   : > { %5738 = vmatmul.mubr.msk.bf16.gmra.mrb[164].mxu1 %vm5737_vm13, %v7359_v57 }
 0x5c1   : > { %6935 = vtanh.f32 %v3478_v51  ;;  %v3479_v59 = vmul.f32 0.5, %v3421_v53  ;;  %v6268_v62 = vpop.f32.mrb[176].mxu0  ;;  %3893 = vmatprep.mubr.bf16.mxu1 %v7358_v61  ;;  %v5617_v51 = vadd.f32 -1.0, %v3546_v41  ;;  %v5618_v53 = vadd.f32 -1.0, %v3547_v42 }
 0x5c2   : > { %v6269_v54 = vpop.f32.mrb[177].mxu0 }
 0x5c3   : > { %v6932_v2 = vpop.eup %6931  ;;  %6937 = vtanh.f32 %v3479_v59  ;;  %v6270_v0 = vadd.f32 %v6269_v54, %v6268_v62  ;;  %v6271_v1 = vpop.f32.mrb[178].mxu0 }
 0x5c4   : > { %v6272_v5 = vpop.f32.mrb[179].mxu0  ;;  %vm3604_vm14 = vcmp.gt.f32.partialorder %v6932_v2, %v5611_v63  ;;  %v5523_v63 = vld [vmem:[%s7671_s30 + $0x2e0] sm:$0xff] }
 0x5c5   : > { %v6934_v6 = vpop.eup %6933  ;;  %v3426_v7 = vadd.f32 %v8303_v31, %v6270_v0  ;;  %v6273_v8 = vadd.f32 %v6272_v5, %v6271_v1  ;;  %v3548_v4 = vmul.f32 2.0, %v5523_v63 }
 0x5c6   : > { %vm3605_vm15 = vcmp.gt.f32.partialorder %v6934_v6, %v5612_v55  ;;  %v5524_v55 = vld [vmem:[%s7671_s30 + $0x2e8] sm:$0xff] }
 0x5c7   : > { %v3480_v11 = vmul.f32 0.5, %v3426_v7  ;;  %v3429_v22 = vadd.f32 %v8303_v31, %v6273_v8  ;;  %vm5739_vm0 = vmpackc.low %vm3605_vm15, %vm3604_vm14  ;;  %v3549_v5 = vmul.f32 2.0, %v5524_v55  ;;  %v5619_v58 = vadd.f32 -1.0, %v3548_v4 }
 0x5c8   : > { %5740 = vmatmul.mubr.msk.bf16.gmra.mrb[168].mxu1 %vm5739_vm0, %v7359_v57 }
 0x5c9   : > { %6939 = vtanh.f32 %v3480_v11  ;;  %v3481_v60 = vmul.f32 0.5, %v3429_v22  ;;  %v6274_v12 = vpop.f32.mrb[180].mxu0  ;;  %3903 = vmatprep.mubr.bf16.mxu1 %v7358_v61  ;;  %v5620_v10 = vadd.f32 -1.0, %v3549_v5  ;;  %v5525_v22 = vld [vmem:[%s7671_s30 + $0x2f0] sm:$0xff] }
 0x5ca   : > { %v6275_v23 = vpop.f32.mrb[181].mxu0 }
 0x5cb   : > { %v6936_v21 = vpop.eup %6935  ;;  %6941 = vtanh.f32 %v3481_v60  ;;  %v6276_v15 = vadd.f32 %v6275_v23, %v6274_v12  ;;  %v6277_v24 = vpop.f32.mrb[182].mxu0  ;;  %v5526_v60 = vld [vmem:[%s7671_s30 + $0x2f8] sm:$0xff]  ;;  %v3550_v23 = vmul.f32 2.0, %v5525_v22 }
 0x5cc   : > { %v6278_v25 = vpop.f32.mrb[183].mxu0  ;;  %vm3606_vm1 = vcmp.gt.f32.partialorder %v6936_v21, %v5613_v13  ;;  %v3551_v13 = vmul.f32 2.0, %v5526_v60 }
 0x5cd   : > { %v6938_v18 = vpop.eup %6937  ;;  %v3434_v19 = vadd.f32 %v8303_v31, %v6276_v15  ;;  %v6279_v20 = vadd.f32 %v6278_v25, %v6277_v24 }
 0x5ce   : > { %vm3607_vm2 = vcmp.gt.f32.partialorder %v6938_v18, %v5614_v14  ;;  %v5622_v14 = vadd.f32 -1.0, %v3551_v13 }
 0x5cf   : > { %v3482_v28 = vmul.f32 0.5, %v3434_v19  ;;  %v3437_v29 = vadd.f32 %v8303_v31, %v6279_v20  ;;  %vm5741_vm3 = vmpackc.low %vm3607_vm2, %vm3606_vm1 }
 0x5d0   : > { %5742 = vmatmul.mubr.msk.bf16.gmra.mrb[172].mxu1 %vm5741_vm3, %v7359_v57 }
 0x5d1   : > { %6943 = vtanh.f32 %v3482_v28  ;;  %v3483_v30 = vmul.f32 0.5, %v3437_v29  ;;  %v6280_v44 = vpop.f32.mrb[184].mxu0  ;;  %3913 = vmatprep.mubr.bf16.mxu1 %v7358_v61  ;;  %v5655_v28 = vld [vmem:[%s7887_s10 + $0x400] sm:$0xff]  ;;  %v5656_v29 = vld [vmem:[%s7887_s10 + $0x408] sm:$0xff] }
 0x5d2   : > { %v6281_v46 = vpop.f32.mrb[185].mxu0 }
 0x5d3   : > { %v6940_v34 = vpop.eup %6939  ;;  %6945 = vtanh.f32 %v3483_v30  ;;  %v6282_v48 = vadd.f32 %v6281_v46, %v6280_v44  ;;  %v6283_v35 = vpop.f32.mrb[186].mxu0  ;;  %v5657_v44 = vld [vmem:[%s7887_s10 + $0x410] sm:$0xff]  ;;  %v4082_v46 = vmul.f32 2.0, %v5655_v28 }
 0x5d4   : > { %v6284_v37 = vpop.f32.mrb[187].mxu0  ;;  %vm3608_vm4 = vcmp.gt.f32.partialorder %v6940_v34, %v5615_v32  ;;  %v5658_v32 = vld [vmem:[%s7887_s10 + $0x418] sm:$0xff]  ;;  %v4083_v34 = vmul.f32 2.0, %v5656_v29  ;;  %v4084_v49 = vmul.f32 2.0, %v5657_v44 }
 0x5d5   : > { %v6942_v38 = vpop.eup %6941  ;;  %v3442_v39 = vadd.f32 %v8303_v31, %v6282_v48  ;;  %v6285_v40 = vadd.f32 %v6284_v37, %v6283_v35  ;;  %v5659_v48 = vld [vmem:[%s7887_s10 + $0x420] sm:$0xff] }
 0x5d6   : > { %vm3609_vm5 = vcmp.gt.f32.partialorder %v6942_v38, %v5616_v33 }
 0x5d7   : > { %v3484_v43 = vmul.f32 0.5, %v3442_v39  ;;  %v3445_v45 = vadd.f32 %v8303_v31, %v6285_v40  ;;  %vm5743_vm6 = vmpackc.low %vm3609_vm5, %vm3608_vm4  ;;  %v4085_v39 = vmul.f32 2.0, %v5658_v32 }
 0x5d8   : > { %5744 = vmatmul.mubr.msk.bf16.gmra.mrb[176].mxu1 %vm5743_vm6, %v7359_v57 }
 0x5d9   : > { %6947 = vtanh.f32 %v3484_v43  ;;  %v3485_v50 = vmul.f32 0.5, %v3445_v45  ;;  %v6286_v47 = vpop.f32.mrb[188].mxu0  ;;  %3923 = vmatprep.mubr.bf16.mxu1 %v7358_v61  ;;  %v5751_v43 = vadd.f32 -1.0, %v4082_v46  ;;  %v4086_v45 = vmul.f32 2.0, %v5659_v48 }
 0x5da   : > { %v6287_v52 = vpop.f32.mrb[189].mxu0 }
 0x5db   : > { %v6944_v59 = vpop.eup %6943  ;;  %6949 = vtanh.f32 %v3485_v50  ;;  %v6288_v62 = vadd.f32 %v6287_v52, %v6286_v47  ;;  %v6289_v54 = vpop.f32.mrb[190].mxu0  ;;  %v5660_v50 = vld [vmem:[%s7887_s10 + $0x428] sm:$0xff]  ;;  %v5755_v4 = vadd.f32 -1.0, %v4086_v45 }
 0x5dc   : > { %v6290_v2 = vpop.f32.mrb[191].mxu0  ;;  %vm3610_vm7 = vcmp.gt.f32.partialorder %v6944_v59, %v5617_v51  ;;  %v5752_v51 = vadd.f32 -1.0, %v4083_v34 }
 0x5dd   : > { %v6946_v0 = vpop.eup %6945  ;;  %v3450_v1 = vadd.f32 %v8303_v31, %v6288_v62  ;;  %v6291_v3 = vadd.f32 %v6290_v2, %v6289_v54  ;;  %v5753_v62 = vadd.f32 -1.0, %v4084_v49  ;;  %v5662_v54 = vld [vmem:[%s7887_s10 + $0x438] sm:$0xff]  ;;  %v5754_v2 = vadd.f32 -1.0, %v4085_v39 }
 0x5de   : > { %vm3611_vm8 = vcmp.gt.f32.partialorder %v6946_v0, %v5618_v53  ;;  %v5661_v53 = vld [vmem:[%s7887_s10 + $0x430] sm:$0xff]  ;;  %v4087_v0 = vmul.f32 2.0, %v5660_v50 }
 0x5df   : > { %v3486_v6 = vmul.f32 0.5, %v3450_v1  ;;  %v3453_v7 = vadd.f32 %v8303_v31, %v6291_v3  ;;  %vm5745_vm9 = vmpackc.low %vm3611_vm8, %vm3610_vm7  ;;  %v5621_v31 = vadd.f32 -1.0, %v3550_v23  ;;  %v5663_v1 = vld [vmem:[%s7887_s10 + $0x440] sm:$0xff]  ;;  %v4088_v5 = vmul.f32 2.0, %v5661_v53 }
 0x5e0   : > { %5746 = vmatmul.mubr.msk.bf16.gmra.mrb[180].mxu1 %vm5745_vm9, %v7359_v57  ;;  %v4090_v23 = vmul.f32 2.0, %v5663_v1 }
 0x5e1   : > { %6951 = vtanh.f32 %v3486_v6  ;;  %v3487_v8 = vmul.f32 0.5, %v3453_v7  ;;  %3933 = vmatprep.mubr.bf16.mxu1 %v7358_v61  ;;  %v5757_v28 = vadd.f32 -1.0, %v4088_v5 }
 0x5e2   : > { %v5759_v46 = vadd.f32 -1.0, %v4090_v23 }
 0x5e3   : > { %v6948_v11 = vpop.eup %6947  ;;  %6953 = vtanh.f32 %v3487_v8  ;;  %v7360_v8 = vmov 0.0  }
 0x5e4   : > { %vm3612_vm10 = vcmp.gt.f32.partialorder %v6948_v11, %v5619_v58 }
 0x5e5   : > { %v6950_v12 = vpop.eup %6949 }
 0x5e6   : > { %vm3613_vm11 = vcmp.gt.f32.partialorder %v6950_v12, %v5620_v10  ;;  %v4089_v10 = vmul.f32 2.0, %v5662_v54 }
 0x5e7   : > { %vm5747_vm12 = vmpackc.low %vm3613_vm11, %vm3612_vm10 }
 0x5e8   : > { %5748 = vmatmul.mubr.msk.bf16.gmra.mrb[184].mxu1 %vm5747_vm12, %v7359_v57  ;;  %v5758_v44 = vadd.f32 -1.0, %v4089_v10  ;;  %v5671_v10 = vld [vmem:[%s7887_s10 + $0x480] sm:$0xff] }
 0x5e9   : > { %3943 = vmatprep.mubr.bf16.mxu1 %v7358_v61 }
 0x5eb   : > { %v6952_v21 = vpop.eup %6951 }
 0x5ec   : > { %vm3614_vm13 = vcmp.gt.f32.partialorder %v6952_v21, %v5621_v31 }
 0x5ed   : > { %v6954_v15 = vpop.eup %6953 }
 0x5ee   : > { %vm3615_vm14 = vcmp.gt.f32.partialorder %v6954_v15, %v5622_v14 }
 0x5ef   : > { %vm5749_vm15 = vmpackc.low %vm3615_vm14, %vm3614_vm13 }
 0x5f0   : > { %5750 = vmatmul.mubr.msk.bf16.gmra.mrb[188].mxu1 %vm5749_vm15, %v7359_v57 }
 0x64b   : > { %v3795_v24 = vpop.f32.mrb[128].mxu1 }
 0x64c   : > { %v3796_v16 = vadd.f32 %v3795_v24, %v7878_v56  ;;  %v3797_v17 = vpop.f32.mrb[129].mxu1 }
 0x64d   : > { %v3798_v25 = vadd.f32 %v3797_v17, %v7880_v9  ;;  %v3799_v61 = vpop.f32.mrb[130].mxu1  ;;  %v5664_v17 = vld [vmem:[%s7887_s10 + $0x448] sm:$0xff] }
 0x64e   : > { %v3954_v18 = vmul.f32 0.5, %v3796_v16  ;;  %v3800_v19 = vadd.f32 %v3799_v61, %v7878_v56  ;;  %v3801_v20 = vpop.f32.mrb[131].mxu1  ;;  %v4091_v32 = vmul.f32 2.0, %v5664_v17 }
 0x64f   : > { %v3955_v26 = vmul.f32 0.5, %v3798_v25  ;;  %v3802_v27 = vadd.f32 %v3801_v20, %v7880_v9  ;;  %v5756_v20 = vadd.f32 -1.0, %v4087_v0  ;;  %v5669_v0 = vld [vmem:[%s7887_s10 + $0x470] sm:$0xff] }
 0x650   : > { %6955 = vtanh.f32 %v3954_v18  ;;  %v3956_v57 = vmul.f32 0.5, %v3800_v19 }
 0x651   : > { %6957 = vtanh.f32 %v3955_v26  ;;  %v3957_v30 = vmul.f32 0.5, %v3802_v27  ;;  %v5665_v26 = vld [vmem:[%s7887_s10 + $0x450] sm:$0xff]  ;;  %v5666_v27 = vld [vmem:[%s7887_s10 + $0x458] sm:$0xff] }
 0x652   : > { %6959 = vtanh.f32 %v3956_v57  ;;  %v4092_v48 = vmul.f32 2.0, %v5665_v26 }
 0x653   : > { %6961 = vtanh.f32 %v3957_v30  ;;  %v3805_v33 = vpop.f32.mrb[132].mxu1 }
 0x654   : > { %v3806_v35 = vadd.f32 %v3805_v33, %v7878_v56  ;;  %v3807_v36 = vpop.f32.mrb[133].mxu1  ;;  %v5667_v33 = vld [vmem:[%s7887_s10 + $0x460] sm:$0xff]  ;;  %v5761_v5 = vadd.f32 -1.0, %v4092_v48 }
 0x655   : > { %v3808_v37 = vadd.f32 %v3807_v36, %v7880_v9  ;;  %v3809_v38 = vpop.f32.mrb[134].mxu1 }
 0x656   : > { %v3958_v40 = vmul.f32 0.5, %v3806_v35  ;;  %v3810_v41 = vadd.f32 %v3809_v38, %v7878_v56  ;;  %v3811_v42 = vpop.f32.mrb[135].mxu1  ;;  %v4093_v35 = vmul.f32 2.0, %v5666_v27 }
 0x657   : > { %v3959_v47 = vmul.f32 0.5, %v3808_v37  ;;  %v3812_v52 = vadd.f32 %v3811_v42, %v7880_v9  ;;  %v4094_v42 = vmul.f32 2.0, %v5667_v33 }
 0x658   : > { %6963 = vtanh.f32 %v3958_v40  ;;  %v3960_v59 = vmul.f32 0.5, %v3810_v41 }
 0x659   : > { %6965 = vtanh.f32 %v3959_v47  ;;  %v3961_v63 = vmul.f32 0.5, %v3812_v52 }
 0x65a   : > { %v6956_v55 = vpop.eup %6955  ;;  %6967 = vtanh.f32 %v3960_v59  ;;  %v5668_v59 = vld [vmem:[%s7887_s10 + $0x468] sm:$0xff] }
 0x65b   : > { %v6958_v3 = vpop.eup %6957  ;;  %vm4210_vm0 = vcmp.gt.f32.partialorder %v6956_v55, %v5751_v43  ;;  %6969 = vtanh.f32 %v3961_v63  ;;  %v3815_v6 = vpop.f32.mrb[136].mxu1 }
 0x65c   : > { %v6960_v7 = vpop.eup %6959  ;;  %v5815_v58 = vsel %vm4210_vm0, 1.0, %v7360_v8  ;;  %vm4211_vm1 = vcmp.gt.f32.partialorder %v6958_v3, %v5752_v51  ;;  %v3816_v11 = vadd.f32 %v3815_v6, %v7878_v56  ;;  %v3817_v22 = vpop.f32.mrb[137].mxu1  ;;  %v5762_v6 = vadd.f32 -1.0, %v4093_v35 }
 0x65d   : > { %v6962_v60 = vpop.eup %6961  ;;  %v5816_v12 = vsel %vm4211_vm1, 1.0, %v7360_v8  ;;  %vm4212_vm2 = vcmp.gt.f32.partialorder %v6960_v7, %v5753_v62  ;;  %v3818_v13 = vadd.f32 %v3817_v22, %v7880_v9  ;;  %v3819_v31 = vpop.f32.mrb[138].mxu1  ;;  %v4095_v7 = vmul.f32 2.0, %v5668_v59 }
 0x65e   : > { %v5922_v14 = vpack.c.bf16 %v5816_v12, %v5815_v58  ;;  %v5817_v21 = vsel %vm4212_vm2, 1.0, %v7360_v8  ;;  %vm4213_vm3 = vcmp.gt.f32.partialorder %v6962_v60, %v5754_v2  ;;  %v3962_v15 = vmul.f32 0.5, %v3816_v11  ;;  %v3821_v24 = vpop.f32.mrb[139].mxu1  ;;  %v5670_v58 = vld [vmem:[%s7887_s10 + $0x478] sm:$0xff] }
 0x65f   : > { %v5818_v16 = vsel %vm4213_vm3, 1.0, %v7360_v8  ;;  %v3963_v25 = vmul.f32 0.5, %v3818_v13  ;;  %v3820_v61 = vadd.f32 %v3819_v31, %v7878_v56  ;;  %v3822_v18 = vadd.f32 %v3821_v24, %v7880_v9 }
 0x660   : > { %4594 = vst [vmem:[%s8428_s22] sm:$0xff] %v5922_v14  ;;  %v5923_v19 = vpack.c.bf16 %v5818_v16, %v5817_v21  ;;  %6971 = vtanh.f32 %v3962_v15  ;;  %v5760_v2 = vadd.f32 -1.0, %v4091_v32  ;;  %v5763_v22 = vadd.f32 -1.0, %v4094_v42  ;;  %v5673_v32 = vld [vmem:[%s7887_s10 + $0x490] sm:$0xff] }
 0x661   : > { %6973 = vtanh.f32 %v3963_v25  ;;  %v3964_v57 = vmul.f32 0.5, %v3820_v61  ;;  %v3965_v29 = vmul.f32 0.5, %v3822_v18  ;;  %v4096_v60 = vmul.f32 2.0, %v5669_v0 }
 0x662   : > { %v6964_v30 = vpop.eup %6963  ;;  %4595 = vst [vmem:[%s8428_s22 + $0x8] sm:$0xff] %v5923_v19  ;;  %v4097_v15 = vmul.f32 2.0, %v5670_v58  ;;  %v4098_v24 = vmul.f32 2.0, %v5671_v10  ;;  %v4100_v42 = vmul.f32 2.0, %v5673_v32  ;;  %v5680_v32 = vld [vmem:[%s7887_s10 + $0x4c8] sm:$0xff] }
 0x663   : > { %v6966_v34 = vpop.eup %6965  ;;  %vm4214_vm4 = vcmp.gt.f32.partialorder %v6964_v30, %v5755_v4  ;;  %6975 = vtanh.f32 %v3964_v57  ;;  %v3825_v36 = vpop.f32.mrb[140].mxu1  ;;  %v5672_v30 = vld [vmem:[%s7887_s10 + $0x488] sm:$0xff]  ;;  %v5765_v48 = vadd.f32 -1.0, %v4096_v60 }
 0x664   : > { %v6968_v49 = vpop.eup %6967  ;;  %v5819_v37 = vsel %vm4214_vm4, 1.0, %v7360_v8  ;;  %vm4215_vm5 = vcmp.gt.f32.partialorder %v6966_v34, %v5756_v20  ;;  %6977 = vtanh.f32 %v3965_v29  ;;  %v3826_v38 = vadd.f32 %v3825_v36, %v7878_v56  ;;  %v3827_v39 = vpop.f32.mrb[141].mxu1  ;;  %v5674_v36 = vld [vmem:[%s7887_s10 + $0x498] sm:$0xff] }
 0x665   : > { %v6970_v40 = vpop.eup %6969  ;;  %v5820_v41 = vsel %vm4215_vm5, 1.0, %v7360_v8  ;;  %vm4216_vm6 = vcmp.gt.f32.partialorder %v6968_v49, %v5757_v28  ;;  %v3828_v43 = vadd.f32 %v3827_v39, %v7880_v9  ;;  %v3829_v45 = vpop.f32.mrb[142].mxu1  ;;  %v5764_v29 = vadd.f32 -1.0, %v4095_v7  ;;  %v5675_v49 = vld [vmem:[%s7887_s10 + $0x4a0] sm:$0xff]  ;;  %v5677_v7 = vld [vmem:[%s7887_s10 + $0x4b0] sm:$0xff] }
 0x666   : > { %v5924_v50 = vpack.c.bf16 %v5820_v41, %v5819_v37  ;;  %v5821_v47 = vsel %vm4216_vm6, 1.0, %v7360_v8  ;;  %vm4217_vm7 = vcmp.gt.f32.partialorder %v6970_v40, %v5758_v44  ;;  %v3966_v52 = vmul.f32 0.5, %v3826_v38  ;;  %v3831_v51 = vpop.f32.mrb[143].mxu1 }
 0x667   : > { %v5822_v53 = vsel %vm4217_vm7, 1.0, %v7360_v8  ;;  %v3967_v62 = vmul.f32 0.5, %v3828_v43  ;;  %v3830_v54 = vadd.f32 %v3829_v45, %v7878_v56  ;;  %v3832_v63 = vadd.f32 %v3831_v51, %v7880_v9 }
 0x668   : > { %4596 = vst [vmem:[%s8428_s22 + $0x10] sm:$0xff] %v5924_v50  ;;  %v5925_v55 = vpack.c.bf16 %v5822_v53, %v5821_v47  ;;  %6979 = vtanh.f32 %v3966_v52  ;;  %v5766_v35 = vadd.f32 -1.0, %v4097_v15  ;;  %v5767_v38 = vadd.f32 -1.0, %v4098_v24 }
 0x669   : > { %6981 = vtanh.f32 %v3967_v62  ;;  %v3968_v1 = vmul.f32 0.5, %v3830_v54  ;;  %v3969_v3 = vmul.f32 0.5, %v3832_v63  ;;  %v4099_v39 = vmul.f32 2.0, %v5672_v30 }
 0x66a   : > { %v6972_v4 = vpop.eup %6971  ;;  %4597 = vst [vmem:[%s8428_s22 + $0x18] sm:$0xff] %v5925_v55  ;;  %v4101_v52 = vmul.f32 2.0, %v5674_v36  ;;  %v4102_v51 = vmul.f32 2.0, %v5675_v49  ;;  %v4104_v15 = vmul.f32 2.0, %v5677_v7  ;;  %v5681_v49 = vld [vmem:[%s7887_s10 + $0x4d0] sm:$0xff] }
 0x66b   : > { %v6974_v11 = vpop.eup %6973  ;;  %vm4218_vm8 = vcmp.gt.f32.partialorder %v6972_v4, %v5759_v46  ;;  %6983 = vtanh.f32 %v3968_v1  ;;  %v3835_v12 = vpop.f32.mrb[144].mxu1  ;;  %v5676_v1 = vld [vmem:[%s7887_s10 + $0x4a8] sm:$0xff] }
 0x66c   : > { %v5823_v23 = vsel %vm4218_vm8, 1.0, %v7360_v8  ;;  %vm4219_vm9 = vcmp.gt.f32.partialorder %v6974_v11, %v5760_v2  ;;  %6985 = vtanh.f32 %v3969_v3  ;;  %v3836_v13 = vadd.f32 %v3835_v12, %v7878_v56  ;;  %v3837_v31 = vpop.f32.mrb[145].mxu1 }
 0x66d   : > { %v6976_v14 = vpop.eup %6975  ;;  %v5824_v21 = vsel %vm4219_vm9, 1.0, %v7360_v8  ;;  %v3838_v16 = vadd.f32 %v3837_v31, %v7880_v9  ;;  %v3839_v17 = vpop.f32.mrb[146].mxu1  ;;  %v5769_v11 = vadd.f32 -1.0, %v4100_v42  ;;  %v5679_v31 = vld [vmem:[%s7887_s10 + $0x4c0] sm:$0xff] }
 0x66e   : > { %v6978_v25 = vpop.eup %6977  ;;  %v5926_v61 = vpack.c.bf16 %v5824_v21, %v5823_v23  ;;  %vm4220_vm10 = vcmp.gt.f32.partialorder %v6976_v14, %v5761_v5  ;;  %v3970_v18 = vmul.f32 0.5, %v3836_v13  ;;  %v3840_v19 = vadd.f32 %v3839_v17, %v7878_v56  ;;  %v3841_v20 = vpop.f32.mrb[147].mxu1 }
 0x66f   : > { %v5825_v26 = vsel %vm4220_vm10, 1.0, %v7360_v8  ;;  %vm4221_vm11 = vcmp.gt.f32.partialorder %v6978_v25, %v5762_v6  ;;  %v3971_v27 = vmul.f32 0.5, %v3838_v16  ;;  %v3842_v28 = vadd.f32 %v3841_v20, %v7880_v9 }
 0x670   : > { %4598 = vst [vmem:[%s8428_s22 + $0x20] sm:$0xff] %v5926_v61  ;;  %v5826_v57 = vsel %vm4221_vm11, 1.0, %v7360_v8  ;;  %6987 = vtanh.f32 %v3970_v18  ;;  %v3972_v44 = vmul.f32 0.5, %v3840_v19  ;;  %v5768_v6 = vadd.f32 -1.0, %v4099_v39 }
 0x671   : > { %v5927_v46 = vpack.c.bf16 %v5826_v57, %v5825_v26  ;;  %6989 = vtanh.f32 %v3971_v27  ;;  %v3973_v33 = vmul.f32 0.5, %v3842_v28  ;;  %v5770_v23 = vadd.f32 -1.0, %v4101_v52 }
 0x672   : > { %v6980_v34 = vpop.eup %6979  ;;  %6991 = vtanh.f32 %v3972_v44  ;;  %v4103_v13 = vmul.f32 2.0, %v5676_v1  ;;  %v5771_v21 = vadd.f32 -1.0, %v4102_v51  ;;  %v4106_v26 = vmul.f32 2.0, %v5679_v31 }
 0x673   : > { %v6982_v37 = vpop.eup %6981  ;;  %4599 = vst [vmem:[%s8428_s22 + $0x28] sm:$0xff] %v5927_v46  ;;  %vm4222_vm12 = vcmp.gt.f32.partialorder %v6980_v34, %v5763_v22  ;;  %6993 = vtanh.f32 %v3973_v33  ;;  %v3845_v40 = vpop.f32.mrb[148].mxu1  ;;  %v5678_v22 = vld [vmem:[%s7887_s10 + $0x4b8] sm:$0xff]  ;;  %v4108_v52 = vmul.f32 2.0, %v5681_v49 }
 0x674   : > { %v5827_v41 = vsel %vm4222_vm12, 1.0, %v7360_v8  ;;  %vm4223_vm13 = vcmp.gt.f32.partialorder %v6982_v37, %v5764_v29  ;;  %v3846_v43 = vadd.f32 %v3845_v40, %v7878_v56  ;;  %v3847_v45 = vpop.f32.mrb[149].mxu1  ;;  %v4105_v25 = vmul.f32 2.0, %v5678_v22  ;;  %v5682_v37 = vld [vmem:[%s7887_s10 + $0x4d8] sm:$0xff] }
 0x675   : > { %v6984_v50 = vpop.eup %6983  ;;  %v5828_v47 = vsel %vm4223_vm13, 1.0, %v7360_v8  ;;  %v3848_v53 = vadd.f32 %v3847_v45, %v7880_v9  ;;  %v3849_v59 = vpop.f32.mrb[150].mxu1  ;;  %v5772_v36 = vadd.f32 -1.0, %v4103_v13  ;;  %v4107_v45 = vmul.f32 2.0, %v5680_v32  ;;  %v5685_v13 = vld [vmem:[%s7887_s10 + $0x4f0] sm:$0xff] }
 0x676   : > { %v6986_v62 = vpop.eup %6985  ;;  %v5928_v54 = vpack.c.bf16 %v5828_v47, %v5827_v41  ;;  %vm4224_vm14 = vcmp.gt.f32.partialorder %v6984_v50, %v5765_v48  ;;  %v3974_v63 = vmul.f32 0.5, %v3846_v43  ;;  %v3850_v55 = vadd.f32 %v3849_v59, %v7878_v56  ;;  %v3851_v2 = vpop.f32.mrb[151].mxu1  ;;  %v5683_v50 = vld [vmem:[%s7887_s10 + $0x4e0] sm:$0xff] }
 0x677   : > { %v5829_v0 = vsel %vm4224_vm14, 1.0, %v7360_v8  ;;  %vm4225_vm15 = vcmp.gt.f32.partialorder %v6986_v62, %v5766_v35  ;;  %v3975_v3 = vmul.f32 0.5, %v3848_v53  ;;  %v3852_v4 = vadd.f32 %v3851_v2, %v7880_v9 }
 0x678   : > { %4600 = vst [vmem:[%s8428_s22 + $0x30] sm:$0xff] %v5928_v54  ;;  %v5830_v5 = vsel %vm4225_vm15, 1.0, %v7360_v8  ;;  %6995 = vtanh.f32 %v3974_v63  ;;  %v3976_v58 = vmul.f32 0.5, %v3850_v55  ;;  %v5774_v42 = vadd.f32 -1.0, %v4105_v25  ;;  %v5687_v25 = vld [vmem:[%s7887_s10 + $0x500] sm:$0xff] }
 0x679   : > { %v5929_v10 = vpack.c.bf16 %v5830_v5, %v5829_v0  ;;  %6997 = vtanh.f32 %v3975_v3  ;;  %v3977_v60 = vmul.f32 0.5, %v3852_v4  ;;  %v5775_v43 = vadd.f32 -1.0, %v4106_v26 }
 0x67a   : > { %v6988_v12 = vpop.eup %6987  ;;  %6999 = vtanh.f32 %v3976_v58  ;;  %v4109_v51 = vmul.f32 2.0, %v5682_v37  ;;  %v4110_v0 = vmul.f32 2.0, %v5683_v50 }
 0x67b   : > { %v6990_v14 = vpop.eup %6989  ;;  %4601 = vst [vmem:[%s8428_s22 + $0x38] sm:$0xff] %v5929_v10  ;;  %vm4226_vm0 = vcmp.gt.f32.partialorder %v6988_v12, %v5767_v38  ;;  %7001 = vtanh.f32 %v3977_v60  ;;  %v3855_v24 = vpop.f32.mrb[152].mxu1  ;;  %v5773_v38 = vadd.f32 -1.0, %v4104_v15  ;;  %v5684_v10 = vld [vmem:[%s7887_s10 + $0x4e8] sm:$0xff]  ;;  %v5777_v15 = vadd.f32 -1.0, %v4108_v52 }
 0x67c   : > { %v6992_v16 = vpop.eup %6991  ;;  %v5831_v17 = vsel %vm4226_vm0, 1.0, %v7360_v8  ;;  %vm4227_vm1 = vcmp.gt.f32.partialorder %v6990_v14, %v5768_v6  ;;  %v3856_v61 = vadd.f32 %v3855_v24, %v7878_v56  ;;  %v3857_v18 = vpop.f32.mrb[153].mxu1  ;;  %v5778_v24 = vadd.f32 -1.0, %v4109_v51 }
 0x67d   : > { %v6994_v19 = vpop.eup %6993  ;;  %v5832_v20 = vsel %vm4227_vm1, 1.0, %v7360_v8  ;;  %vm4228_vm2 = vcmp.gt.f32.partialorder %v6992_v16, %v5769_v11  ;;  %v3858_v27 = vadd.f32 %v3857_v18, %v7880_v9  ;;  %v3859_v28 = vpop.f32.mrb[154].mxu1  ;;  %v4111_v16 = vmul.f32 2.0, %v5684_v10 }
 0x67e   : > { %v5930_v57 = vpack.c.bf16 %v5832_v20, %v5831_v17  ;;  %v5833_v29 = vsel %vm4228_vm2, 1.0, %v7360_v8  ;;  %vm4229_vm3 = vcmp.gt.f32.partialorder %v6994_v19, %v5770_v23  ;;  %v3978_v30 = vmul.f32 0.5, %v3856_v61  ;;  %v3861_v44 = vpop.f32.mrb[155].mxu1  ;;  %v5686_v17 = vld [vmem:[%s7887_s10 + $0x4f8] sm:$0xff] }
 0x67f   : > { %v5834_v46 = vsel %vm4229_vm3, 1.0, %v7360_v8  ;;  %v3979_v33 = vmul.f32 0.5, %v3858_v27  ;;  %v3860_v34 = vadd.f32 %v3859_v28, %v7878_v56  ;;  %v3862_v48 = vadd.f32 %v3861_v44, %v7880_v9 }
 0x680   : > { %4602 = vst [vmem:[%s8428_s22 + $0x40] sm:$0xff] %v5930_v57  ;;  %v5931_v35 = vpack.c.bf16 %v5834_v46, %v5833_v29  ;;  %7003 = vtanh.f32 %v3978_v30  ;;  %v5776_v23 = vadd.f32 -1.0, %v4107_v45  ;;  %v5779_v18 = vadd.f32 -1.0, %v4110_v0  ;;  %v5689_v45 = vld [vmem:[%s7887_s10 + $0x510] sm:$0xff] }
 0x681   : > { %7005 = vtanh.f32 %v3979_v33  ;;  %v3980_v39 = vmul.f32 0.5, %v3860_v34  ;;  %v3981_v40 = vmul.f32 0.5, %v3862_v48  ;;  %v4112_v19 = vmul.f32 2.0, %v5685_v13 }
 0x682   : > { %v6996_v41 = vpop.eup %6995  ;;  %4603 = vst [vmem:[%s8428_s22 + $0x48] sm:$0xff] %v5931_v35  ;;  %v4113_v30 = vmul.f32 2.0, %v5686_v17  ;;  %v4114_v44 = vmul.f32 2.0, %v5687_v25  ;;  %v4116_v0 = vmul.f32 2.0, %v5689_v45  ;;  %v5696_v45 = vld [vmem:[%s7887_s10 + $0x548] sm:$0xff] }
 0x683   : > { %v6998_v47 = vpop.eup %6997  ;;  %vm4230_vm4 = vcmp.gt.f32.partialorder %v6996_v41, %v5771_v21  ;;  %7007 = vtanh.f32 %v3980_v39  ;;  %v3865_v53 = vpop.f32.mrb[156].mxu1  ;;  %v5688_v41 = vld [vmem:[%s7887_s10 + $0x508] sm:$0xff]  ;;  %v5781_v52 = vadd.f32 -1.0, %v4112_v19 }
 0x684   : > { %v7000_v59 = vpop.eup %6999  ;;  %v5835_v62 = vsel %vm4230_vm4, 1.0, %v7360_v8  ;;  %vm4231_vm5 = vcmp.gt.f32.partialorder %v6998_v47, %v5772_v36  ;;  %7009 = vtanh.f32 %v3981_v40  ;;  %v3866_v54 = vadd.f32 %v3865_v53, %v7878_v56  ;;  %v3867_v63 = vpop.f32.mrb[157].mxu1  ;;  %v5690_v53 = vld [vmem:[%s7887_s10 + $0x518] sm:$0xff] }
 0x685   : > { %v7002_v55 = vpop.eup %7001  ;;  %v5836_v2 = vsel %vm4231_vm5, 1.0, %v7360_v8  ;;  %vm4232_vm6 = vcmp.gt.f32.partialorder %v7000_v59, %v5773_v38  ;;  %v3868_v1 = vadd.f32 %v3867_v63, %v7880_v9  ;;  %v3869_v3 = vpop.f32.mrb[158].mxu1  ;;  %v5780_v40 = vadd.f32 -1.0, %v4111_v16  ;;  %v5691_v59 = vld [vmem:[%s7887_s10 + $0x520] sm:$0xff]  ;;  %v5693_v16 = vld [vmem:[%s7887_s10 + $0x530] sm:$0xff] }
 0x686   : > { %v5932_v4 = vpack.c.bf16 %v5836_v2, %v5835_v62  ;;  %v5837_v5 = vsel %vm4232_vm6, 1.0, %v7360_v8  ;;  %vm4233_vm7 = vcmp.gt.f32.partialorder %v7002_v55, %v5774_v42  ;;  %v3982_v6 = vmul.f32 0.5, %v3866_v54  ;;  %v3871_v7 = vpop.f32.mrb[159].mxu1 }
 0x687   : > { %v5838_v58 = vsel %vm4233_vm7, 1.0, %v7360_v8  ;;  %v3983_v11 = vmul.f32 0.5, %v3868_v1  ;;  %v3870_v22 = vadd.f32 %v3869_v3, %v7878_v56  ;;  %v3872_v60 = vadd.f32 %v3871_v7, %v7880_v9 }
 0x688   : > { %4604 = vst [vmem:[%s8428_s22 + $0x50] sm:$0xff] %v5932_v4  ;;  %v5933_v12 = vpack.c.bf16 %v5838_v58, %v5837_v5  ;;  %7011 = vtanh.f32 %v3982_v6  ;;  %v5782_v51 = vadd.f32 -1.0, %v4113_v30  ;;  %v5783_v54 = vadd.f32 -1.0, %v4114_v44 }
 0x689   : > { %7013 = vtanh.f32 %v3983_v11  ;;  %v3984_v31 = vmul.f32 0.5, %v3870_v22  ;;  %v3985_v14 = vmul.f32 0.5, %v3872_v60  ;;  %v4115_v63 = vmul.f32 2.0, %v5688_v41 }
 0x68a   : > { %v7004_v21 = vpop.eup %7003  ;;  %4605 = vst [vmem:[%s8428_s22 + $0x58] sm:$0xff] %v5933_v12  ;;  %v4117_v6 = vmul.f32 2.0, %v5690_v53  ;;  %v4118_v7 = vmul.f32 2.0, %v5691_v59  ;;  %v4120_v30 = vmul.f32 2.0, %v5693_v16  ;;  %v5697_v59 = vld [vmem:[%s7887_s10 + $0x550] sm:$0xff] }
 0x68b   : > { %v7006_v61 = vpop.eup %7005  ;;  %vm4234_vm8 = vcmp.gt.f32.partialorder %v7004_v21, %v5775_v43  ;;  %7015 = vtanh.f32 %v3984_v31  ;;  %v3875_v20 = vpop.f32.mrb[160].mxu1  ;;  %v5692_v31 = vld [vmem:[%s7887_s10 + $0x528] sm:$0xff] }
 0x68c   : > { %v5839_v26 = vsel %vm4234_vm8, 1.0, %v7360_v8  ;;  %vm4235_vm9 = vcmp.gt.f32.partialorder %v7006_v61, %v5776_v23  ;;  %7017 = vtanh.f32 %v3985_v14  ;;  %v3876_v27 = vadd.f32 %v3875_v20, %v7878_v56  ;;  %v3877_v28 = vpop.f32.mrb[161].mxu1 }
 0x68d   : > { %v7008_v57 = vpop.eup %7007  ;;  %v5840_v29 = vsel %vm4235_vm9, 1.0, %v7360_v8  ;;  %v3878_v46 = vadd.f32 %v3877_v28, %v7880_v9  ;;  %v3879_v32 = vpop.f32.mrb[162].mxu1  ;;  %v5785_v61 = vadd.f32 -1.0, %v4116_v0  ;;  %v5695_v28 = vld [vmem:[%s7887_s10 + $0x540] sm:$0xff] }
 0x68e   : > { %v7010_v33 = vpop.eup %7009  ;;  %v5934_v34 = vpack.c.bf16 %v5840_v29, %v5839_v26  ;;  %vm4236_vm10 = vcmp.gt.f32.partialorder %v7008_v57, %v5777_v15  ;;  %v3986_v48 = vmul.f32 0.5, %v3876_v27  ;;  %v3880_v35 = vadd.f32 %v3879_v32, %v7878_v56  ;;  %v3881_v36 = vpop.f32.mrb[163].mxu1 }
 0x68f   : > { %v5841_v49 = vsel %vm4236_vm10, 1.0, %v7360_v8  ;;  %vm4237_vm11 = vcmp.gt.f32.partialorder %v7010_v33, %v5778_v24  ;;  %v3987_v37 = vmul.f32 0.5, %v3878_v46  ;;  %v3882_v38 = vadd.f32 %v3881_v36, %v7880_v9 }
 0x690   : > { %4606 = vst [vmem:[%s8428_s22 + $0x60] sm:$0xff] %v5934_v34  ;;  %v5842_v39 = vsel %vm4237_vm11, 1.0, %v7360_v8  ;;  %7019 = vtanh.f32 %v3986_v48  ;;  %v3988_v42 = vmul.f32 0.5, %v3880_v35  ;;  %v5784_v24 = vadd.f32 -1.0, %v4115_v63 }
 0x691   : > { %v5935_v43 = vpack.c.bf16 %v5842_v39, %v5841_v49  ;;  %7021 = vtanh.f32 %v3987_v37  ;;  %v3989_v50 = vmul.f32 0.5, %v3882_v38  ;;  %v5786_v26 = vadd.f32 -1.0, %v4117_v6 }
 0x692   : > { %v7012_v47 = vpop.eup %7011  ;;  %7023 = vtanh.f32 %v3988_v42  ;;  %v4119_v27 = vmul.f32 2.0, %v5692_v31  ;;  %v5787_v29 = vadd.f32 -1.0, %v4118_v7  ;;  %v4122_v49 = vmul.f32 2.0, %v5695_v28 }
 0x693   : > { %v7014_v62 = vpop.eup %7013  ;;  %4607 = vst [vmem:[%s8428_s22 + $0x68] sm:$0xff] %v5935_v43  ;;  %vm4238_vm12 = vcmp.gt.f32.partialorder %v7012_v47, %v5779_v18  ;;  %7025 = vtanh.f32 %v3989_v50  ;;  %v3885_v55 = vpop.f32.mrb[164].mxu1  ;;  %v5694_v18 = vld [vmem:[%s7887_s10 + $0x538] sm:$0xff]  ;;  %v4124_v6 = vmul.f32 2.0, %v5697_v59 }
 0x694   : > { %v5843_v2 = vsel %vm4238_vm12, 1.0, %v7360_v8  ;;  %vm4239_vm13 = vcmp.gt.f32.partialorder %v7014_v62, %v5780_v40  ;;  %v3886_v1 = vadd.f32 %v3885_v55, %v7878_v56  ;;  %v3887_v3 = vpop.f32.mrb[165].mxu1  ;;  %v4121_v33 = vmul.f32 2.0, %v5694_v18  ;;  %v5698_v62 = vld [vmem:[%s7887_s10 + $0x558] sm:$0xff] }
 0x695   : > { %v7016_v4 = vpop.eup %7015  ;;  %v5844_v5 = vsel %vm4239_vm13, 1.0, %v7360_v8  ;;  %v3888_v58 = vadd.f32 %v3887_v3, %v7880_v9  ;;  %v3889_v10 = vpop.f32.mrb[166].mxu1  ;;  %v5788_v53 = vadd.f32 -1.0, %v4119_v27  ;;  %v4123_v3 = vmul.f32 2.0, %v5696_v45  ;;  %v5701_v27 = vld [vmem:[%s7887_s10 + $0x570] sm:$0xff] }
 0x696   : > { %v7018_v11 = vpop.eup %7017  ;;  %v5936_v22 = vpack.c.bf16 %v5844_v5, %v5843_v2  ;;  %vm4240_vm14 = vcmp.gt.f32.partialorder %v7016_v4, %v5781_v52  ;;  %v3990_v60 = vmul.f32 0.5, %v3886_v1  ;;  %v3890_v12 = vadd.f32 %v3889_v10, %v7878_v56  ;;  %v3891_v23 = vpop.f32.mrb[167].mxu1  ;;  %v5699_v4 = vld [vmem:[%s7887_s10 + $0x560] sm:$0xff] }
 0x697   : > { %v5845_v13 = vsel %vm4240_vm14, 1.0, %v7360_v8  ;;  %vm4241_vm15 = vcmp.gt.f32.partialorder %v7018_v11, %v5782_v51  ;;  %v3991_v14 = vmul.f32 0.5, %v3888_v58  ;;  %v3892_v21 = vadd.f32 %v3891_v23, %v7880_v9 }
 0x698   : > { %4608 = vst [vmem:[%s8428_s22 + $0x70] sm:$0xff] %v5936_v22  ;;  %v5846_v15 = vsel %vm4241_vm15, 1.0, %v7360_v8  ;;  %7027 = vtanh.f32 %v3990_v60  ;;  %v3992_v17 = vmul.f32 0.5, %v3890_v12  ;;  %v5790_v0 = vadd.f32 -1.0, %v4121_v33  ;;  %v5703_v33 = vld [vmem:[%s7887_s10 + $0x580] sm:$0xff] }
 0x699   : > { %v5937_v25 = vpack.c.bf16 %v5846_v15, %v5845_v13  ;;  %7029 = vtanh.f32 %v3991_v14  ;;  %v3993_v19 = vmul.f32 0.5, %v3892_v21  ;;  %v5791_v1 = vadd.f32 -1.0, %v4122_v49 }
 0x69a   : > { %v7020_v20 = vpop.eup %7019  ;;  %7031 = vtanh.f32 %v3992_v17  ;;  %v4125_v7 = vmul.f32 2.0, %v5698_v62  ;;  %v4126_v13 = vmul.f32 2.0, %v5699_v4 }
 0x69b   : > { %v7022_v57 = vpop.eup %7021  ;;  %4609 = vst [vmem:[%s8428_s22 + $0x78] sm:$0xff] %v5937_v25  ;;  %vm4242_vm0 = vcmp.gt.f32.partialorder %v7020_v20, %v5783_v54  ;;  %7033 = vtanh.f32 %v3993_v19  ;;  %v3895_v44 = vpop.f32.mrb[168].mxu1  ;;  %v5789_v54 = vadd.f32 -1.0, %v4120_v30  ;;  %v5700_v25 = vld [vmem:[%s7887_s10 + $0x568] sm:$0xff]  ;;  %v5793_v30 = vadd.f32 -1.0, %v4124_v6 }
 0x69c   : > { %v7024_v46 = vpop.eup %7023  ;;  %v5847_v32 = vsel %vm4242_vm0, 1.0, %v7360_v8  ;;  %vm4243_vm1 = vcmp.gt.f32.partialorder %v7022_v57, %v5784_v24  ;;  %v3896_v34 = vadd.f32 %v3895_v44, %v7878_v56  ;;  %v3897_v48 = vpop.f32.mrb[169].mxu1  ;;  %v5794_v44 = vadd.f32 -1.0, %v4125_v7 }
 0x69d   : > { %v7026_v35 = vpop.eup %7025  ;;  %v5848_v36 = vsel %vm4243_vm1, 1.0, %v7360_v8  ;;  %vm4244_vm2 = vcmp.gt.f32.partialorder %v7024_v46, %v5785_v61  ;;  %v3898_v37 = vadd.f32 %v3897_v48, %v7880_v9  ;;  %v3899_v38 = vpop.f32.mrb[170].mxu1  ;;  %v4127_v46 = vmul.f32 2.0, %v5700_v25 }
 0x69e   : > { %v5938_v39 = vpack.c.bf16 %v5848_v36, %v5847_v32  ;;  %v5849_v40 = vsel %vm4244_vm2, 1.0, %v7360_v8  ;;  %vm4245_vm3 = vcmp.gt.f32.partialorder %v7026_v35, %v5786_v26  ;;  %v3994_v41 = vmul.f32 0.5, %v3896_v34  ;;  %v3901_v42 = vpop.f32.mrb[171].mxu1  ;;  %v5702_v32 = vld [vmem:[%s7887_s10 + $0x578] sm:$0xff] }
 0x69f   : > { %v5850_v43 = vsel %vm4245_vm3, 1.0, %v7360_v8  ;;  %v3995_v50 = vmul.f32 0.5, %v3898_v37  ;;  %v3900_v47 = vadd.f32 %v3899_v38, %v7878_v56  ;;  %v3902_v52 = vadd.f32 %v3901_v42, %v7880_v9 }
 0x6a0   : > { %4610 = vst [vmem:[%s8428_s22 + $0x80] sm:$0xff] %v5938_v39  ;;  %v5939_v51 = vpack.c.bf16 %v5850_v43, %v5849_v40  ;;  %7035 = vtanh.f32 %v3994_v41  ;;  %v5792_v26 = vadd.f32 -1.0, %v4123_v3  ;;  %v5795_v48 = vadd.f32 -1.0, %v4126_v13  ;;  %v5705_v3 = vld [vmem:[%s7887_s10 + $0x590] sm:$0xff] }
 0x6a1   : > { %7037 = vtanh.f32 %v3995_v50  ;;  %v3996_v63 = vmul.f32 0.5, %v3900_v47  ;;  %v3997_v55 = vmul.f32 0.5, %v3902_v52  ;;  %v4128_v35 = vmul.f32 2.0, %v5701_v27 }
 0x6a2   : > { %v7028_v2 = vpop.eup %7027  ;;  %4611 = vst [vmem:[%s8428_s22 + $0x88] sm:$0xff] %v5939_v51  ;;  %v4129_v41 = vmul.f32 2.0, %v5702_v32  ;;  %v4130_v42 = vmul.f32 2.0, %v5703_v33  ;;  %v4132_v13 = vmul.f32 2.0, %v5705_v3  ;;  %v5712_v3 = vld [vmem:[%s7887_s10 + $0x5c8] sm:$0xff] }
 0x6a3   : > { %v7030_v5 = vpop.eup %7029  ;;  %vm4246_vm4 = vcmp.gt.f32.partialorder %v7028_v2, %v5787_v29  ;;  %7039 = vtanh.f32 %v3996_v63  ;;  %v3905_v58 = vpop.f32.mrb[172].mxu1  ;;  %v5704_v2 = vld [vmem:[%s7887_s10 + $0x588] sm:$0xff]  ;;  %v5797_v6 = vadd.f32 -1.0, %v4128_v35 }
 0x6a4   : > { %v7032_v10 = vpop.eup %7031  ;;  %v5851_v11 = vsel %vm4246_vm4, 1.0, %v7360_v8  ;;  %vm4247_vm5 = vcmp.gt.f32.partialorder %v7030_v5, %v5788_v53  ;;  %7041 = vtanh.f32 %v3997_v55  ;;  %v3906_v22 = vadd.f32 %v3905_v58, %v7878_v56  ;;  %v3907_v60 = vpop.f32.mrb[173].mxu1  ;;  %v5706_v58 = vld [vmem:[%s7887_s10 + $0x598] sm:$0xff] }
 0x6a5   : > { %v7034_v12 = vpop.eup %7033  ;;  %v5852_v23 = vsel %vm4247_vm5, 1.0, %v7360_v8  ;;  %vm4248_vm6 = vcmp.gt.f32.partialorder %v7032_v10, %v5789_v54  ;;  %v3908_v31 = vadd.f32 %v3907_v60, %v7880_v9  ;;  %v3909_v14 = vpop.f32.mrb[174].mxu1  ;;  %v5796_v55 = vadd.f32 -1.0, %v4127_v46  ;;  %v5707_v10 = vld [vmem:[%s7887_s10 + $0x5a0] sm:$0xff]  ;;  %v5709_v46 = vld [vmem:[%s7887_s10 + $0x5b0] sm:$0xff] }
 0x6a6   : > { %v5940_v21 = vpack.c.bf16 %v5852_v23, %v5851_v11  ;;  %v5853_v15 = vsel %vm4248_vm6, 1.0, %v7360_v8  ;;  %vm4249_vm7 = vcmp.gt.f32.partialorder %v7034_v12, %v5790_v0  ;;  %v3998_v24 = vmul.f32 0.5, %v3906_v22  ;;  %v3911_v16 = vpop.f32.mrb[175].mxu1 }
 0x6a7   : > { %v5854_v17 = vsel %vm4249_vm7, 1.0, %v7360_v8  ;;  %v3999_v61 = vmul.f32 0.5, %v3908_v31  ;;  %v3910_v18 = vadd.f32 %v3909_v14, %v7878_v56  ;;  %v3912_v19 = vadd.f32 %v3911_v16, %v7880_v9 }
 0x6a8   : > { %4612 = vst [vmem:[%s8428_s22 + $0x90] sm:$0xff] %v5940_v21  ;;  %v5941_v20 = vpack.c.bf16 %v5854_v17, %v5853_v15  ;;  %7043 = vtanh.f32 %v3998_v24  ;;  %v5798_v7 = vadd.f32 -1.0, %v4129_v41  ;;  %v5799_v22 = vadd.f32 -1.0, %v4130_v42 }
 0x6a9   : > { %7045 = vtanh.f32 %v3999_v61  ;;  %v4000_v28 = vmul.f32 0.5, %v3910_v18  ;;  %v4001_v57 = vmul.f32 0.5, %v3912_v19  ;;  %v4131_v60 = vmul.f32 2.0, %v5704_v2 }
 0x6aa   : > { %v7036_v29 = vpop.eup %7035  ;;  %4613 = vst [vmem:[%s8428_s22 + $0x98] sm:$0xff] %v5941_v20  ;;  %v4133_v24 = vmul.f32 2.0, %v5706_v58  ;;  %v4134_v16 = vmul.f32 2.0, %v5707_v10  ;;  %v4136_v41 = vmul.f32 2.0, %v5709_v46  ;;  %v5713_v10 = vld [vmem:[%s7887_s10 + $0x5d0] sm:$0xff] }
 0x6ab   : > { %v7038_v34 = vpop.eup %7037  ;;  %vm4250_vm8 = vcmp.gt.f32.partialorder %v7036_v29, %v5791_v1  ;;  %7047 = vtanh.f32 %v4000_v28  ;;  %v3915_v36 = vpop.f32.mrb[176].mxu1  ;;  %v5708_v28 = vld [vmem:[%s7887_s10 + $0x5a8] sm:$0xff] }
 0x6ac   : > { %v5855_v49 = vsel %vm4250_vm8, 1.0, %v7360_v8  ;;  %vm4251_vm9 = vcmp.gt.f32.partialorder %v7038_v34, %v5792_v26  ;;  %7049 = vtanh.f32 %v4001_v57  ;;  %v3916_v37 = vadd.f32 %v3915_v36, %v7878_v56  ;;  %v3917_v38 = vpop.f32.mrb[177].mxu1 }
 0x6ad   : > { %v7040_v39 = vpop.eup %7039  ;;  %v5856_v40 = vsel %vm4251_vm9, 1.0, %v7360_v8  ;;  %v3918_v43 = vadd.f32 %v3917_v38, %v7880_v9  ;;  %v3919_v45 = vpop.f32.mrb[178].mxu1  ;;  %v5801_v34 = vadd.f32 -1.0, %v4132_v13  ;;  %v5711_v38 = vld [vmem:[%s7887_s10 + $0x5c0] sm:$0xff]  ;;  %v4139_v13 = vmul.f32 2.0, %v5712_v3 }
 0x6ae   : > { %v7042_v50 = vpop.eup %7041  ;;  %v5942_v47 = vpack.c.bf16 %v5856_v40, %v5855_v49  ;;  %vm4252_vm10 = vcmp.gt.f32.partialorder %v7040_v39, %v5793_v30  ;;  %v4002_v52 = vmul.f32 0.5, %v3916_v37  ;;  %v3920_v51 = vadd.f32 %v3919_v45, %v7878_v56  ;;  %v3921_v53 = vpop.f32.mrb[179].mxu1 }
 0x6af   : > { %v5857_v59 = vsel %vm4252_vm10, 1.0, %v7360_v8  ;;  %vm4253_vm11 = vcmp.gt.f32.partialorder %v7042_v50, %v5794_v44  ;;  %v4003_v62 = vmul.f32 0.5, %v3918_v43  ;;  %v3922_v54 = vadd.f32 %v3921_v53, %v7880_v9 }
 0x6b0   : > { %4614 = vst [vmem:[%s8428_s22 + $0xa0] sm:$0xff] %v5942_v47  ;;  %v5858_v63 = vsel %vm4253_vm11, 1.0, %v7360_v8  ;;  %7051 = vtanh.f32 %v4002_v52  ;;  %v4004_v0 = vmul.f32 0.5, %v3920_v51  ;;  %v5800_v44 = vadd.f32 -1.0, %v4131_v60 }
 0x6b1   : > { %v5943_v1 = vpack.c.bf16 %v5858_v63, %v5857_v59  ;;  %7053 = vtanh.f32 %v4003_v62  ;;  %v4005_v4 = vmul.f32 0.5, %v3922_v54  ;;  %v5802_v49 = vadd.f32 -1.0, %v4133_v24 }
 0x6b2   : > { %v7044_v5 = vpop.eup %7043  ;;  %7055 = vtanh.f32 %v4004_v0  ;;  %v4135_v37 = vmul.f32 2.0, %v5708_v28  ;;  %v5803_v40 = vadd.f32 -1.0, %v4134_v16  ;;  %v4138_v59 = vmul.f32 2.0, %v5711_v38 }
 0x6b3   : > { %v7046_v11 = vpop.eup %7045  ;;  %4615 = vst [vmem:[%s8428_s22 + $0xa8] sm:$0xff] %v5943_v1  ;;  %vm4254_vm12 = vcmp.gt.f32.partialorder %v7044_v5, %v5795_v48  ;;  %7057 = vtanh.f32 %v4005_v4  ;;  %v3925_v12 = vpop.f32.mrb[180].mxu1  ;;  %v5710_v48 = vld [vmem:[%s7887_s10 + $0x5b8] sm:$0xff] }
 0x6b4   : > { %v5859_v23 = vsel %vm4254_vm12, 1.0, %v7360_v8  ;;  %vm4255_vm13 = vcmp.gt.f32.partialorder %v7046_v11, %v5796_v55  ;;  %v3926_v31 = vadd.f32 %v3925_v12, %v7878_v56  ;;  %v3927_v14 = vpop.f32.mrb[181].mxu1  ;;  %v4137_v50 = vmul.f32 2.0, %v5710_v48 }
 0x6b5   : > { %v7048_v21 = vpop.eup %7047  ;;  %v5860_v15 = vsel %vm4255_vm13, 1.0, %v7360_v8  ;;  %v3928_v17 = vadd.f32 %v3927_v14, %v7880_v9  ;;  %v3929_v25 = vpop.f32.mrb[182].mxu1  ;;  %v5804_v58 = vadd.f32 -1.0, %v4135_v37  ;;  %v5805_v11 = vadd.f32 -1.0, %v4136_v41 }
 0x6b6   : > { %v7050_v61 = vpop.eup %7049  ;;  %v5944_v18 = vpack.c.bf16 %v5860_v15, %v5859_v23  ;;  %vm4256_vm14 = vcmp.gt.f32.partialorder %v7048_v21, %v5797_v6  ;;  %v4006_v19 = vmul.f32 0.5, %v3926_v31  ;;  %v3930_v20 = vadd.f32 %v3929_v25, %v7878_v56  ;;  %v3931_v26 = vpop.f32.mrb[183].mxu1  ;;  %v5714_v31 = vld [vmem:[%s7887_s10 + $0x5d8] sm:$0xff] }
 0x6b7   : > { %v5861_v27 = vsel %vm4256_vm14, 1.0, %v7360_v8  ;;  %vm4257_vm15 = vcmp.gt.f32.partialorder %v7050_v61, %v5798_v7  ;;  %v4007_v57 = vmul.f32 0.5, %v3928_v17  ;;  %v3932_v29 = vadd.f32 %v3931_v26, %v7880_v9 }
 0x6b8   : > { %4616 = vst [vmem:[%s8428_s22 + $0xb0] sm:$0xff] %v5944_v18  ;;  %v5862_v30 = vsel %vm4257_vm15, 1.0, %v7360_v8  ;;  %7059 = vtanh.f32 %v4006_v19  ;;  %v4008_v32 = vmul.f32 0.5, %v3930_v20  ;;  %v5806_v23 = vadd.f32 -1.0, %v4137_v50 }
 0x6b9   : > { %v5945_v33 = vpack.c.bf16 %v5862_v30, %v5861_v27  ;;  %7061 = vtanh.f32 %v4007_v57  ;;  %v4009_v35 = vmul.f32 0.5, %v3932_v29  ;;  %v5807_v21 = vadd.f32 -1.0, %v4138_v59 }
 0x6ba   : > { %v7052_v36 = vpop.eup %7051  ;;  %7063 = vtanh.f32 %v4008_v32  ;;  %v4140_v15 = vmul.f32 2.0, %v5713_v10  ;;  %v4141_v20 = vmul.f32 2.0, %v5714_v31  ;;  %v5808_v48 = vadd.f32 -1.0, %v4139_v13 }
 0x6bb   : > { %v7054_v39 = vpop.eup %7053  ;;  %4617 = vst [vmem:[%s8428_s22 + $0xb8] sm:$0xff] %v5945_v33  ;;  %vm4258_vm0 = vcmp.gt.f32.partialorder %v7052_v36, %v5799_v22  ;;  %7065 = vtanh.f32 %v4009_v35  ;;  %v3935_v42 = vpop.f32.mrb[184].mxu1  ;;  %v5715_v35 = vld [vmem:[%s7887_s10 + $0x5e0] sm:$0xff]  ;;  %v5716_v36 = vld [vmem:[%s7887_s10 + $0x5e8] sm:$0xff] }
 0x6bc   : > { %v7056_v43 = vpop.eup %7055  ;;  %v5863_v45 = vsel %vm4258_vm0, 1.0, %v7360_v8  ;;  %vm4259_vm1 = vcmp.gt.f32.partialorder %v7054_v39, %v5800_v44  ;;  %v3936_v47 = vadd.f32 %v3935_v42, %v7878_v56  ;;  %v3937_v52 = vpop.f32.mrb[185].mxu1  ;;  %v5809_v39 = vadd.f32 -1.0, %v4140_v15  ;;  %v5717_v42 = vld [vmem:[%s7887_s10 + $0x5f0] sm:$0xff] }
 0x6bd   : > { %v7058_v51 = vpop.eup %7057  ;;  %v5864_v53 = vsel %vm4259_vm1, 1.0, %v7360_v8  ;;  %vm4260_vm2 = vcmp.gt.f32.partialorder %v7056_v43, %v5801_v34  ;;  %v3938_v62 = vadd.f32 %v3937_v52, %v7880_v9  ;;  %v3939_v54 = vpop.f32.mrb[186].mxu1  ;;  %v5810_v41 = vadd.f32 -1.0, %v4141_v20 }
 0x6be   : > { %v5946_v63 = vpack.c.bf16 %v5864_v53, %v5863_v45  ;;  %v5865_v55 = vsel %vm4260_vm2, 1.0, %v7360_v8  ;;  %vm4261_vm3 = vcmp.gt.f32.partialorder %v7058_v51, %v5802_v49  ;;  %v4010_v2 = vmul.f32 0.5, %v3936_v47  ;;  %v3941_v0 = vpop.f32.mrb[187].mxu1  ;;  %v5718_v45 = vld [vmem:[%s7887_s10 + $0x5f8] sm:$0xff] }
 0x6bf   : > { %v5866_v1 = vsel %vm4261_vm3, 1.0, %v7360_v8  ;;  %v4011_v4 = vmul.f32 0.5, %v3938_v62  ;;  %v3940_v5 = vadd.f32 %v3939_v54, %v7878_v56  ;;  %v3942_v6 = vadd.f32 %v3941_v0, %v7880_v9 }
 0x6c0   : > { %4618 = vst [vmem:[%s8428_s22 + $0xc0] sm:$0xff] %v5946_v63  ;;  %v5947_v7 = vpack.c.bf16 %v5866_v1, %v5865_v55  ;;  %7067 = vtanh.f32 %v4010_v2  ;;  %v4143_v43 = vmul.f32 2.0, %v5716_v36  ;;  %v4144_v53 = vmul.f32 2.0, %v5717_v42 }
 0x6c1   : > { %7069 = vtanh.f32 %v4011_v4  ;;  %v4012_v22 = vmul.f32 0.5, %v3940_v5  ;;  %v4013_v60 = vmul.f32 0.5, %v3942_v6  ;;  %v4145_v54 = vmul.f32 2.0, %v5718_v45 }
 0x6c2   : > { %v7060_v12 = vpop.eup %7059  ;;  %4619 = vst [vmem:[%s8428_s22 + $0xc8] sm:$0xff] %v5947_v7  ;;  %v5812_v55 = vadd.f32 -1.0, %v4143_v43  ;;  %v5813_v1 = vadd.f32 -1.0, %v4144_v53 }
 0x6c3   : > { %v7062_v14 = vpop.eup %7061  ;;  %vm4262_vm4 = vcmp.gt.f32.partialorder %v7060_v12, %v5803_v40  ;;  %7071 = vtanh.f32 %v4012_v22  ;;  %v3945_v24 = vpop.f32.mrb[188].mxu1  ;;  %v5814_v4 = vadd.f32 -1.0, %v4145_v54 }
 0x6c4   : > { %v7064_v16 = vpop.eup %7063  ;;  %v5867_v17 = vsel %vm4262_vm4, 1.0, %v7360_v8  ;;  %vm4263_vm5 = vcmp.gt.f32.partialorder %v7062_v14, %v5804_v58  ;;  %7073 = vtanh.f32 %v4013_v60  ;;  %v3946_v25 = vadd.f32 %v3945_v24, %v7878_v56  ;;  %v3947_v61 = vpop.f32.mrb[189].mxu1 }
 0x6c5   : > { %v7066_v18 = vpop.eup %7065  ;;  %v5868_v19 = vsel %vm4263_vm5, 1.0, %v7360_v8  ;;  %vm4264_vm6 = vcmp.gt.f32.partialorder %v7064_v16, %v5805_v11  ;;  %v3948_v26 = vadd.f32 %v3947_v61, %v7880_v9  ;;  %v3949_v27 = vpop.f32.mrb[190].mxu1 }
 0x6c6   : > { %v5948_v28 = vpack.c.bf16 %v5868_v19, %v5867_v17  ;;  %v5869_v57 = vsel %vm4264_vm6, 1.0, %v7360_v8  ;;  %vm4265_vm7 = vcmp.gt.f32.partialorder %v7066_v18, %v5806_v23  ;;  %v4014_v29 = vmul.f32 0.5, %v3946_v25  ;;  %v3951_v30 = vpop.f32.mrb[191].mxu1 }
 0x6c7   : > { %v5870_v44 = vsel %vm4265_vm7, 1.0, %v7360_v8  ;;  %v4015_v46 = vmul.f32 0.5, %v3948_v26  ;;  %v3950_v32 = vadd.f32 %v3949_v27, %v7878_v56  ;;  %v3952_v33 = vadd.f32 %v3951_v30, %v7880_v9 }
 0x6c8   : > { %4620 = vst [vmem:[%s8428_s22 + $0xd0] sm:$0xff] %v5948_v28  ;;  %v5949_v34 = vpack.c.bf16 %v5870_v44, %v5869_v57  ;;  %7075 = vtanh.f32 %v4014_v29  ;;  %v4142_v56 = vmul.f32 2.0, %v5715_v35 }
 0x6c9   : > { %7077 = vtanh.f32 %v4015_v46  ;;  %v4016_v49 = vmul.f32 0.5, %v3950_v32  ;;  %v4017_v37 = vmul.f32 0.5, %v3952_v33 }
 0x6ca   : > { %v7068_v38 = vpop.eup %7067  ;;  %4621 = vst [vmem:[%s8428_s22 + $0xd8] sm:$0xff] %v5949_v34  ;;  %v5811_v62 = vadd.f32 -1.0, %v4142_v56 }
 0x6cb   : > { %v7070_v40 = vpop.eup %7069  ;;  %vm4266_vm8 = vcmp.gt.f32.partialorder %v7068_v38, %v5807_v21  ;;  %7079 = vtanh.f32 %v4016_v49 }
 0x6cc   : > { %v5871_v9 = vsel %vm4266_vm8, 1.0, %v7360_v8  ;;  %vm4267_vm9 = vcmp.gt.f32.partialorder %v7070_v40, %v5808_v48  ;;  %7081 = vtanh.f32 %v4017_v37 }
 0x6cd   : > { %v7072_v50 = vpop.eup %7071  ;;  %v5872_v47 = vsel %vm4267_vm9, 1.0, %v7360_v8 }
 0x6ce   : > { %v7074_v52 = vpop.eup %7073  ;;  %v5950_v51 = vpack.c.bf16 %v5872_v47, %v5871_v9  ;;  %vm4268_vm10 = vcmp.gt.f32.partialorder %v7072_v50, %v5809_v39 }
 0x6cf   : > { %v5873_v59 = vsel %vm4268_vm10, 1.0, %v7360_v8  ;;  %vm4269_vm11 = vcmp.gt.f32.partialorder %v7074_v52, %v5810_v41 }
 0x6d0   : > { %4622 = vst [vmem:[%s8428_s22 + $0xe0] sm:$0xff] %v5950_v51  ;;  %v5874_v63 = vsel %vm4269_vm11, 1.0, %v7360_v8 }
 0x6d1   : > { %v5951_v2 = vpack.c.bf16 %v5874_v63, %v5873_v59 }
 0x6d2   : > { %v7076_v0 = vpop.eup %7075 }
 0x6d3   : > { %v7078_v3 = vpop.eup %7077  ;;  %4623 = vst [vmem:[%s8428_s22 + $0xe8] sm:$0xff] %v5951_v2  ;;  %vm4270_vm12 = vcmp.gt.f32.partialorder %v7076_v0, %v5811_v62 }
 0x6d4   : > { %v5875_v5 = vsel %vm4270_vm12, 1.0, %v7360_v8  ;;  %vm4271_vm13 = vcmp.gt.f32.partialorder %v7078_v3, %v5812_v55 }
 0x6d5   : > { %v7080_v6 = vpop.eup %7079  ;;  %v5876_v7 = vsel %vm4271_vm13, 1.0, %v7360_v8 }
 0x6d6   : > { %v7082_v58 = vpop.eup %7081  ;;  %v5952_v10 = vpack.c.bf16 %v5876_v7, %v5875_v5  ;;  %vm4272_vm14 = vcmp.gt.f32.partialorder %v7080_v6, %v5813_v1 }
 0x6d7   : > { %v5877_v11 = vsel %vm4272_vm14, 1.0, %v7360_v8  ;;  %vm4273_vm15 = vcmp.gt.f32.partialorder %v7082_v58, %v5814_v4 }
 0x6d8   : > { %4624 = vst [vmem:[%s8428_s22 + $0xf0] sm:$0xff] %v5952_v10  ;;  %v5878_v22 = vsel %vm4273_vm15, 1.0, %v7360_v8 }
 0x6d9   : > { %v5953_v60 = vpack.c.bf16 %v5878_v22, %v5877_v11 }
 0x6db   : > { %4625 = vst [vmem:[%s8428_s22 + $0xf8] sm:$0xff] %v5953_v60 }
 0x6dc   : > { %7268 = shalt.err (!%p7265_p5)
}
 0x6dd   : > { %s7269_s21 = scalar_lea.hbm %s8632_s14, 4096  ;;  %s7273_s15 = scalar_lea.hbm %s8686_s7, 8192 }
 0x6de   : > { %p7270_p13 = scmp.ne.s32.totalorder %s8632_s14, %s7269_s21  ;;  %p7274_p7 = scmp.lt.u32.totalorder %s8632_s14, %s8686_s7 }
 0x6df   : > { %p7275_p8 = scmp.lt.u32.totalorder %s7273_s15, %s7269_s21  ;;  %p7277_p1 = scmp.lt.u32.totalorder %s7269_s21, %s8632_s14 }
 0x6e0   : > { %p7271_p3 = pnand %p7270_p13, %p8716_p10 }
 0x6e1   : > { %p7276_p9 = por %p7275_p8, %p7274_p7 }
 0x6e2   : > { %p7272_p0 = pneg %p7271_p3 }
 0x6e3   : > { %p7278_p2 = por %p7277_p1, %p7276_p9 }
 0x6e5   : > { %p7279_p6 = pnand %p7278_p2, %p7272_p0 }
 0x6e7   : > { %7282 = shalt.err (!%p7279_p6)
}
 0x6e8   : > { %s7362_s12 = smov 128   ;;  %s7363_s10 = smov 8  }
 0x6e9   : > { %6332 = dma.vmem_to_hbm [thread:$0]  (%p8716_p10), %s8634_s9, 4096, %s8632_s14, %s4627_s28, %s7362_s12, %s7362_s12, %s7363_s10  }
 0x6ea PF: > { %s8717_s22 = sld [smem:[#allocation26_spill]]  ;;  %s8718_s8 = sld [smem:[#allocation29_spill]] }
 0x6f0   : > { %s4656_s1 = sand.u32 1, %s8717_s22   ;;  %p8719_p11 = scmp.ne.s32.totalorder %s8718_s8, 0 }
 0x6f1   : > { %s4657_s19 = scalar_lea.sflag [#allocation4], %s4656_s1 }
 0x6f2   : > { %p6348_p12 = pnand %p4801_p4, %p8719_p11 }
 0x6f4   : > { %7316 = dma.done.wait (!%p6348_p12), %s4657_s19, 4096  }
 0x6f5   : > { %7318 = vsyncadd (!%p6348_p12), %s4657_s19, 4294963200  ;;  %s8720_s27 = sld [smem:[#allocation27_spill]]  ;;  %s8721_s17 = sld [smem:[#allocation28_spill]] }
 0x6f6   : > { %s8722_s24 = smov %s7325_s25  ;;  %s8723_s25 = smov %s7329_s26 }
 0x6fb   : > { %p25_p5 = scmp.ge.s32.totalorder %s8720_s27, 4   ;;  %s8724_s26 = smov %s8721_s17 }
 0x6fd   :  { %27 = sbr.rel (!%p25_p5) target bundleno = 11 (0xb), region = 147 }
 0x704   :  { %4662 = vsyncpa [#allocation3], 1 }
 0x705   :  { %4664 = vsyncpa [#allocation3 + $0x1], 1 }
 0x706   :  { %4665 = vsyncpa [#allocation6], 1 }
 0x707   :  { %4666 = vsyncpa [#allocation9], 1 }
 0x708   :  { %4667 = vsyncpa [#allocation12], 1 }
 0x709   :  { %4669 = vsyncpa [#allocation12 + $0x1], 1 }
 0x70a   :  { %4670 = vsyncpa [#allocation4], 1 }
 0x70b   :  { %4672 = vsyncpa [#allocation4 + $0x1], 1 }

</bundles_post_ra>
